<compile_context>
chip_gen: v7x
topology: tpu7x:2x2x1
jax: 0.10.0
libtpu: 0.0.40
codegen_flags: <defaults>
</compile_context>

<pallas_src>
import functools
import math

import jax
import jax.numpy as jnp
from jax.experimental import pallas as pl
from jax.experimental.pallas import tpu as pltpu

_BN_EPS = 1e-5
_LANE = 128


def _round_up(x, m):
    return ((x + m - 1) // m) * m


@functools.lru_cache(maxsize=None)
def _vmem_limit_bytes():
    # ~3/4 of physical VMEM: ~96 MiB on v5e/v6e (128 MiB), ~48 MiB on v7x.
    try:
        cap = int(pltpu.get_tpu_info().vmem_capacity_bytes)
    except Exception:
        cap = 64 * 1024 * 1024
    return max(32 * 1024 * 1024, min((cap * 3) // 4, 96 * 1024 * 1024))


def _resident_spec(block_shape, index_map):
    """Constant-index block: single-buffered -> no wasted double-buffer VMEM."""
    try:
        return pl.BlockSpec(block_shape, index_map, pipeline_mode=pl.Buffered(1))
    except (TypeError, AttributeError):
        return pl.BlockSpec(block_shape, index_map)


# ---------------------------------------------------------------------------
# Kernel 1: conv1 = 3x3 conv (stride 1/2 via phase split) as 9 shifted
# unit-stride matmuls, plus optional fused 1x1 downsample conv.  Emits bf16
# activations and fp32 per-image partial BN statistics (sum, sum_sq).
# Grid: one step per image ("parallel" -> shards across TensorCores).
# ---------------------------------------------------------------------------
def _conv1_kernel(*refs, taps, ds_tap, ho, wo, cin_p, cout_p):
    if ds_tap is not None:
        ph_ref, w_ref, wd_ref, y_ref, st_ref, yd_ref, std_ref = refs
    else:
        ph_ref, w_ref, y_ref, st_ref = refs

    acc = None
    for t, (r0, c0) in enumerate(taps):
        a = ph_ref[0, r0:r0 + ho, c0:c0 + wo, :].reshape(ho * wo, cin_p)
        d = jnp.dot(a, w_ref[t], preferred_element_type=jnp.float32)
        acc = d if acc is None else acc + d

    y_ref[0] = acc.reshape(ho, wo, cout_p).astype(y_ref.dtype)     # bf16 out
    st_ref[0] = jnp.concatenate(                                   # one store
        [jnp.sum(acc, axis=0, keepdims=True),
         jnp.sum(acc * acc, axis=0, keepdims=True)], axis=0)

    if ds_tap is not None:
        r0, c0 = ds_tap
        ad = ph_ref[0, r0:r0 + ho, c0:c0 + wo, :].reshape(ho * wo, cin_p)
        accd = jnp.dot(ad, wd_ref[...], preferred_element_type=jnp.float32)
        yd_ref[0] = accd.reshape(ho, wo, cout_p).astype(yd_ref.dtype)
        std_ref[0] = jnp.concatenate(
            [jnp.sum(accd, axis=0, keepdims=True),
             jnp.sum(accd * accd, axis=0, keepdims=True)], axis=0)


def conv1_stats(phases, w9, wd, *, ho, wo, taps, ds_tap):
    n, ph_h, ph_w, cin_p = phases.shape
    cout_p = w9.shape[-1]
    has_ds = ds_tap is not None

    kernel = functools.partial(_conv1_kernel, taps=taps, ds_tap=ds_tap,
                               ho=ho, wo=wo, cin_p=cin_p, cout_p=cout_p)

    inputs = [phases, w9]
    in_specs = [pl.BlockSpec((1, ph_h, ph_w, cin_p), lambda i: (i, 0, 0, 0)),
                _resident_spec((9, cin_p, cout_p), lambda i: (0, 0, 0))]
    out_shapes = [jax.ShapeDtypeStruct((n, ho, wo, cout_p), jnp.bfloat16),
                  jax.ShapeDtypeStruct((n, 2, cout_p), jnp.float32)]
    out_specs = [pl.BlockSpec((1, ho, wo, cout_p), lambda i: (i, 0, 0, 0)),
                 pl.BlockSpec((1, 2, cout_p), lambda i: (i, 0, 0))]
    if has_ds:
        inputs.append(wd)
        in_specs.append(_resident_spec((cin_p, cout_p), lambda i: (0, 0)))
        out_shapes += [jax.ShapeDtypeStruct((n, ho, wo, cout_p), jnp.bfloat16),
                       jax.ShapeDtypeStruct((n, 2, cout_p), jnp.float32)]
        out_specs += [pl.BlockSpec((1, ho, wo, cout_p), lambda i: (i, 0, 0, 0)),
                      pl.BlockSpec((1, 2, cout_p), lambda i: (i, 0, 0))]

    n_mm = len(taps) + (1 if has_ds else 0)
    flops = 2 * n * ho * wo * cin_p * cout_p * n_mm
    bytes_in = sum(int(a.size) * a.dtype.itemsize for a in inputs)
    bytes_out = sum(math.prod(s.shape) * jnp.dtype(s.dtype).itemsize
                    for s in out_shapes)

    return pl.pallas_call(
        kernel,
        out_shape=tuple(out_shapes),
        grid=(n,),
        in_specs=in_specs,
        out_specs=tuple(out_specs),
        compiler_params=pltpu.CompilerParams(
            dimension_semantics=("parallel",),
            vmem_limit_bytes=_vmem_limit_bytes()),
        cost_estimate=pl.CostEstimate(flops=flops, transcendentals=0,
                                      bytes_accessed=bytes_in + bytes_out),
    )(*inputs)


# ---------------------------------------------------------------------------
# Kernel 2: conv2 with fused BN1-apply + ReLU + bf16 cast prologue.
# The normalized activation never touches HBM: it is written zero-bordered
# into a VMEM scratch of (ho+2, wo+2, C) and immediately consumed by the
# 9-tap matmuls.  Also emits fp32 partial BN2 statistics.
# ---------------------------------------------------------------------------
def _conv2_kernel(y1_ref, sc_ref, sh_ref, w_ref, y_ref, st_ref, pad_buf, *,
                  ho, wo, c):
    z = (y1_ref[0].astype(jnp.float32) * sc_ref[...].reshape(1, 1, c)
         + sh_ref[...].reshape(1, 1, c))
    z = jnp.maximum(z, 0.0).astype(pad_buf.dtype)

    # Zero-bordered halo in VMEM scratch; full clear each step is negligible
    # next to the matmuls and stays correct under megacore grid splitting.
    pad_buf[...] = jnp.zeros(pad_buf.shape, pad_buf.dtype)
    pad_buf[1:1 + ho, 1:1 + wo, :] = z

    acc = None
    for ky in range(3):
        for kx in range(3):
            a = pad_buf[ky:ky + ho, kx:kx + wo, :].reshape(ho * wo, c)
            d = jnp.dot(a, w_ref[ky * 3 + kx],
                        preferred_element_type=jnp.float32)
            acc = d if acc is None else acc + d

    y_ref[0] = acc.reshape(ho, wo, c).astype(y_ref.dtype)          # bf16 out
    st_ref[0] = jnp.concatenate(
        [jnp.sum(acc, axis=0, keepdims=True),
         jnp.sum(acc * acc, axis=0, keepdims=True)], axis=0)


def conv2_bn_relu_stats(y1, sc1, sh1, w9, *, ho, wo):
    n = y1.shape[0]
    c = y1.shape[-1]
    kernel = functools.partial(_conv2_kernel, ho=ho, wo=wo, c=c)

    flops = 2 * n * ho * wo * c * c * 9
    bytes_in = (int(y1.size) * y1.dtype.itemsize + int(w9.size) * w9.dtype.itemsize
                + 2 * c * 4)
    bytes_out = n * ho * wo * c * 2 + n * 2 * c * 4

    return pl.pallas_call(
        kernel,
        out_shape=(jax.ShapeDtypeStruct((n, ho, wo, c), jnp.bfloat16),
                   jax.ShapeDtypeStruct((n, 2, c), jnp.float32)),
        grid=(n,),
        in_specs=[pl.BlockSpec((1, ho, wo, c), lambda i: (i, 0, 0, 0)),
                  _resident_spec((1, c), lambda i: (0, 0)),
                  _resident_spec((1, c), lambda i: (0, 0)),
                  _resident_spec((9, c, c), lambda i: (0, 0, 0))],
        out_specs=(pl.BlockSpec((1, ho, wo, c), lambda i: (i, 0, 0, 0)),
                   pl.BlockSpec((1, 2, c), lambda i: (i, 0, 0))),
        scratch_shapes=[pltpu.VMEM((ho + 2, wo + 2, c), jnp.bfloat16)],
        compiler_params=pltpu.CompilerParams(
            dimension_semantics=("parallel",),
            vmem_limit_bytes=_vmem_limit_bytes()),
        cost_estimate=pl.CostEstimate(flops=flops, transcendentals=0,
                                      bytes_accessed=bytes_in + bytes_out),
    )(y1, sc1, sh1, w9)


# ---------------------------------------------------------------------------
# Kernel 3: final fused BN2-apply + residual (+ residual-BN) + ReLU.
# M-tiled, lane-dense.  Identity residual is a plain bf16 add (no per-element
# scale/shift work).
# ---------------------------------------------------------------------------
def _bn2_res_relu_kernel(*refs, res_affine):
    if res_affine:
        y_ref, sc_ref, sh_ref, r_ref, rsc_ref, rsh_ref, o_ref = refs
    else:
        y_ref, sc_ref, sh_ref, r_ref, o_ref = refs
    z = y_ref[...].astype(jnp.float32) * sc_ref[...] + sh_ref[...]
    if res_affine:
        z = z + r_ref[...].astype(jnp.float32) * rsc_ref[...] + rsh_ref[...]
    else:
        z = z + r_ref[...].astype(jnp.float32)
    o_ref[...] = jnp.maximum(z, 0.0).astype(o_ref.dtype)


def bn2_res_relu(y, scale, shift, residual, res_scale=None, res_shift=None, *,
                 out_dtype, tile_m=1024):
    m, c = y.shape
    res_affine = res_scale is not None

    tm = min(tile_m, _round_up(m, 8))
    mp = _round_up(m, tm)
    if mp != m:
        y = jnp.pad(y, ((0, mp - m), (0, 0)))
        residual = jnp.pad(residual, ((0, mp - m), (0, 0)))

    kernel = functools.partial(_bn2_res_relu_kernel, res_affine=res_affine)
    inputs = [y, scale, shift, residual]
    in_specs = [pl.BlockSpec((tm, c), lambda i: (i, 0)),
                _resident_spec((1, c), lambda i: (0, 0)),
                _resident_spec((1, c), lambda i: (0, 0)),
                pl.BlockSpec((tm, c), lambda i: (i, 0))]
    if res_affine:
        inputs += [res_scale, res_shift]
        in_specs += [_resident_spec((1, c), lambda i: (0, 0)),
                     _resident_spec((1, c), lambda i: (0, 0))]

    bytes_in = sum(int(a.size) * a.dtype.itemsize for a in inputs)
    bytes_out = mp * c * jnp.dtype(out_dtype).itemsize

    out = pl.pallas_call(
        kernel,
        out_shape=jax.ShapeDtypeStruct((mp, c), out_dtype),
        grid=(mp // tm,),
        in_specs=in_specs,
        out_specs=pl.BlockSpec((tm, c), lambda i: (i, 0)),
        compiler_params=pltpu.CompilerParams(
            dimension_semantics=("parallel",),
            vmem_limit_bytes=_vmem_limit_bytes()),
        cost_estimate=pl.CostEstimate(
            flops=(6 if res_affine else 4) * mp * c, transcendentals=0,
            bytes_accessed=bytes_in + bytes_out),
    )(*inputs)
    return out[:m] if mp != m else out


# ---------------------------------------------------------------------------
# Parameter prep (once, outside the hot path): lane padding, bf16 cast,
# (9, Cin_p, Cout_p) tap layout.
# ---------------------------------------------------------------------------
def _prep_conv3x3_weight(w, cin_p, cout_p):
    cout, cin = w.shape[0], w.shape[1]
    wt = jnp.transpose(w, (2, 3, 1, 0)).reshape(9, cin, cout)   # t = ky*3+kx
    wt = jnp.pad(wt, ((0, 0), (0, cin_p - cin), (0, cout_p - cout)))
    return wt.astype(jnp.bfloat16)


def _prep_conv1x1_weight(w, cin_p, cout_p):
    cout, cin = w.shape[0], w.shape[1]
    wt = jnp.transpose(w, (2, 3, 1, 0)).reshape(cin, cout)
    wt = jnp.pad(wt, ((0, cin_p - cin), (0, cout_p - cout)))
    return wt.astype(jnp.bfloat16)


def _prep_gamma_beta(g, b, cout_p):
    c = g.shape[0]
    gp = jnp.pad(g.astype(jnp.float32), (0, cout_p - c), constant_values=1.0)
    bp = jnp.pad(b.astype(jnp.float32), (0, cout_p - c))
    return gp, bp


def prepare_params(params, cin, cout, stride):
    cin_p, cout_p = _round_up(cin, _LANE), _round_up(cout, _LANE)
    has_ds = (stride != 1) or (cin != cout)
    p = {"w1": _prep_conv3x3_weight(params["w1"], cin_p, cout_p),
         "w2": _prep_conv3x3_weight(params["w2"], cout_p, cout_p)}
    p["g1"], p["b1"] = _prep_gamma_beta(params["g1"], params["b1"], cout_p)
    p["g2"], p["b2"] = _prep_gamma_beta(params["g2"], params["b2"], cout_p)
    if has_ds:
        p["wd"] = _prep_conv1x1_weight(params["wd"], cin_p, cout_p)
        p["gd"], p["bd"] = _prep_gamma_beta(params["gd"], params["bd"], cout_p)
    return p


# ---------------------------------------------------------------------------
# BN stats finalization (tiny XLA op on per-channel sums).
# ---------------------------------------------------------------------------
def _scale_shift(stats, count, gamma_p, beta_p, eps=_BN_EPS):
    # NOTE: E[y^2] - mean^2 in fp32 can cancel for very large M / large-mean
    # activations; switch to centered partial sums if tighter accuracy needed.
    s = jnp.sum(stats, axis=0)                      # (2, C)
    mean = s[0] / count
    var = jnp.maximum(s[1] / count - mean * mean, 0.0)
    scale = gamma_p * jax.lax.rsqrt(var + eps)
    shift = beta_p - mean * scale
    return scale.reshape(1, -1), shift.reshape(1, -1)


# ---------------------------------------------------------------------------
# Stride-parity phase split: turns every 3x3 tap (incl. stride 2) into a
# unit-stride static slice usable inside the kernel.  Total bytes == |x_pad|.
# ---------------------------------------------------------------------------
def _build_phases(x_pad, ho, wo, stride):
    if stride == 1:
        taps = tuple((ky, kx) for ky in range(3) for kx in range(3))
        return x_pad, taps, (1, 1)                  # ds tap = centre pixel
    assert stride == 2, "only stride 1 / 2 supported"
    _, hp, wp, _ = x_pad.shape
    hh, wh = ho + 1, wo + 1
    need_h, need_w = 2 * ho + 2, 2 * wo + 2
    x_pad = jnp.pad(x_pad, ((0, 0), (0, max(0, need_h - hp)),
                            (0, max(0, need_w - wp)), (0, 0)))
    planes = [x_pad[:, a:a + 2 * ho + 1:2, b:b + 2 * wo + 1:2, :]
              for a in (0, 1) for b in (0, 1)]
    phases = jnp.concatenate(planes, axis=1)        # (N, 4*hh, wh, C)

    def tap(ky, kx):
        p = (ky % 2) * 2 + (kx % 2)
        return (p * hh + ky // 2, kx // 2)

    taps = tuple(tap(ky, kx) for ky in range(3) for kx in range(3))
    return phases, taps, tap(1, 1)                  # x[2i,2j] == tap(1,1)


# ---------------------------------------------------------------------------
# Forward pass
# ---------------------------------------------------------------------------
def mix_block_forward(x_nchw, prepped, *, stride, cout):
    n, cin, h, w = x_nchw.shape
    cin_p = prepped["w1"].shape[1]
    cout_p = prepped["w1"].shape[-1]
    has_ds = "wd" in prepped

    ho = (h + 2 - 3) // stride + 1
    wo = (w + 2 - 3) // stride + 1
    count = n * ho * wo
    m = n * ho * wo

    # One fused XLA producer: NCHW->NHWC + channel pad + spatial pad + bf16.
    x_pad = jnp.pad(jnp.transpose(x_nchw, (0, 2, 3, 1)),
                    ((0, 0), (1, 1), (1, 1), (0, cin_p - cin))
                    ).astype(jnp.bfloat16)
    phases, taps, ds_tap = _build_phases(x_pad, ho, wo, stride)

    # conv1 (+ fused downsample 1x1 conv) + partial BN statistics.
    if has_ds:
        y1, st1, yd, std = conv1_stats(phases, prepped["w1"], prepped["wd"],
                                       ho=ho, wo=wo, taps=taps, ds_tap=ds_tap)
    else:
        y1, st1 = conv1_stats(phases, prepped["w1"], None,
                              ho=ho, wo=wo, taps=taps, ds_tap=None)

    sc1, sh1 = _scale_shift(st1, count, prepped["g1"], prepped["b1"])

    # conv2 with fused BN1 + ReLU prologue (no HBM round trip for h1).
    y2, st2 = conv2_bn_relu_stats(y1, sc1, sh1, prepped["w2"], ho=ho, wo=wo)
    sc2, sh2 = _scale_shift(st2, count, prepped["g2"], prepped["b2"])

    # Residual path + BN2 + ReLU in one M-tiled lane-dense pass.
    if has_ds:
        scd, shd = _scale_shift(std, count, prepped["gd"], prepped["bd"])
        out = bn2_res_relu(y2.reshape(m, cout_p), sc2, sh2,
                           yd.reshape(m, cout_p), scd, shd,
                           out_dtype=jnp.float32)
    else:  # identity: stride == 1 and cin == cout  ->  cin_p == cout_p
        res = x_pad[:, 1:1 + h, 1:1 + w, :].reshape(m, cin_p)   # bf16
        out = bn2_res_relu(y2.reshape(m, cout_p), sc2, sh2, res,
                           out_dtype=jnp.float32)

    out = out[:, :cout].reshape(n, ho, wo, cout)
    return jnp.transpose(out, (0, 3, 1, 2))         # back to NCHW


# ---------------------------------------------------------------------------
# Pure-JAX fp32 reference (PyTorch training-mode BN semantics).
# ---------------------------------------------------------------------------
def _bn_train_ref(y, gamma, beta, eps=_BN_EPS):
    mean = jnp.mean(y, axis=(0, 2, 3), keepdims=True)
    var = jnp.mean(jnp.square(y - mean), axis=(0, 2, 3), keepdims=True)
    return ((y - mean) * jax.lax.rsqrt(var + eps) * gamma.reshape(1, -1, 1, 1)
            + beta.reshape(1, -1, 1, 1))


def _conv_nchw(x, w, stride, pad):
    return jax.lax.conv_general_dilated(
        x, w, window_strides=(stride, stride),
        padding=[(pad, pad), (pad, pad)],
        dimension_numbers=("NCHW", "OIHW", "NCHW"))


def residual_block_ref(x, p, stride=1):
    out = jax.nn.relu(_bn_train_ref(_conv_nchw(x, p["w1"], stride, 1),
                                    p["g1"], p["b1"]))
    out = _bn_train_ref(_conv_nchw(out, p["w2"], 1, 1), p["g2"], p["b2"])
    if stride != 1 or x.shape[1] != p["w1"].shape[0]:
        ds = _bn_train_ref(_conv_nchw(x, p["wd"], stride, 0), p["gd"], p["bd"])
    else:
        ds = x
    return jax.nn.relu(out + ds)


# ---------------------------------------------------------------------------
if __name__ == "__main__":
    # --- case 1: stride-2 downsample branch --------------------------------
    key = jax.random.PRNGKey(0)
    N, Cin, H, W = 2, 4, 16, 16
    Cout, stride = 8, 2

    k_x, k1, k2, kd = jax.random.split(key, 4)
    x = jax.random.normal(k_x, (N, Cin, H, W), dtype=jnp.float32)
    params = {
        "w1": 0.1 * jax.random.normal(k1, (Cout, Cin, 3, 3), jnp.float32),
        "g1": jnp.ones((Cout,), jnp.float32),
        "b1": jnp.zeros((Cout,), jnp.float32),
        "w2": 0.1 * jax.random.normal(k2, (Cout, Cout, 3, 3), jnp.float32),
        "g2": jnp.ones((Cout,), jnp.float32),
        "b2": jnp.zeros((Cout,), jnp.float32),
        "wd": 0.1 * jax.random.normal(kd, (Cout, Cin, 1, 1), jnp.float32),
        "gd": jnp.ones((Cout,), jnp.float32),
        "bd": jnp.zeros((Cout,), jnp.float32),
    }

    prepped = prepare_params(params, Cin, Cout, stride)
    fwd = jax.jit(functools.partial(mix_block_forward, stride=stride, cout=Cout))
    out = fwd(x, prepped)
    jax.block_until_ready(out)
    assert out.shape == (N, Cout, H // stride, W // stride), out.shape

    ref = residual_block_ref(x, params, stride=stride)
    # Tolerance accounts for bf16 activations/weights vs the fp32 reference.
    assert jnp.allclose(out, ref, atol=5e-2, rtol=5e-2), \
        float(jnp.max(jnp.abs(out - ref)))

    # --- case 2: identity residual (stride=1, Cin==Cout) --------------------
    N2, C2, H2, W2 = 2, 8, 16, 16
    k_x2, k21, k22 = jax.random.split(jax.random.PRNGKey(1), 3)
    x2 = jax.random.normal(k_x2, (N2, C2, H2, W2), jnp.float32)
    params2 = {
        "w1": 0.1 * jax.random.normal(k21, (C2, C2, 3, 3), jnp.float32),
        "g1": jnp.ones((C2,), jnp.float32),
        "b1": jnp.zeros((C2,), jnp.float32),
        "w2": 0.1 * jax.random.normal(k22, (C2, C2, 3, 3), jnp.float32),
        "g2": jnp.ones((C2,), jnp.float32),
        "b2": jnp.zeros((C2,), jnp.float32),
    }
    prepped2 = prepare_params(params2, C2, C2, 1)
    fwd2 = jax.jit(functools.partial(mix_block_forward, stride=1, cout=C2))
    out2 = fwd2(x2, prepped2)
    jax.block_until_ready(out2)
    ref2 = residual_block_ref(x2, params2, stride=1)
    assert jnp.allclose(out2, ref2, atol=5e-2, rtol=5e-2), \
        float(jnp.max(jnp.abs(out2 - ref2)))

    print("KERNEL_OK")
</pallas_src>

<mosaic_0001>
module attributes {stable_mosaic.version = 11 : i64} {
  func.func @_conv1_kernel(%arg0: i32, %arg1: memref<1x36x9x128xbf16, #tpu.memory_space<vmem>>, %arg2: memref<9x128x128xbf16, #tpu.memory_space<vmem>>, %arg3: memref<128x128xbf16, #tpu.memory_space<vmem>>, %arg4: memref<1x8x8x128xbf16, #tpu.memory_space<vmem>>, %arg5: memref<1x2x128xf32, #tpu.memory_space<vmem>>, %arg6: memref<1x8x8x128xbf16, #tpu.memory_space<vmem>>, %arg7: memref<1x2x128xf32, #tpu.memory_space<vmem>>) attributes {dimension_semantics = [#tpu.dimension_semantics<parallel>], iteration_bounds = array<i64: 2>, scalar_prefetch = 0 : i64, scratch_operands = 0 : i64, tpu.core_type = #tpu.core_type<tc>, window_params = [{transform_indices = @transform_0, window_bounds = array<i64: 1, 36, 9, 128>}, {pipeline_mode = #tpu.pipeline_mode<synchronous>, transform_indices = @transform_1, window_bounds = array<i64: 9, 128, 128>}, {pipeline_mode = #tpu.pipeline_mode<synchronous>, transform_indices = @transform_2, window_bounds = array<i64: 128, 128>}, {transform_indices = @transform_3, window_bounds = array<i64: 1, 8, 8, 128>}, {transform_indices = @transform_4, window_bounds = array<i64: 1, 2, 128>}, {transform_indices = @transform_5, window_bounds = array<i64: 1, 8, 8, 128>}, {transform_indices = @transform_6, window_bounds = array<i64: 1, 2, 128>}]} {
    %c0 = arith.constant 0 : index
    %c0_0 = arith.constant 0 : index
    %c0_1 = arith.constant 0 : index
    %c0_2 = arith.constant 0 : index
    %0 = vector.load %arg1[%c0, %c0_0, %c0_1, %c0_2] : memref<1x36x9x128xbf16, #tpu.memory_space<vmem>>, vector<1x8x8x128xbf16>
    %1 = vector.shape_cast %0 : vector<1x8x8x128xbf16> to vector<8x8x128xbf16>
    %2 = vector.shape_cast %1 : vector<8x8x128xbf16> to vector<64x128xbf16>
    %c0_3 = arith.constant 0 : index
    %c0_4 = arith.constant 0 : index
    %c0_5 = arith.constant 0 : index
    %3 = vector.load %arg2[%c0_3, %c0_4, %c0_5] : memref<9x128x128xbf16, #tpu.memory_space<vmem>>, vector<1x128x128xbf16>
    %4 = vector.shape_cast %3 : vector<1x128x128xbf16> to vector<128x128xbf16>
    %cst = arith.constant dense<0.000000e+00> : vector<64x128xf32>
    %5 = tpu.matmul %2, %4, %cst {dimension_numbers = #tpu.dot_dimension_numbers<[1], [0], [0], [1], [0, 0, 1, 1], [], []>} : vector<64x128xbf16>, vector<128x128xbf16>, vector<64x128xf32> -> vector<64x128xf32>
    %c0_6 = arith.constant 0 : index
    %c9 = arith.constant 9 : index
    %c0_7 = arith.constant 0 : index
    %c0_8 = arith.constant 0 : index
    %6 = vector.load %arg1[%c0_6, %c9, %c0_7, %c0_8] : memref<1x36x9x128xbf16, #tpu.memory_space<vmem>>, vector<1x8x8x128xbf16>
    %7 = vector.shape_cast %6 : vector<1x8x8x128xbf16> to vector<8x8x128xbf16>
    %8 = vector.shape_cast %7 : vector<8x8x128xbf16> to vector<64x128xbf16>
    %c1 = arith.constant 1 : index
    %c0_9 = arith.constant 0 : index
    %c0_10 = arith.constant 0 : index
    %9 = vector.load %arg2[%c1, %c0_9, %c0_10] : memref<9x128x128xbf16, #tpu.memory_space<vmem>>, vector<1x128x128xbf16>
    %10 = vector.shape_cast %9 : vector<1x128x128xbf16> to vector<128x128xbf16>
    %cst_11 = arith.constant dense<0.000000e+00> : vector<64x128xf32>
    %11 = tpu.matmul %8, %10, %cst_11 {dimension_numbers = #tpu.dot_dimension_numbers<[1], [0], [0], [1], [0, 0, 1, 1], [], []>} : vector<64x128xbf16>, vector<128x128xbf16>, vector<64x128xf32> -> vector<64x128xf32>
    %12 = arith.addf %5, %11 : vector<64x128xf32>
    %c0_12 = arith.constant 0 : index
    %c0_13 = arith.constant 0 : index
    %c1_14 = arith.constant 1 : index
    %c0_15 = arith.constant 0 : index
    %13 = vector.load %arg1[%c0_12, %c0_13, %c1_14, %c0_15] : memref<1x36x9x128xbf16, #tpu.memory_space<vmem>>, vector<1x8x8x128xbf16>
    %14 = vector.shape_cast %13 : vector<1x8x8x128xbf16> to vector<8x8x128xbf16>
    %15 = vector.shape_cast %14 : vector<8x8x128xbf16> to vector<64x128xbf16>
    %c2 = arith.constant 2 : index
    %c0_16 = arith.constant 0 : index
    %c0_17 = arith.constant 0 : index
    %16 = vector.load %arg2[%c2, %c0_16, %c0_17] : memref<9x128x128xbf16, #tpu.memory_space<vmem>>, vector<1x128x128xbf16>
    %17 = vector.shape_cast %16 : vector<1x128x128xbf16> to vector<128x128xbf16>
    %cst_18 = arith.constant dense<0.000000e+00> : vector<64x128xf32>
    %18 = tpu.matmul %15, %17, %cst_18 {dimension_numbers = #tpu.dot_dimension_numbers<[1], [0], [0], [1], [0, 0, 1, 1], [], []>} : vector<64x128xbf16>, vector<128x128xbf16>, vector<64x128xf32> -> vector<64x128xf32>
    %19 = arith.addf %12, %18 : vector<64x128xf32>
    %c0_19 = arith.constant 0 : index
    %c18 = arith.constant 18 : index
    %c0_20 = arith.constant 0 : index
    %c0_21 = arith.constant 0 : index
    %20 = vector.load %arg1[%c0_19, %c18, %c0_20, %c0_21] : memref<1x36x9x128xbf16, #tpu.memory_space<vmem>>, vector<1x8x8x128xbf16>
    %21 = vector.shape_cast %20 : vector<1x8x8x128xbf16> to vector<8x8x128xbf16>
    %22 = vector.shape_cast %21 : vector<8x8x128xbf16> to vector<64x128xbf16>
    %c3 = arith.constant 3 : index
    %c0_22 = arith.constant 0 : index
    %c0_23 = arith.constant 0 : index
    %23 = vector.load %arg2[%c3, %c0_22, %c0_23] : memref<9x128x128xbf16, #tpu.memory_space<vmem>>, vector<1x128x128xbf16>
    %24 = vector.shape_cast %23 : vector<1x128x128xbf16> to vector<128x128xbf16>
    %cst_24 = arith.constant dense<0.000000e+00> : vector<64x128xf32>
    %25 = tpu.matmul %22, %24, %cst_24 {dimension_numbers = #tpu.dot_dimension_numbers<[1], [0], [0], [1], [0, 0, 1, 1], [], []>} : vector<64x128xbf16>, vector<128x128xbf16>, vector<64x128xf32> -> vector<64x128xf32>
    %26 = arith.addf %19, %25 : vector<64x128xf32>
    %c0_25 = arith.constant 0 : index
    %c27 = arith.constant 27 : index
    %c0_26 = arith.constant 0 : index
    %c0_27 = arith.constant 0 : index
    %27 = vector.load %arg1[%c0_25, %c27, %c0_26, %c0_27] : memref<1x36x9x128xbf16, #tpu.memory_space<vmem>>, vector<1x8x8x128xbf16>
    %28 = vector.shape_cast %27 : vector<1x8x8x128xbf16> to vector<8x8x128xbf16>
    %29 = vector.shape_cast %28 : vector<8x8x128xbf16> to vector<64x128xbf16>
    %c4 = arith.constant 4 : index
    %c0_28 = arith.constant 0 : index
    %c0_29 = arith.constant 0 : index
    %30 = vector.load %arg2[%c4, %c0_28, %c0_29] : memref<9x128x128xbf16, #tpu.memory_space<vmem>>, vector<1x128x128xbf16>
    %31 = vector.shape_cast %30 : vector<1x128x128xbf16> to vector<128x128xbf16>
    %cst_30 = arith.constant dense<0.000000e+00> : vector<64x128xf32>
    %32 = tpu.matmul %29, %31, %cst_30 {dimension_numbers = #tpu.dot_dimension_numbers<[1], [0], [0], [1], [0, 0, 1, 1], [], []>} : vector<64x128xbf16>, vector<128x128xbf16>, vector<64x128xf32> -> vector<64x128xf32>
    %33 = arith.addf %26, %32 : vector<64x128xf32>
    %c0_31 = arith.constant 0 : index
    %c18_32 = arith.constant 18 : index
    %c1_33 = arith.constant 1 : index
    %c0_34 = arith.constant 0 : index
    %34 = vector.load %arg1[%c0_31, %c18_32, %c1_33, %c0_34] : memref<1x36x9x128xbf16, #tpu.memory_space<vmem>>, vector<1x8x8x128xbf16>
    %35 = vector.shape_cast %34 : vector<1x8x8x128xbf16> to vector<8x8x128xbf16>
    %36 = vector.shape_cast %35 : vector<8x8x128xbf16> to vector<64x128xbf16>
    %c5 = arith.constant 5 : index
    %c0_35 = arith.constant 0 : index
    %c0_36 = arith.constant 0 : index
    %37 = vector.load %arg2[%c5, %c0_35, %c0_36] : memref<9x128x128xbf16, #tpu.memory_space<vmem>>, vector<1x128x128xbf16>
    %38 = vector.shape_cast %37 : vector<1x128x128xbf16> to vector<128x128xbf16>
    %cst_37 = arith.constant dense<0.000000e+00> : vector<64x128xf32>
    %39 = tpu.matmul %36, %38, %cst_37 {dimension_numbers = #tpu.dot_dimension_numbers<[1], [0], [0], [1], [0, 0, 1, 1], [], []>} : vector<64x128xbf16>, vector<128x128xbf16>, vector<64x128xf32> -> vector<64x128xf32>
    %40 = arith.addf %33, %39 : vector<64x128xf32>
    %c0_38 = arith.constant 0 : index
    %c1_39 = arith.constant 1 : index
    %c0_40 = arith.constant 0 : index
    %c0_41 = arith.constant 0 : index
    %41 = vector.load %arg1[%c0_38, %c1_39, %c0_40, %c0_41] : memref<1x36x9x128xbf16, #tpu.memory_space<vmem>>, vector<1x8x8x128xbf16>
    %42 = vector.shape_cast %41 : vector<1x8x8x128xbf16> to vector<8x8x128xbf16>
    %43 = vector.shape_cast %42 : vector<8x8x128xbf16> to vector<64x128xbf16>
    %c6 = arith.constant 6 : index
    %c0_42 = arith.constant 0 : index
    %c0_43 = arith.constant 0 : index
    %44 = vector.load %arg2[%c6, %c0_42, %c0_43] : memref<9x128x128xbf16, #tpu.memory_space<vmem>>, vector<1x128x128xbf16>
    %45 = vector.shape_cast %44 : vector<1x128x128xbf16> to vector<128x128xbf16>
    %cst_44 = arith.constant dense<0.000000e+00> : vector<64x128xf32>
    %46 = tpu.matmul %43, %45, %cst_44 {dimension_numbers = #tpu.dot_dimension_numbers<[1], [0], [0], [1], [0, 0, 1, 1], [], []>} : vector<64x128xbf16>, vector<128x128xbf16>, vector<64x128xf32> -> vector<64x128xf32>
    %47 = arith.addf %40, %46 : vector<64x128xf32>
    %c0_45 = arith.constant 0 : index
    %c10 = arith.constant 10 : index
    %c0_46 = arith.constant 0 : index
    %c0_47 = arith.constant 0 : index
    %48 = vector.load %arg1[%c0_45, %c10, %c0_46, %c0_47] : memref<1x36x9x128xbf16, #tpu.memory_space<vmem>>, vector<1x8x8x128xbf16>
    %49 = vector.shape_cast %48 : vector<1x8x8x128xbf16> to vector<8x8x128xbf16>
    %50 = vector.shape_cast %49 : vector<8x8x128xbf16> to vector<64x128xbf16>
    %c7 = arith.constant 7 : index
    %c0_48 = arith.constant 0 : index
    %c0_49 = arith.constant 0 : index
    %51 = vector.load %arg2[%c7, %c0_48, %c0_49] : memref<9x128x128xbf16, #tpu.memory_space<vmem>>, vector<1x128x128xbf16>
    %52 = vector.shape_cast %51 : vector<1x128x128xbf16> to vector<128x128xbf16>
    %cst_50 = arith.constant dense<0.000000e+00> : vector<64x128xf32>
    %53 = tpu.matmul %50, %52, %cst_50 {dimension_numbers = #tpu.dot_dimension_numbers<[1], [0], [0], [1], [0, 0, 1, 1], [], []>} : vector<64x128xbf16>, vector<128x128xbf16>, vector<64x128xf32> -> vector<64x128xf32>
    %54 = arith.addf %47, %53 : vector<64x128xf32>
    %c0_51 = arith.constant 0 : index
    %c1_52 = arith.constant 1 : index
    %c1_53 = arith.constant 1 : index
    %c0_54 = arith.constant 0 : index
    %55 = vector.load %arg1[%c0_51, %c1_52, %c1_53, %c0_54] : memref<1x36x9x128xbf16, #tpu.memory_space<vmem>>, vector<1x8x8x128xbf16>
    %56 = vector.shape_cast %55 : vector<1x8x8x128xbf16> to vector<8x8x128xbf16>
    %57 = vector.shape_cast %56 : vector<8x8x128xbf16> to vector<64x128xbf16>
    %c8 = arith.constant 8 : index
    %c0_55 = arith.constant 0 : index
    %c0_56 = arith.constant 0 : index
    %58 = vector.load %arg2[%c8, %c0_55, %c0_56] : memref<9x128x128xbf16, #tpu.memory_space<vmem>>, vector<1x128x128xbf16>
    %59 = vector.shape_cast %58 : vector<1x128x128xbf16> to vector<128x128xbf16>
    %cst_57 = arith.constant dense<0.000000e+00> : vector<64x128xf32>
    %60 = tpu.matmul %57, %59, %cst_57 {dimension_numbers = #tpu.dot_dimension_numbers<[1], [0], [0], [1], [0, 0, 1, 1], [], []>} : vector<64x128xbf16>, vector<128x128xbf16>, vector<64x128xf32> -> vector<64x128xf32>
    %61 = arith.addf %54, %60 : vector<64x128xf32>
    %62 = vector.shape_cast %61 : vector<64x128xf32> to vector<8x8x128xf32>
    %63 = arith.truncf %62 : vector<8x8x128xf32> to vector<8x8x128xbf16>
    %c0_58 = arith.constant 0 : index
    %c0_59 = arith.constant 0 : index
    %c0_60 = arith.constant 0 : index
    %c0_61 = arith.constant 0 : index
    %64 = vector.load %arg4[%c0_58, %c0_59, %c0_60, %c0_61] : memref<1x8x8x128xbf16, #tpu.memory_space<vmem>>, vector<1x8x8x128xbf16>
    %65 = vector.shape_cast %64 : vector<1x8x8x128xbf16> to vector<8x8x128xbf16>
    %66 = vector.shape_cast %63 : vector<8x8x128xbf16> to vector<1x8x8x128xbf16>
    tpu.vector_store %arg4[%c0_58, %c0_59, %c0_60, %c0_61], %66 {strides = array<i32>} : memref<1x8x8x128xbf16, #tpu.memory_space<vmem>>, vector<1x8x8x128xbf16>,
    %cst_62 = arith.constant dense<0.000000e+00> : vector<128xf32>
    %67 = vector.multi_reduction <add>, %61, %cst_62 [0] : vector<64x128xf32> to vector<128xf32>
    %68 = vector.shape_cast %67 : vector<128xf32> to vector<1x128xf32>
    %69 = arith.mulf %61, %61 : vector<64x128xf32>
    %cst_63 = arith.constant dense<0.000000e+00> : vector<128xf32>
    %70 = vector.multi_reduction <add>, %69, %cst_63 [0] : vector<64x128xf32> to vector<128xf32>
    %71 = vector.shape_cast %70 : vector<128xf32> to vector<1x128xf32>
    %72 = tpu.concatenate %68, %71 in 0 : vector<1x128xf32>, vector<1x128xf32> -> vector<2x128xf32>
    %c0_64 = arith.constant 0 : index
    %c0_65 = arith.constant 0 : index
    %c0_66 = arith.constant 0 : index
    %73 = vector.load %arg5[%c0_64, %c0_65, %c0_66] : memref<1x2x128xf32, #tpu.memory_space<vmem>>, vector<1x2x128xf32>
    %74 = vector.shape_cast %73 : vector<1x2x128xf32> to vector<2x128xf32>
    %75 = vector.shape_cast %72 : vector<2x128xf32> to vector<1x2x128xf32>
    tpu.vector_store %arg5[%c0_64, %c0_65, %c0_66], %75 {strides = array<i32>} : memref<1x2x128xf32, #tpu.memory_space<vmem>>, vector<1x2x128xf32>,
    %c0_67 = arith.constant 0 : index
    %c27_68 = arith.constant 27 : index
    %c0_69 = arith.constant 0 : index
    %c0_70 = arith.constant 0 : index
    %76 = vector.load %arg1[%c0_67, %c27_68, %c0_69, %c0_70] : memref<1x36x9x128xbf16, #tpu.memory_space<vmem>>, vector<1x8x8x128xbf16>
    %77 = vector.shape_cast %76 : vector<1x8x8x128xbf16> to vector<8x8x128xbf16>
    %78 = vector.shape_cast %77 : vector<8x8x128xbf16> to vector<64x128xbf16>
    %c0_71 = arith.constant 0 : index
    %c0_72 = arith.constant 0 : index
    %79 = vector.load %arg3[%c0_71, %c0_72] : memref<128x128xbf16, #tpu.memory_space<vmem>>, vector<128x128xbf16>
    %cst_73 = arith.constant dense<0.000000e+00> : vector<64x128xf32>
    %80 = tpu.matmul %78, %79, %cst_73 {dimension_numbers = #tpu.dot_dimension_numbers<[1], [0], [0], [1], [0, 0, 1, 1], [], []>} : vector<64x128xbf16>, vector<128x128xbf16>, vector<64x128xf32> -> vector<64x128xf32>
    %81 = vector.shape_cast %80 : vector<64x128xf32> to vector<8x8x128xf32>
    %82 = arith.truncf %81 : vector<8x8x128xf32> to vector<8x8x128xbf16>
    %c0_74 = arith.constant 0 : index
    %c0_75 = arith.constant 0 : index
    %c0_76 = arith.constant 0 : index
    %c0_77 = arith.constant 0 : index
    %83 = vector.load %arg6[%c0_74, %c0_75, %c0_76, %c0_77] : memref<1x8x8x128xbf16, #tpu.memory_space<vmem>>, vector<1x8x8x128xbf16>
    %84 = vector.shape_cast %83 : vector<1x8x8x128xbf16> to vector<8x8x128xbf16>
    %85 = vector.shape_cast %82 : vector<8x8x128xbf16> to vector<1x8x8x128xbf16>
    tpu.vector_store %arg6[%c0_74, %c0_75, %c0_76, %c0_77], %85 {strides = array<i32>} : memref<1x8x8x128xbf16, #tpu.memory_space<vmem>>, vector<1x8x8x128xbf16>,
    %cst_78 = arith.constant dense<0.000000e+00> : vector<128xf32>
    %86 = vector.multi_reduction <add>, %80, %cst_78 [0] : vector<64x128xf32> to vector<128xf32>
    %87 = vector.shape_cast %86 : vector<128xf32> to vector<1x128xf32>
    %88 = arith.mulf %80, %80 : vector<64x128xf32>
    %cst_79 = arith.constant dense<0.000000e+00> : vector<128xf32>
    %89 = vector.multi_reduction <add>, %88, %cst_79 [0] : vector<64x128xf32> to vector<128xf32>
    %90 = vector.shape_cast %89 : vector<128xf32> to vector<1x128xf32>
    %91 = tpu.concatenate %87, %90 in 0 : vector<1x128xf32>, vector<1x128xf32> -> vector<2x128xf32>
    %c0_80 = arith.constant 0 : index
    %c0_81 = arith.constant 0 : index
    %c0_82 = arith.constant 0 : index
    %92 = vector.load %arg7[%c0_80, %c0_81, %c0_82] : memref<1x2x128xf32, #tpu.memory_space<vmem>>, vector<1x2x128xf32>
    %93 = vector.shape_cast %92 : vector<1x2x128xf32> to vector<2x128xf32>
    %94 = vector.shape_cast %91 : vector<2x128xf32> to vector<1x2x128xf32>
    tpu.vector_store %arg7[%c0_80, %c0_81, %c0_82], %94 {strides = array<i32>} : memref<1x2x128xf32, #tpu.memory_space<vmem>>, vector<1x2x128xf32>,
    return
  }
  func.func @transform_0(%arg0: i32) -> (i32, i32, i32, i32) {
    %c0_i32 = arith.constant 0 : i32
    %c0_i32_0 = arith.constant 0 : i32
    %c0_i32_1 = arith.constant 0 : i32
    %c0_i32_2 = arith.constant 0 : i32
    return %arg0, %c0_i32, %c0_i32_0, %c0_i32_1 : i32, i32, i32, i32
  }
  func.func @transform_1(%arg0: i32) -> (i32, i32, i32) {
    %c0_i32 = arith.constant 0 : i32
    %c0_i32_0 = arith.constant 0 : i32
    %c0_i32_1 = arith.constant 0 : i32
    %c0_i32_2 = arith.constant 0 : i32
    return %c0_i32, %c0_i32_0, %c0_i32_1 : i32, i32, i32
  }
  func.func @transform_2(%arg0: i32) -> (i32, i32) {
    %c0_i32 = arith.constant 0 : i32
    %c0_i32_0 = arith.constant 0 : i32
    %c0_i32_1 = arith.constant 0 : i32
    return %c0_i32, %c0_i32_0 : i32, i32
  }
  func.func @transform_3(%arg0: i32) -> (i32, i32, i32, i32) {
    %c0_i32 = arith.constant 0 : i32
    %c0_i32_0 = arith.constant 0 : i32
    %c0_i32_1 = arith.constant 0 : i32
    %c0_i32_2 = arith.constant 0 : i32
    return %arg0, %c0_i32, %c0_i32_0, %c0_i32_1 : i32, i32, i32, i32
  }
  func.func @transform_4(%arg0: i32) -> (i32, i32, i32) {
    %c0_i32 = arith.constant 0 : i32
    %c0_i32_0 = arith.constant 0 : i32
    %c0_i32_1 = arith.constant 0 : i32
    return %arg0, %c0_i32, %c0_i32_0 : i32, i32, i32
  }
  func.func @transform_5(%arg0: i32) -> (i32, i32, i32, i32) {
    %c0_i32 = arith.constant 0 : i32
    %c0_i32_0 = arith.constant 0 : i32
    %c0_i32_1 = arith.constant 0 : i32
    %c0_i32_2 = arith.constant 0 : i32
    return %arg0, %c0_i32, %c0_i32_0, %c0_i32_1 : i32, i32, i32, i32
  }
  func.func @transform_6(%arg0: i32) -> (i32, i32, i32) {
    %c0_i32 = arith.constant 0 : i32
    %c0_i32_0 = arith.constant 0 : i32
    %c0_i32_1 = arith.constant 0 : i32
    return %arg0, %c0_i32, %c0_i32_0 : i32, i32, i32
  }
}

module attributes {stable_mosaic.version = 11 : i64} {
  func.func @_conv2_kernel(%arg0: i32, %arg1: memref<1x8x8x128xbf16, #tpu.memory_space<vmem>>, %arg2: memref<1x128xf32, #tpu.memory_space<vmem>>, %arg3: memref<1x128xf32, #tpu.memory_space<vmem>>, %arg4: memref<9x128x128xbf16, #tpu.memory_space<vmem>>, %arg5: memref<1x8x8x128xbf16, #tpu.memory_space<vmem>>, %arg6: memref<1x2x128xf32, #tpu.memory_space<vmem>>, %arg7: memref<10x10x128xbf16, #tpu.memory_space<vmem>>) attributes {dimension_semantics = [#tpu.dimension_semantics<parallel>], iteration_bounds = array<i64: 2>, scalar_prefetch = 0 : i64, scratch_operands = 1 : i64, tpu.core_type = #tpu.core_type<tc>, window_params = [{transform_indices = @transform_0, window_bounds = array<i64: 1, 8, 8, 128>}, {pipeline_mode = #tpu.pipeline_mode<synchronous>, transform_indices = @transform_1, window_bounds = array<i64: 1, 128>}, {pipeline_mode = #tpu.pipeline_mode<synchronous>, transform_indices = @transform_2, window_bounds = array<i64: 1, 128>}, {pipeline_mode = #tpu.pipeline_mode<synchronous>, transform_indices = @transform_3, window_bounds = array<i64: 9, 128, 128>}, {transform_indices = @transform_4, window_bounds = array<i64: 1, 8, 8, 128>}, {transform_indices = @transform_5, window_bounds = array<i64: 1, 2, 128>}]} {
    %c0 = arith.constant 0 : index
    %c0_0 = arith.constant 0 : index
    %c0_1 = arith.constant 0 : index
    %c0_2 = arith.constant 0 : index
    %0 = vector.load %arg1[%c0, %c0_0, %c0_1, %c0_2] : memref<1x8x8x128xbf16, #tpu.memory_space<vmem>>, vector<1x8x8x128xbf16>
    %1 = vector.shape_cast %0 : vector<1x8x8x128xbf16> to vector<8x8x128xbf16>
    %2 = arith.extf %1 : vector<8x8x128xbf16> to vector<8x8x128xf32>
    %c0_3 = arith.constant 0 : index
    %c0_4 = arith.constant 0 : index
    %3 = vector.load %arg2[%c0_3, %c0_4] : memref<1x128xf32, #tpu.memory_space<vmem>>, vector<1x128xf32>
    %4 = vector.shape_cast %3 : vector<1x128xf32> to vector<1x1x128xf32>
    %5 = vector.broadcast %4 : vector<1x1x128xf32> to vector<8x8x128xf32>
    %6 = arith.mulf %2, %5 : vector<8x8x128xf32>
    %c0_5 = arith.constant 0 : index
    %c0_6 = arith.constant 0 : index
    %7 = vector.load %arg3[%c0_5, %c0_6] : memref<1x128xf32, #tpu.memory_space<vmem>>, vector<1x128xf32>
    %8 = vector.shape_cast %7 : vector<1x128xf32> to vector<1x1x128xf32>
    %9 = vector.broadcast %8 : vector<1x1x128xf32> to vector<8x8x128xf32>
    %10 = arith.addf %6, %9 : vector<8x8x128xf32>
    %cst = arith.constant 0.000000e+00 : f32
    %11 = vector.broadcast %cst : f32 to vector<8x8x128xf32>
    %12 = arith.maximumf %10, %11 : vector<8x8x128xf32>
    %13 = arith.truncf %12 : vector<8x8x128xf32> to vector<8x8x128xbf16>
    %cst_7 = arith.constant 0.000000e+00 : bf16
    %14 = vector.broadcast %cst_7 : bf16 to vector<10x10x128xbf16>
    %c0_8 = arith.constant 0 : index
    %c0_9 = arith.constant 0 : index
    %c0_10 = arith.constant 0 : index
    %15 = vector.load %arg7[%c0_8, %c0_9, %c0_10] : memref<10x10x128xbf16, #tpu.memory_space<vmem>>, vector<10x10x128xbf16>
    tpu.vector_store %arg7[%c0_8, %c0_9, %c0_10], %14 {strides = array<i32>} : memref<10x10x128xbf16, #tpu.memory_space<vmem>>, vector<10x10x128xbf16>,
    %c1 = arith.constant 1 : index
    %c1_11 = arith.constant 1 : index
    %c0_12 = arith.constant 0 : index
    %16 = vector.load %arg7[%c1, %c1_11, %c0_12] : memref<10x10x128xbf16, #tpu.memory_space<vmem>>, vector<8x8x128xbf16>
    tpu.vector_store %arg7[%c1, %c1_11, %c0_12], %13 {strides = array<i32>} : memref<10x10x128xbf16, #tpu.memory_space<vmem>>, vector<8x8x128xbf16>,
    %c0_13 = arith.constant 0 : index
    %c0_14 = arith.constant 0 : index
    %c0_15 = arith.constant 0 : index
    %17 = vector.load %arg7[%c0_13, %c0_14, %c0_15] : memref<10x10x128xbf16, #tpu.memory_space<vmem>>, vector<8x8x128xbf16>
    %18 = vector.shape_cast %17 : vector<8x8x128xbf16> to vector<64x128xbf16>
    %c0_16 = arith.constant 0 : index
    %c0_17 = arith.constant 0 : index
    %c0_18 = arith.constant 0 : index
    %19 = vector.load %arg4[%c0_16, %c0_17, %c0_18] : memref<9x128x128xbf16, #tpu.memory_space<vmem>>, vector<1x128x128xbf16>
    %20 = vector.shape_cast %19 : vector<1x128x128xbf16> to vector<128x128xbf16>
    %cst_19 = arith.constant dense<0.000000e+00> : vector<64x128xf32>
    %21 = tpu.matmul %18, %20, %cst_19 {dimension_numbers = #tpu.dot_dimension_numbers<[1], [0], [0], [1], [0, 0, 1, 1], [], []>} : vector<64x128xbf16>, vector<128x128xbf16>, vector<64x128xf32> -> vector<64x128xf32>
    %c0_20 = arith.constant 0 : index
    %c1_21 = arith.constant 1 : index
    %c0_22 = arith.constant 0 : index
    %22 = vector.load %arg7[%c0_20, %c1_21, %c0_22] : memref<10x10x128xbf16, #tpu.memory_space<vmem>>, vector<8x8x128xbf16>
    %23 = vector.shape_cast %22 : vector<8x8x128xbf16> to vector<64x128xbf16>
    %c1_23 = arith.constant 1 : index
    %c0_24 = arith.constant 0 : index
    %c0_25 = arith.constant 0 : index
    %24 = vector.load %arg4[%c1_23, %c0_24, %c0_25] : memref<9x128x128xbf16, #tpu.memory_space<vmem>>, vector<1x128x128xbf16>
    %25 = vector.shape_cast %24 : vector<1x128x128xbf16> to vector<128x128xbf16>
    %cst_26 = arith.constant dense<0.000000e+00> : vector<64x128xf32>
    %26 = tpu.matmul %23, %25, %cst_26 {dimension_numbers = #tpu.dot_dimension_numbers<[1], [0], [0], [1], [0, 0, 1, 1], [], []>} : vector<64x128xbf16>, vector<128x128xbf16>, vector<64x128xf32> -> vector<64x128xf32>
    %27 = arith.addf %21, %26 : vector<64x128xf32>
    %c0_27 = arith.constant 0 : index
    %c2 = arith.constant 2 : index
    %c0_28 = arith.constant 0 : index
    %28 = vector.load %arg7[%c0_27, %c2, %c0_28] : memref<10x10x128xbf16, #tpu.memory_space<vmem>>, vector<8x8x128xbf16>
    %29 = vector.shape_cast %28 : vector<8x8x128xbf16> to vector<64x128xbf16>
    %c2_29 = arith.constant 2 : index
    %c0_30 = arith.constant 0 : index
    %c0_31 = arith.constant 0 : index
    %30 = vector.load %arg4[%c2_29, %c0_30, %c0_31] : memref<9x128x128xbf16, #tpu.memory_space<vmem>>, vector<1x128x128xbf16>
    %31 = vector.shape_cast %30 : vector<1x128x128xbf16> to vector<128x128xbf16>
    %cst_32 = arith.constant dense<0.000000e+00> : vector<64x128xf32>
    %32 = tpu.matmul %29, %31, %cst_32 {dimension_numbers = #tpu.dot_dimension_numbers<[1], [0], [0], [1], [0, 0, 1, 1], [], []>} : vector<64x128xbf16>, vector<128x128xbf16>, vector<64x128xf32> -> vector<64x128xf32>
    %33 = arith.addf %27, %32 : vector<64x128xf32>
    %c1_33 = arith.constant 1 : index
    %c0_34 = arith.constant 0 : index
    %c0_35 = arith.constant 0 : index
    %34 = vector.load %arg7[%c1_33, %c0_34, %c0_35] : memref<10x10x128xbf16, #tpu.memory_space<vmem>>, vector<8x8x128xbf16>
    %35 = vector.shape_cast %34 : vector<8x8x128xbf16> to vector<64x128xbf16>
    %c3 = arith.constant 3 : index
    %c0_36 = arith.constant 0 : index
    %c0_37 = arith.constant 0 : index
    %36 = vector.load %arg4[%c3, %c0_36, %c0_37] : memref<9x128x128xbf16, #tpu.memory_space<vmem>>, vector<1x128x128xbf16>
    %37 = vector.shape_cast %36 : vector<1x128x128xbf16> to vector<128x128xbf16>
    %cst_38 = arith.constant dense<0.000000e+00> : vector<64x128xf32>
    %38 = tpu.matmul %35, %37, %cst_38 {dimension_numbers = #tpu.dot_dimension_numbers<[1], [0], [0], [1], [0, 0, 1, 1], [], []>} : vector<64x128xbf16>, vector<128x128xbf16>, vector<64x128xf32> -> vector<64x128xf32>
    %39 = arith.addf %33, %38 : vector<64x128xf32>
    %c1_39 = arith.constant 1 : index
    %c1_40 = arith.constant 1 : index
    %c0_41 = arith.constant 0 : index
    %40 = vector.load %arg7[%c1_39, %c1_40, %c0_41] : memref<10x10x128xbf16, #tpu.memory_space<vmem>>, vector<8x8x128xbf16>
    %41 = vector.shape_cast %40 : vector<8x8x128xbf16> to vector<64x128xbf16>
    %c4 = arith.constant 4 : index
    %c0_42 = arith.constant 0 : index
    %c0_43 = arith.constant 0 : index
    %42 = vector.load %arg4[%c4, %c0_42, %c0_43] : memref<9x128x128xbf16, #tpu.memory_space<vmem>>, vector<1x128x128xbf16>
    %43 = vector.shape_cast %42 : vector<1x128x128xbf16> to vector<128x128xbf16>
    %cst_44 = arith.constant dense<0.000000e+00> : vector<64x128xf32>
    %44 = tpu.matmul %41, %43, %cst_44 {dimension_numbers = #tpu.dot_dimension_numbers<[1], [0], [0], [1], [0, 0, 1, 1], [], []>} : vector<64x128xbf16>, vector<128x128xbf16>, vector<64x128xf32> -> vector<64x128xf32>
    %45 = arith.addf %39, %44 : vector<64x128xf32>
    %c1_45 = arith.constant 1 : index
    %c2_46 = arith.constant 2 : index
    %c0_47 = arith.constant 0 : index
    %46 = vector.load %arg7[%c1_45, %c2_46, %c0_47] : memref<10x10x128xbf16, #tpu.memory_space<vmem>>, vector<8x8x128xbf16>
    %47 = vector.shape_cast %46 : vector<8x8x128xbf16> to vector<64x128xbf16>
    %c5 = arith.constant 5 : index
    %c0_48 = arith.constant 0 : index
    %c0_49 = arith.constant 0 : index
    %48 = vector.load %arg4[%c5, %c0_48, %c0_49] : memref<9x128x128xbf16, #tpu.memory_space<vmem>>, vector<1x128x128xbf16>
    %49 = vector.shape_cast %48 : vector<1x128x128xbf16> to vector<128x128xbf16>
    %cst_50 = arith.constant dense<0.000000e+00> : vector<64x128xf32>
    %50 = tpu.matmul %47, %49, %cst_50 {dimension_numbers = #tpu.dot_dimension_numbers<[1], [0], [0], [1], [0, 0, 1, 1], [], []>} : vector<64x128xbf16>, vector<128x128xbf16>, vector<64x128xf32> -> vector<64x128xf32>
    %51 = arith.addf %45, %50 : vector<64x128xf32>
    %c2_51 = arith.constant 2 : index
    %c0_52 = arith.constant 0 : index
    %c0_53 = arith.constant 0 : index
    %52 = vector.load %arg7[%c2_51, %c0_52, %c0_53] : memref<10x10x128xbf16, #tpu.memory_space<vmem>>, vector<8x8x128xbf16>
    %53 = vector.shape_cast %52 : vector<8x8x128xbf16> to vector<64x128xbf16>
    %c6 = arith.constant 6 : index
    %c0_54 = arith.constant 0 : index
    %c0_55 = arith.constant 0 : index
    %54 = vector.load %arg4[%c6, %c0_54, %c0_55] : memref<9x128x128xbf16, #tpu.memory_space<vmem>>, vector<1x128x128xbf16>
    %55 = vector.shape_cast %54 : vector<1x128x128xbf16> to vector<128x128xbf16>
    %cst_56 = arith.constant dense<0.000000e+00> : vector<64x128xf32>
    %56 = tpu.matmul %53, %55, %cst_56 {dimension_numbers = #tpu.dot_dimension_numbers<[1], [0], [0], [1], [0, 0, 1, 1], [], []>} : vector<64x128xbf16>, vector<128x128xbf16>, vector<64x128xf32> -> vector<64x128xf32>
    %57 = arith.addf %51, %56 : vector<64x128xf32>
    %c2_57 = arith.constant 2 : index
    %c1_58 = arith.constant 1 : index
    %c0_59 = arith.constant 0 : index
    %58 = vector.load %arg7[%c2_57, %c1_58, %c0_59] : memref<10x10x128xbf16, #tpu.memory_space<vmem>>, vector<8x8x128xbf16>
    %59 = vector.shape_cast %58 : vector<8x8x128xbf16> to vector<64x128xbf16>
    %c7 = arith.constant 7 : index
    %c0_60 = arith.constant 0 : index
    %c0_61 = arith.constant 0 : index
    %60 = vector.load %arg4[%c7, %c0_60, %c0_61] : memref<9x128x128xbf16, #tpu.memory_space<vmem>>, vector<1x128x128xbf16>
    %61 = vector.shape_cast %60 : vector<1x128x128xbf16> to vector<128x128xbf16>
    %cst_62 = arith.constant dense<0.000000e+00> : vector<64x128xf32>
    %62 = tpu.matmul %59, %61, %cst_62 {dimension_numbers = #tpu.dot_dimension_numbers<[1], [0], [0], [1], [0, 0, 1, 1], [], []>} : vector<64x128xbf16>, vector<128x128xbf16>, vector<64x128xf32> -> vector<64x128xf32>
    %63 = arith.addf %57, %62 : vector<64x128xf32>
    %c2_63 = arith.constant 2 : index
    %c2_64 = arith.constant 2 : index
    %c0_65 = arith.constant 0 : index
    %64 = vector.load %arg7[%c2_63, %c2_64, %c0_65] : memref<10x10x128xbf16, #tpu.memory_space<vmem>>, vector<8x8x128xbf16>
    %65 = vector.shape_cast %64 : vector<8x8x128xbf16> to vector<64x128xbf16>
    %c8 = arith.constant 8 : index
    %c0_66 = arith.constant 0 : index
    %c0_67 = arith.constant 0 : index
    %66 = vector.load %arg4[%c8, %c0_66, %c0_67] : memref<9x128x128xbf16, #tpu.memory_space<vmem>>, vector<1x128x128xbf16>
    %67 = vector.shape_cast %66 : vector<1x128x128xbf16> to vector<128x128xbf16>
    %cst_68 = arith.constant dense<0.000000e+00> : vector<64x128xf32>
    %68 = tpu.matmul %65, %67, %cst_68 {dimension_numbers = #tpu.dot_dimension_numbers<[1], [0], [0], [1], [0, 0, 1, 1], [], []>} : vector<64x128xbf16>, vector<128x128xbf16>, vector<64x128xf32> -> vector<64x128xf32>
    %69 = arith.addf %63, %68 : vector<64x128xf32>
    %70 = vector.shape_cast %69 : vector<64x128xf32> to vector<8x8x128xf32>
    %71 = arith.truncf %70 : vector<8x8x128xf32> to vector<8x8x128xbf16>
    %c0_69 = arith.constant 0 : index
    %c0_70 = arith.constant 0 : index
    %c0_71 = arith.constant 0 : index
    %c0_72 = arith.constant 0 : index
    %72 = vector.load %arg5[%c0_69, %c0_70, %c0_71, %c0_72] : memref<1x8x8x128xbf16, #tpu.memory_space<vmem>>, vector<1x8x8x128xbf16>
    %73 = vector.shape_cast %72 : vector<1x8x8x128xbf16> to vector<8x8x128xbf16>
    %74 = vector.shape_cast %71 : vector<8x8x128xbf16> to vector<1x8x8x128xbf16>
    tpu.vector_store %arg5[%c0_69, %c0_70, %c0_71, %c0_72], %74 {strides = array<i32>} : memref<1x8x8x128xbf16, #tpu.memory_space<vmem>>, vector<1x8x8x128xbf16>,
    %cst_73 = arith.constant dense<0.000000e+00> : vector<128xf32>
    %75 = vector.multi_reduction <add>, %69, %cst_73 [0] : vector<64x128xf32> to vector<128xf32>
    %76 = vector.shape_cast %75 : vector<128xf32> to vector<1x128xf32>
    %77 = arith.mulf %69, %69 : vector<64x128xf32>
    %cst_74 = arith.constant dense<0.000000e+00> : vector<128xf32>
    %78 = vector.multi_reduction <add>, %77, %cst_74 [0] : vector<64x128xf32> to vector<128xf32>
    %79 = vector.shape_cast %78 : vector<128xf32> to vector<1x128xf32>
    %80 = tpu.concatenate %76, %79 in 0 : vector<1x128xf32>, vector<1x128xf32> -> vector<2x128xf32>
    %c0_75 = arith.constant 0 : index
    %c0_76 = arith.constant 0 : index
    %c0_77 = arith.constant 0 : index
    %81 = vector.load %arg6[%c0_75, %c0_76, %c0_77] : memref<1x2x128xf32, #tpu.memory_space<vmem>>, vector<1x2x128xf32>
    %82 = vector.shape_cast %81 : vector<1x2x128xf32> to vector<2x128xf32>
    %83 = vector.shape_cast %80 : vector<2x128xf32> to vector<1x2x128xf32>
    tpu.vector_store %arg6[%c0_75, %c0_76, %c0_77], %83 {strides = array<i32>} : memref<1x2x128xf32, #tpu.memory_space<vmem>>, vector<1x2x128xf32>,
    return
  }
  func.func @transform_0(%arg0: i32) -> (i32, i32, i32, i32) {
    %c0_i32 = arith.constant 0 : i32
    %c0_i32_0 = arith.constant 0 : i32
    %c0_i32_1 = arith.constant 0 : i32
    %c0_i32_2 = arith.constant 0 : i32
    return %arg0, %c0_i32, %c0_i32_0, %c0_i32_1 : i32, i32, i32, i32
  }
  func.func @transform_1(%arg0: i32) -> (i32, i32) {
    %c0_i32 = arith.constant 0 : i32
    %c0_i32_0 = arith.constant 0 : i32
    %c0_i32_1 = arith.constant 0 : i32
    return %c0_i32, %c0_i32_0 : i32, i32
  }
  func.func @transform_2(%arg0: i32) -> (i32, i32) {
    %c0_i32 = arith.constant 0 : i32
    %c0_i32_0 = arith.constant 0 : i32
    %c0_i32_1 = arith.constant 0 : i32
    return %c0_i32, %c0_i32_0 : i32, i32
  }
  func.func @transform_3(%arg0: i32) -> (i32, i32, i32) {
    %c0_i32 = arith.constant 0 : i32
    %c0_i32_0 = arith.constant 0 : i32
    %c0_i32_1 = arith.constant 0 : i32
    %c0_i32_2 = arith.constant 0 : i32
    return %c0_i32, %c0_i32_0, %c0_i32_1 : i32, i32, i32
  }
  func.func @transform_4(%arg0: i32) -> (i32, i32, i32, i32) {
    %c0_i32 = arith.constant 0 : i32
    %c0_i32_0 = arith.constant 0 : i32
    %c0_i32_1 = arith.constant 0 : i32
    %c0_i32_2 = arith.constant 0 : i32
    return %arg0, %c0_i32, %c0_i32_0, %c0_i32_1 : i32, i32, i32, i32
  }
  func.func @transform_5(%arg0: i32) -> (i32, i32, i32) {
    %c0_i32 = arith.constant 0 : i32
    %c0_i32_0 = arith.constant 0 : i32
    %c0_i32_1 = arith.constant 0 : i32
    return %arg0, %c0_i32, %c0_i32_0 : i32, i32, i32
  }
}

module attributes {stable_mosaic.version = 11 : i64} {
  func.func @_bn2_res_relu_kernel(%arg0: i32, %arg1: memref<128x128xbf16, #tpu.memory_space<vmem>>, %arg2: memref<1x128xf32, #tpu.memory_space<vmem>>, %arg3: memref<1x128xf32, #tpu.memory_space<vmem>>, %arg4: memref<128x128xbf16, #tpu.memory_space<vmem>>, %arg5: memref<1x128xf32, #tpu.memory_space<vmem>>, %arg6: memref<1x128xf32, #tpu.memory_space<vmem>>, %arg7: memref<128x128xf32, #tpu.memory_space<vmem>>) attributes {dimension_semantics = [#tpu.dimension_semantics<parallel>], iteration_bounds = array<i64: 1>, scalar_prefetch = 0 : i64, scratch_operands = 0 : i64, tpu.core_type = #tpu.core_type<tc>, window_params = [{transform_indices = @transform_0, window_bounds = array<i64: 128, 128>}, {pipeline_mode = #tpu.pipeline_mode<synchronous>, transform_indices = @transform_1, window_bounds = array<i64: 1, 128>}, {pipeline_mode = #tpu.pipeline_mode<synchronous>, transform_indices = @transform_2, window_bounds = array<i64: 1, 128>}, {transform_indices = @transform_3, window_bounds = array<i64: 128, 128>}, {pipeline_mode = #tpu.pipeline_mode<synchronous>, transform_indices = @transform_4, window_bounds = array<i64: 1, 128>}, {pipeline_mode = #tpu.pipeline_mode<synchronous>, transform_indices = @transform_5, window_bounds = array<i64: 1, 128>}, {transform_indices = @transform_6, window_bounds = array<i64: 128, 128>}]} {
    %c0 = arith.constant 0 : index
    %c0_0 = arith.constant 0 : index
    %0 = vector.load %arg1[%c0, %c0_0] : memref<128x128xbf16, #tpu.memory_space<vmem>>, vector<128x128xbf16>
    %1 = arith.extf %0 : vector<128x128xbf16> to vector<128x128xf32>
    %c0_1 = arith.constant 0 : index
    %c0_2 = arith.constant 0 : index
    %2 = vector.load %arg2[%c0_1, %c0_2] : memref<1x128xf32, #tpu.memory_space<vmem>>, vector<1x128xf32>
    %3 = vector.broadcast %2 : vector<1x128xf32> to vector<128x128xf32>
    %4 = arith.mulf %1, %3 : vector<128x128xf32>
    %c0_3 = arith.constant 0 : index
    %c0_4 = arith.constant 0 : index
    %5 = vector.load %arg3[%c0_3, %c0_4] : memref<1x128xf32, #tpu.memory_space<vmem>>, vector<1x128xf32>
    %6 = vector.broadcast %5 : vector<1x128xf32> to vector<128x128xf32>
    %7 = arith.addf %4, %6 : vector<128x128xf32>
    %c0_5 = arith.constant 0 : index
    %c0_6 = arith.constant 0 : index
    %8 = vector.load %arg4[%c0_5, %c0_6] : memref<128x128xbf16, #tpu.memory_space<vmem>>, vector<128x128xbf16>
    %9 = arith.extf %8 : vector<128x128xbf16> to vector<128x128xf32>
    %c0_7 = arith.constant 0 : index
    %c0_8 = arith.constant 0 : index
    %10 = vector.load %arg5[%c0_7, %c0_8] : memref<1x128xf32, #tpu.memory_space<vmem>>, vector<1x128xf32>
    %11 = vector.broadcast %10 : vector<1x128xf32> to vector<128x128xf32>
    %12 = arith.mulf %9, %11 : vector<128x128xf32>
    %13 = arith.addf %7, %12 : vector<128x128xf32>
    %c0_9 = arith.constant 0 : index
    %c0_10 = arith.constant 0 : index
    %14 = vector.load %arg6[%c0_9, %c0_10] : memref<1x128xf32, #tpu.memory_space<vmem>>, vector<1x128xf32>
    %15 = vector.broadcast %14 : vector<1x128xf32> to vector<128x128xf32>
    %16 = arith.addf %13, %15 : vector<128x128xf32>
    %cst = arith.constant 0.000000e+00 : f32
    %17 = vector.broadcast %cst : f32 to vector<128x128xf32>
    %18 = arith.maximumf %16, %17 : vector<128x128xf32>
    %c0_11 = arith.constant 0 : index
    %c0_12 = arith.constant 0 : index
    %19 = vector.load %arg7[%c0_11, %c0_12] : memref<128x128xf32, #tpu.memory_space<vmem>>, vector<128x128xf32>
    tpu.vector_store %arg7[%c0_11, %c0_12], %18 {strides = array<i32>} : memref<128x128xf32, #tpu.memory_space<vmem>>, vector<128x128xf32>,
    return
  }
  func.func @transform_0(%arg0: i32) -> (i32, i32) {
    %c0_i32 = arith.constant 0 : i32
    %c0_i32_0 = arith.constant 0 : i32
    return %arg0, %c0_i32 : i32, i32
  }
  func.func @transform_1(%arg0: i32) -> (i32, i32) {
    %c0_i32 = arith.constant 0 : i32
    %c0_i32_0 = arith.constant 0 : i32
    %c0_i32_1 = arith.constant 0 : i32
    return %c0_i32, %c0_i32_0 : i32, i32
  }
  func.func @transform_2(%arg0: i32) -> (i32, i32) {
    %c0_i32 = arith.constant 0 : i32
    %c0_i32_0 = arith.constant 0 : i32
    %c0_i32_1 = arith.constant 0 : i32
    return %c0_i32, %c0_i32_0 : i32, i32
  }
  func.func @transform_3(%arg0: i32) -> (i32, i32) {
    %c0_i32 = arith.constant 0 : i32
    %c0_i32_0 = arith.constant 0 : i32
    return %arg0, %c0_i32 : i32, i32
  }
  func.func @transform_4(%arg0: i32) -> (i32, i32) {
    %c0_i32 = arith.constant 0 : i32
    %c0_i32_0 = arith.constant 0 : i32
    %c0_i32_1 = arith.constant 0 : i32
    return %c0_i32, %c0_i32_0 : i32, i32
  }
  func.func @transform_5(%arg0: i32) -> (i32, i32) {
    %c0_i32 = arith.constant 0 : i32
    %c0_i32_0 = arith.constant 0 : i32
    %c0_i32_1 = arith.constant 0 : i32
    return %c0_i32, %c0_i32_0 : i32, i32
  }
  func.func @transform_6(%arg0: i32) -> (i32, i32) {
    %c0_i32 = arith.constant 0 : i32
    %c0_i32_0 = arith.constant 0 : i32
    return %arg0, %c0_i32 : i32, i32
  }
}

</mosaic_0001>

<bundles_post_ra>
// kernel: mix_block_forward.5
= control target key start
LH: loop header
LB: loop body
LE: loop exit
PB: predicated region body
PF: predicated region fallthrough
CT: control target
= control target key end

     0   :  { %s528_s0 = inlined_call_operand.vmem [shape: bf16[128,128], index: 0, kind: input, shape index: {}]   ;;  %s529_s1 = inlined_call_operand.vmem [shape: f32[1,128], index: 1, kind: input, shape index: {}]   ;;  %s530_s2 = inlined_call_operand.vmem [shape: f32[1,128], index: 2, kind: input, shape index: {}]   ;;  %s531_s3 = inlined_call_operand.vmem [shape: bf16[128,128], index: 3, kind: input, shape index: {}]   ;;  %s532_s4 = inlined_call_operand.vmem [shape: f32[1,128], index: 4, kind: input, shape index: {}]   ;;  %s533_s5 = inlined_call_operand.vmem [shape: f32[1,128], index: 5, kind: input, shape index: {}]   ;;  %s534_s6 = inlined_call_operand.vmem [shape: f32[128,128], index: 6, kind: output, shape index: {}]  }
   0x1   :  { %v236_v0 = vld [vmem:[%s528_s0] sm:$0xff]   ;;  %v299_v9 = vld [vmem:[%s528_s0 + $0x8] sm:$0xff]   ;;  %v300_v15 = vld [vmem:[%s528_s0 + $0x10] sm:$0xff]  }
   0x2   :  { %v354_v1 = vld [vmem:[%s529_s1] ss:$0 sm:$0xff]  ;;  %v237_v2 = vunpack.c.l.bf16 %v236_v0  ;;  %v238_v5 = vunpack.c.h.bf16 %v236_v0  ;;  %v306_v10 = vld [vmem:[%s531_s3 + $0x8] sm:$0xff]   ;;  %v241_v13 = vunpack.c.l.bf16 %v299_v9  ;;  %v307_v16 = vld [vmem:[%s531_s3 + $0x10] sm:$0xff]   ;;  %v242_v19 = vunpack.c.h.bf16 %v299_v9 }
   0x3   :  { %v268_v3 = vld [vmem:[%s531_s3] sm:$0xff]   ;;  %v273_v14 = vunpack.c.l.bf16 %v306_v10  ;;  %v274_v20 = vunpack.c.h.bf16 %v306_v10  ;;  %v245_v28 = vunpack.c.l.bf16 %v300_v15  ;;  %v277_v29 = vunpack.c.l.bf16 %v307_v16  ;;  %v301_v34 = vld [vmem:[%s528_s0 + $0x18] sm:$0xff]   ;;  %v303_v9 = vld [vmem:[%s528_s0 + $0x28] sm:$0xff]  }
   0x4   :  { %v362_v4 = vld [vmem:[%s532_s4] ss:$0 sm:$0xff]  ;;  %v269_v7 = vunpack.c.l.bf16 %v268_v3  ;;  %v270_v8 = vunpack.c.h.bf16 %v268_v3  ;;  %v62_v11 = vmul.f32 %v237_v2, %v354_v1  ;;  %v63_v12 = vmul.f32 %v238_v5, %v354_v1  ;;  %v308_v43 = vld [vmem:[%s531_s3 + $0x18] sm:$0xff]  }
   0x5   :  { %v367_v6 = vld [vmem:[%s530_s2] ss:$0 sm:$0xff]  ;;  %v64_v23 = vmul.f32 %v241_v13, %v354_v1  ;;  %v142_v24 = vmul.f32 %v273_v14, %v362_v4  ;;  %v65_v26 = vmul.f32 %v242_v19, %v354_v1  ;;  %v143_v27 = vmul.f32 %v274_v20, %v362_v4  ;;  %v310_v14 = vld [vmem:[%s531_s3 + $0x28] sm:$0xff]  }
   0x6   :  { %v140_v17 = vmul.f32 %v269_v7, %v362_v4  ;;  %v141_v18 = vmul.f32 %v270_v8, %v362_v4  ;;  %v85_v21 = vadd.f32 %v367_v6, %v62_v11  ;;  %v86_v22 = vadd.f32 %v367_v6, %v63_v12  ;;  %v392_v25 = vld [vmem:[%s533_s5] ss:$0 sm:$0xff] }
   0x7   :  { %v87_v32 = vadd.f32 %v367_v6, %v64_v23  ;;  %v246_v33 = vunpack.c.h.bf16 %v300_v15  ;;  %v88_v35 = vadd.f32 %v367_v6, %v65_v26  ;;  %v66_v36 = vmul.f32 %v245_v28, %v354_v1  ;;  %v302_v56 = vld [vmem:[%s528_s0 + $0x20] sm:$0xff]   ;;  %v304_v28 = vld [vmem:[%s528_s0 + $0x30] sm:$0xff]  }
   0x8   :  { %v156_v30 = vadd.f32 %v140_v17, %v85_v21  ;;  %v157_v31 = vadd.f32 %v141_v18, %v86_v22  ;;  %v144_v37 = vmul.f32 %v277_v29, %v362_v4  ;;  %v278_v38 = vunpack.c.h.bf16 %v307_v16  ;;  %v309_v61 = vld [vmem:[%s531_s3 + $0x20] sm:$0xff]  }
   0x9   :  { %v158_v41 = vadd.f32 %v142_v24, %v87_v32  ;;  %v67_v42 = vmul.f32 %v246_v33, %v354_v1  ;;  %v159_v44 = vadd.f32 %v143_v27, %v88_v35  ;;  %v89_v45 = vadd.f32 %v367_v6, %v66_v36  ;;  %v311_v33 = vld [vmem:[%s531_s3 + $0x30] sm:$0xff]  }
   0xa   :  { %v179_v39 = vadd.f32 %v392_v25, %v156_v30  ;;  %v180_v40 = vadd.f32 %v392_v25, %v157_v31  ;;  %v145_v46 = vmul.f32 %v278_v38, %v362_v4  ;;  %v249_v47 = vunpack.c.l.bf16 %v301_v34 }
   0xb   :  { %v181_v50 = vadd.f32 %v392_v25, %v158_v41  ;;  %v90_v51 = vadd.f32 %v367_v6, %v67_v42  ;;  %v182_v52 = vadd.f32 %v392_v25, %v159_v44  ;;  %v160_v53 = vadd.f32 %v144_v37, %v89_v45 }
   0xc   :  { %v195_v48 = vmax.f32 %v179_v39, 0.0  ;;  %v196_v49 = vmax.f32 %v180_v40, 0.0  ;;  %v68_v54 = vmul.f32 %v249_v47, %v354_v1  ;;  %v281_v55 = vunpack.c.l.bf16 %v308_v43 }
   0xd   :  { %v197_v57 = vmax.f32 %v181_v50, 0.0  ;;  %v161_v58 = vadd.f32 %v145_v46, %v90_v51  ;;  %v250_v59 = vunpack.c.h.bf16 %v301_v34  ;;  %v282_v60 = vunpack.c.h.bf16 %v308_v43  ;;  %v305_v50 = vld [vmem:[%s528_s0 + $0x38] sm:$0xff]  }
   0xe   :  { %211 = vst [vmem:[%s534_s6] sm:$0xff] %v195_v48  ;;  %212 = vst [vmem:[%s534_s6 + $0x8] sm:$0xff] %v196_v49  ;;  %v198_v62 = vmax.f32 %v182_v52, 0.0  ;;  %v183_v63 = vadd.f32 %v392_v25, %v160_v53  ;;  %v91_v0 = vadd.f32 %v367_v6, %v68_v54  ;;  %v146_v2 = vmul.f32 %v281_v55, %v362_v4  ;;  %v312_v51 = vld [vmem:[%s531_s3 + $0x38] sm:$0xff]  }
   0xf   :  { %213 = vst [vmem:[%s534_s6 + $0x10] sm:$0xff] %v197_v57  ;;  %v184_v3 = vadd.f32 %v392_v25, %v161_v58  ;;  %v69_v5 = vmul.f32 %v250_v59, %v354_v1  ;;  %v147_v7 = vmul.f32 %v282_v60, %v362_v4  ;;  %v253_v8 = vunpack.c.l.bf16 %v302_v56 }
  0x10   :  { %214 = vst [vmem:[%s534_s6 + $0x18] sm:$0xff] %v198_v62  ;;  %v199_v10 = vmax.f32 %v183_v63, 0.0  ;;  %v162_v11 = vadd.f32 %v146_v2, %v91_v0  ;;  %v285_v12 = vunpack.c.l.bf16 %v309_v61  ;;  %v254_v13 = vunpack.c.h.bf16 %v302_v56 }
  0x11   :  { %v200_v15 = vmax.f32 %v184_v3, 0.0  ;;  %v92_v16 = vadd.f32 %v367_v6, %v69_v5  ;;  %v70_v17 = vmul.f32 %v253_v8, %v354_v1  ;;  %v286_v18 = vunpack.c.h.bf16 %v309_v61 }
  0x12   :  { %215 = vst [vmem:[%s534_s6 + $0x20] sm:$0xff] %v199_v10  ;;  %v185_v19 = vadd.f32 %v392_v25, %v162_v11  ;;  %v148_v20 = vmul.f32 %v285_v12, %v362_v4  ;;  %v71_v21 = vmul.f32 %v254_v13, %v354_v1  ;;  %v257_v22 = vunpack.c.l.bf16 %v303_v9 }
  0x13   :  { %216 = vst [vmem:[%s534_s6 + $0x28] sm:$0xff] %v200_v15  ;;  %v163_v23 = vadd.f32 %v147_v7, %v92_v16  ;;  %v93_v24 = vadd.f32 %v367_v6, %v70_v17  ;;  %v149_v26 = vmul.f32 %v286_v18, %v362_v4  ;;  %v289_v27 = vunpack.c.l.bf16 %v310_v14 }
  0x14   :  { %v201_v29 = vmax.f32 %v185_v19, 0.0  ;;  %v94_v30 = vadd.f32 %v367_v6, %v71_v21  ;;  %v72_v31 = vmul.f32 %v257_v22, %v354_v1  ;;  %v258_v32 = vunpack.c.h.bf16 %v303_v9 }
  0x15   :  { %v186_v34 = vadd.f32 %v392_v25, %v163_v23  ;;  %v164_v35 = vadd.f32 %v148_v20, %v93_v24  ;;  %v150_v36 = vmul.f32 %v289_v27, %v362_v4  ;;  %v290_v37 = vunpack.c.h.bf16 %v310_v14 }
  0x16   :  { %217 = vst [vmem:[%s534_s6 + $0x30] sm:$0xff] %v201_v29  ;;  %v165_v38 = vadd.f32 %v149_v26, %v94_v30  ;;  %v95_v39 = vadd.f32 %v367_v6, %v72_v31  ;;  %v73_v40 = vmul.f32 %v258_v32, %v354_v1  ;;  %v261_v41 = vunpack.c.l.bf16 %v304_v28 }
  0x17   :  { %v202_v42 = vmax.f32 %v186_v34, 0.0  ;;  %v187_v43 = vadd.f32 %v392_v25, %v164_v35  ;;  %v151_v44 = vmul.f32 %v290_v37, %v362_v4  ;;  %v293_v45 = vunpack.c.l.bf16 %v311_v33 }
  0x18   :  { %v188_v46 = vadd.f32 %v392_v25, %v165_v38  ;;  %v166_v47 = vadd.f32 %v150_v36, %v95_v39  ;;  %v96_v48 = vadd.f32 %v367_v6, %v73_v40  ;;  %v74_v49 = vmul.f32 %v261_v41, %v354_v1 }
  0x19   :  { %218 = vst [vmem:[%s534_s6 + $0x38] sm:$0xff] %v202_v42  ;;  %v203_v52 = vmax.f32 %v187_v43, 0.0  ;;  %v152_v53 = vmul.f32 %v293_v45, %v362_v4  ;;  %v262_v54 = vunpack.c.h.bf16 %v304_v28  ;;  %v294_v55 = vunpack.c.h.bf16 %v311_v33 }
  0x1a   :  { %v204_v56 = vmax.f32 %v188_v46, 0.0  ;;  %v189_v57 = vadd.f32 %v392_v25, %v166_v47  ;;  %v167_v58 = vadd.f32 %v151_v44, %v96_v48  ;;  %v97_v59 = vadd.f32 %v367_v6, %v74_v49 }
  0x1b   :  { %219 = vst [vmem:[%s534_s6 + $0x40] sm:$0xff] %v203_v52  ;;  %v75_v60 = vmul.f32 %v262_v54, %v354_v1  ;;  %v153_v61 = vmul.f32 %v294_v55, %v362_v4  ;;  %v265_v62 = vunpack.c.l.bf16 %v305_v50  ;;  %v297_v63 = vunpack.c.l.bf16 %v312_v51 }
  0x1c   :  { %220 = vst [vmem:[%s534_s6 + $0x48] sm:$0xff] %v204_v56  ;;  %v205_v0 = vmax.f32 %v189_v57, 0.0  ;;  %v190_v2 = vadd.f32 %v392_v25, %v167_v58  ;;  %v168_v3 = vadd.f32 %v152_v53, %v97_v59  ;;  %v266_v5 = vunpack.c.h.bf16 %v305_v50 }
  0x1d   :  { %v98_v7 = vadd.f32 %v367_v6, %v75_v60  ;;  %v76_v8 = vmul.f32 %v265_v62, %v354_v1  ;;  %v154_v9 = vmul.f32 %v297_v63, %v362_v4  ;;  %v298_v10 = vunpack.c.h.bf16 %v312_v51 }
  0x1e   :  { %221 = vst [vmem:[%s534_s6 + $0x50] sm:$0xff] %v205_v0  ;;  %v206_v11 = vmax.f32 %v190_v2, 0.0  ;;  %v191_v12 = vadd.f32 %v392_v25, %v168_v3  ;;  %v77_v13 = vmul.f32 %v266_v5, %v354_v1 }
  0x1f   :  { %v169_v14 = vadd.f32 %v153_v61, %v98_v7  ;;  %v99_v15 = vadd.f32 %v367_v6, %v76_v8  ;;  %v155_v16 = vmul.f32 %v298_v10, %v362_v4 }
  0x20   :  { %222 = vst [vmem:[%s534_s6 + $0x58] sm:$0xff] %v206_v11  ;;  %v207_v17 = vmax.f32 %v191_v12, 0.0  ;;  %v100_v18 = vadd.f32 %v367_v6, %v77_v13 }
  0x21   :  { %v192_v19 = vadd.f32 %v392_v25, %v169_v14  ;;  %v170_v20 = vadd.f32 %v154_v9, %v99_v15 }
  0x22   :  { %223 = vst [vmem:[%s534_s6 + $0x60] sm:$0xff] %v207_v17  ;;  %v171_v1 = vadd.f32 %v155_v16, %v100_v18 }
  0x23   :  { %v208_v21 = vmax.f32 %v192_v19, 0.0  ;;  %v193_v22 = vadd.f32 %v392_v25, %v170_v20 }
  0x24   :  { %v194_v4 = vadd.f32 %v392_v25, %v171_v1 }
  0x25   :  { %224 = vst [vmem:[%s534_s6 + $0x68] sm:$0xff] %v208_v21  ;;  %v209_v23 = vmax.f32 %v193_v22, 0.0 }
  0x26   :  { %v210_v24 = vmax.f32 %v194_v4, 0.0 }
  0x27   :  { %225 = vst [vmem:[%s534_s6 + $0x70] sm:$0xff] %v209_v23 }
  0x28   :  { %226 = vst [vmem:[%s534_s6 + $0x78] sm:$0xff] %v210_v24 }

// kernel: mix_block_forward.3
= control target key start
LH: loop header
LB: loop body
LE: loop exit
PB: predicated region body
PF: predicated region fallthrough
CT: control target
= control target key end

     0   :  { %s3533_s21 = smov 0   ;;  %s3951_s0 = inlined_call_operand.vmem [shape: bf16[2,36,9,128], index: 0, kind: input, shape index: {}]   ;;  %s3952_s1 = inlined_call_operand.vmem [shape: bf16[9,128,128], index: 1, kind: input, shape index: {}]   ;;  %s3953_s2 = inlined_call_operand.vmem [shape: bf16[128,128], index: 2, kind: input, shape index: {}]   ;;  %s3954_s3 = inlined_call_operand.vmem [shape: bf16[2,8,8,128], index: 3, kind: output, shape index: {0}]   ;;  %s3955_s4 = inlined_call_operand.vmem [shape: f32[2,2,128], index: 4, kind: output, shape index: {1}]   ;;  %s3956_s5 = inlined_call_operand.vmem [shape: bf16[2,8,8,128], index: 5, kind: output, shape index: {2}]   ;;  %s3957_s6 = inlined_call_operand.vmem [shape: f32[2,2,128], index: 6, kind: output, shape index: {3}]  }
   0x1 LB: > { %s2559_s22 = sadd.s32 4294967295, %s3496_s21   ;;  %p2563_p0 = scmp.ge.s32.totalorder %s3496_s21, 1  ;;  %s3496_s21 = sphi %s3533_s21, %s17_s21  }
   0x2   : > { %p219_p1 = scmp.lt.s32.totalorder %s3496_s21, 3 }
   0x4   : > { %p220_p2 = pnand %p2563_p0, %p219_p1 }
   0x5   : > { %v3382_v0 = vld [vmem:[%s3952_s1 + $0x40] sm:$0xff] (!%p220_p2)   ;;  %p262_p3 = scmp.lt.s32.totalorder (!%p220_p2), %s2559_s22, 1  ;;  %v3384_v2 = vld [vmem:[%s3952_s1 + $0x48] sm:$0xff] (!%p220_p2)   ;;  %v3386_v4 = vld [vmem:[%s3952_s1 + $0x50] sm:$0xff] (!%p220_p2)   ;;  %vm626_vm0 = vsmask.f32 (!%p220_p2), 3328 }
   0x6   : > { %223 = sbr.rel (%p220_p2) target bundleno = 414 (0x19e), region = 32  ;;  %v3383_v1 = vld [vmem:[%s3952_s1 + $0x100] sm:$0xff] (!%p220_p2)   ;;  %3069 = vmatprep.subr.bf16.mxu1 (!%p220_p2), %v3382_v0  ;;  %v3385_v3 = vld [vmem:[%s3952_s1 + $0x108] sm:$0xff] (!%p220_p2)   ;;  %v3387_v5 = vld [vmem:[%s3952_s1 + $0x110] sm:$0xff] (!%p220_p2)   ;;  %vm627_vm1 = vsmask.f32 (!%p220_p2), 7440 }
   0x7   : > { %3165 = vmatprep.subr.bf16.mxu0 (!%p220_p2), %v3383_v1  ;;  %3070 = vmatpush3.bf16.msra.mxu1 (!%p220_p2), %v3382_v0  ;;  %v3388_v6 = vld [vmem:[%s3952_s1 + $0x58] sm:$0xff] (!%p220_p2)   ;;  %v3390_v8 = vld [vmem:[%s3952_s1 + $0x60] sm:$0xff] (!%p220_p2)   ;;  %v3392_v10 = vld [vmem:[%s3952_s1 + $0x68] sm:$0xff] (!%p220_p2)   ;;  %vm2193_vm3 = vcmask (!%p220_p2), 1040384  }
   0x8   : > { %3166 = vmatpush3.bf16.msra.mxu0 (!%p220_p2), %v3383_v1  ;;  %3071 = vmatprep.subr.bf16.mxu1 (!%p220_p2), %v3384_v2  ;;  %v3389_v7 = vld [vmem:[%s3952_s1 + $0x118] sm:$0xff] (!%p220_p2)   ;;  %v3391_v9 = vld [vmem:[%s3952_s1 + $0x120] sm:$0xff] (!%p220_p2)   ;;  %v3393_v12 = vld [vmem:[%s3952_s1 + $0x128] sm:$0xff] (!%p220_p2)  }
   0x9   : > { %3167 = vmatprep.subr.bf16.mxu0 (!%p220_p2), %v3385_v3  ;;  %v3394_v14 = vld [vmem:[%s3952_s1 + $0x70] sm:$0xff] (!%p220_p2)   ;;  %v3396_v16 = vld [vmem:[%s3952_s1 + $0x78] sm:$0xff] (!%p220_p2)   ;;  %v3399_v18 = vld [vmem:[%s3952_s1] sm:$0xff] (!%p220_p2)  }
   0xa   : > { %v3395_v15 = vld [vmem:[%s3952_s1 + $0x130] sm:$0xff] (!%p220_p2)   ;;  %v3397_v17 = vld [vmem:[%s3952_s1 + $0x138] sm:$0xff] (!%p220_p2)   ;;  %v3401_v19 = vld [vmem:[%s3952_s1 + $0x140] sm:$0xff] (!%p220_p2)  }
   0xb   : > { %3072 = vmatpush3.bf16.msra.mxu1 (!%p220_p2), %v3384_v2  ;;  %v3404_v22 = vld [vmem:[%s3952_s1 + $0x8] sm:$0xff] (!%p220_p2)   ;;  %v3406_v26 = vld [vmem:[%s3952_s1 + $0x10] sm:$0xff] (!%p220_p2)   ;;  %v3408_v28 = vld [vmem:[%s3952_s1 + $0x18] sm:$0xff] (!%p220_p2)  }
   0xc   : > { %3168 = vmatpush3.bf16.msra.mxu0 (!%p220_p2), %v3385_v3  ;;  %3073 = vmatprep.subr.bf16.mxu1 (!%p220_p2), %v3386_v4  ;;  %v3405_v23 = vld [vmem:[%s3952_s1 + $0x148] sm:$0xff] (!%p220_p2)   ;;  %v3407_v27 = vld [vmem:[%s3952_s1 + $0x150] sm:$0xff] (!%p220_p2)   ;;  %v3409_v31 = vld [vmem:[%s3952_s1 + $0x158] sm:$0xff] (!%p220_p2)  }
   0xd   : > { %s3961_s22 = smov (!%p262_p3, %s2559_s22), 1  ;;  %3169 = vmatprep.subr.bf16.mxu0 %v3387_v5  ;;  %v3410_v38 = vld [vmem:[%s3952_s1 + $0x20] sm:$0xff]   ;;  %v3412_v47 = vld [vmem:[%s3952_s1 + $0x28] sm:$0xff]   ;;  %vm3648_vm2 = vmor %vm626_vm0, %vm627_vm1 }
   0xe   : > { %s3373_s15 = smul.u32 288, %s3961_s22  ;;  %v3411_v43 = vld [vmem:[%s3952_s1 + $0x160] sm:$0xff]   ;;  %v3413_v50 = vld [vmem:[%s3952_s1 + $0x168] sm:$0xff]   ;;  %v3415_v2 = vld [vmem:[%s3952_s1 + $0x30] sm:$0xff]   ;;  %s2567_s23 = sshll.u32 %s3961_s22, 1 }
   0xf   : > { %3074 = vmatpush3.bf16.msra.mxu1 %v3386_v4  ;;  %s284_s27 = scalar_lea.vmem %s3957_s6, %s2567_s23  ;;  %s275_s30 = scalar_lea.vmem %s3955_s4, %s2567_s23 }
  0x10   : > { %3170 = vmatpush3.bf16.msra.mxu0 %v3387_v5  ;;  %3075 = vmatprep.subr.bf16.mxu1 %v3388_v6  ;;  %s3577_s24 = scalar_lea.vmem %s3951_s0, %s3373_s15  ;;  %s2901_s15 = sshll.u32 %s3961_s22, 5 }
  0x11   : > { %3171 = vmatprep.subr.bf16.mxu0 %v3389_v7  ;;  %v3398_v11 = vld [vmem:[%s3577_s24 + $0x48] ss:$8 sps:$4 sm:$0xff]   ;;  %v3400_v13 = vld [vmem:[%s3577_s24 + $0xd8] ss:$8 sps:$4 sm:$0xff]   ;;  %v2720_v34 = vld [vmem:[%s3577_s24 + $0x94] sm:$0x1]  ;;  %s3925_s17 = scalar_lea.vmem %s3956_s5, %s2901_s15  ;;  %s3930_s20 = scalar_lea.vmem %s3954_s3, %s2901_s15 }
  0x12   : > { %3085 = vmatprep.mubr.bf16.mxu1 %v3398_v11  ;;  %3181 = vmatprep.mubr.bf16.mxu0 %v3400_v13  ;;  %v3402_v20 = vld [vmem:[%s3577_s24 + $0x58] ss:$8 sps:$4 sm:$0xff]   ;;  %v3403_v21 = vld [vmem:[%s3577_s24 + $0xe8] ss:$8 sps:$4 sm:$0xff]   ;;  %v2722_v39 = vld [vmem:[%s3577_s24 + $0x9c] sm:$0x1] }
  0x13   : > { %3076 = vmatpush3.bf16.msra.mxu1 %v3388_v6  ;;  %v3414_v24 = vld [vmem:[%s3577_s24 + $0x68] ss:$8 sps:$4 sm:$0xff]   ;;  %v3416_v25 = vld [vmem:[%s3577_s24 + $0xf8] ss:$8 sps:$4 sm:$0xff]   ;;  %v1263_v40 = vshll.u32 %v2720_v34, 16  ;;  %v1277_v46 = vshll.u32 %v2722_v39, 16 }
  0x14   : > { %3172 = vmatpush3.bf16.msra.mxu0 %v3389_v7  ;;  %3077 = vmatprep.subr.bf16.mxu1 %v3390_v8  ;;  %v3418_v29 = vld [vmem:[%s3577_s24 + $0x78] ss:$8 sps:$4 sm:$0xff]   ;;  %v3419_v30 = vld [vmem:[%s3577_s24 + $0x108] ss:$8 sps:$4 sm:$0xff]   ;;  %v2724_v57 = vld [vmem:[%s3577_s24 + $0xa4] sm:$0x1] }
  0x15   : > { %3173 = vmatprep.subr.bf16.mxu0 %v3391_v9  ;;  %v3422_v32 = vld [vmem:[%s3577_s24] ss:$8 sps:$4 sm:$0xff]   ;;  %v2719_v33 = vld [vmem:[%s3577_s24 + $0x90] sm:$0xf]  ;;  %v2721_v35 = vld [vmem:[%s3577_s24 + $0x98] sm:$0xf] }
  0x16   : > { %v1254_v36 = vshrl.u32 %v2719_v33, 16  ;;  %v1257_v37 = vshll.u32 %v2719_v33, 16  ;;  %v1268_v41 = vshrl.u32 %v2721_v35, 16  ;;  %v1271_v42 = vshll.u32 %v2721_v35, 16  ;;  %v2723_v56 = vld [vmem:[%s3577_s24 + $0xa0] sm:$0xf] }
  0x17   : > { %3078 = vmatpush3.bf16.msra.mxu1 %v3390_v8  ;;  %v1265_v52 = vrot.slane %v1263_v40, 5  ;;  %v1279_v55 = vrot.slane %v1277_v46, 5  ;;  %v2725_v59 = vld [vmem:[%s3577_s24 + $0xa8] sm:$0xf]  ;;  %v2726_v60 = vld [vmem:[%s3577_s24 + $0xac] sm:$0x1] }
  0x18   : > { %3174 = vmatpush3.bf16.msra.mxu0 %v3391_v9  ;;  %3079 = vmatprep.subr.bf16.mxu1 %v3392_v10  ;;  %v1256_v44 = vrot.slane %v1254_v36, 4  ;;  %v1259_v45 = vrot.slane %v1257_v37, 5  ;;  %v1270_v48 = vrot.slane %v1268_v41, 4  ;;  %v1273_v49 = vrot.slane %v1271_v42, 5  ;;  %v3417_v6 = vld [vmem:[%s3952_s1 + $0x170] sm:$0xff]  }
  0x19   : > { %3175 = vmatprep.subr.bf16.mxu0 %v3393_v12  ;;  %v1282_v61 = vshrl.u32 %v2723_v56, 16  ;;  %v1285_v63 = vshll.u32 %v2723_v56, 16  ;;  %v1291_v0 = vshll.u32 %v2724_v57, 16  ;;  %v1296_v1 = vshrl.u32 %v2725_v59, 16  ;;  %v3436_v37 = vld [vmem:[%s3577_s24 + $0x20] ss:$8 sps:$4 sm:$0xff]  }
  0x1a   : > { %v1260_v51 = vor.u32 %v1259_v45, %v1256_v44  ;;  %v1274_v54 = vor.u32 %v1273_v49, %v1270_v48  ;;  %v1299_v5 = vshll.u32 %v2725_v59, 16  ;;  %v3439_v48 = vld [vmem:[%s3577_s24 + $0x30] ss:$8 sps:$4 sm:$0xff]   ;;  %v2731_v49 = vld [vmem:[%s3577_s24 + $0xc0] sm:$0xf] }
  0x1b   : > { %3080 = vmatpush3.bf16.msra.mxu1 %v3392_v10  ;;  %v1284_v4 = vrot.slane %v1282_v61, 4  ;;  %v1287_v8 = vrot.slane %v1285_v63, 5  ;;  %v1298_v9 = vrot.slane %v1296_v1, 4  ;;  %v1305_v10 = vshll.u32 %v2726_v60, 16  ;;  %v3430_v59 = vld [vmem:[%s3952_s1 + $0x98] sm:$0xff]  }
  0x1c   : > { %3176 = vmatpush3.bf16.msra.mxu0 %v3393_v12  ;;  %3081 = vmatprep.subr.bf16.mxu1 %v3394_v14  ;;  %v1261_v58 = vrot.slane %v1260_v51, 4  ;;  %v1275_v62 = vrot.slane %v1274_v54, 4  ;;  %v1293_v12 = vrot.slane %v1291_v0, 5  ;;  %v1301_v13 = vrot.slane %v1299_v5, 5  ;;  %v2733_v51 = vld [vmem:[%s3577_s24 + $0xc8] sm:$0xf] }
  0x1d   : > { %3177 = vmatprep.subr.bf16.mxu0 %v3395_v15  ;;  %v1338_v56 = vshrl.u32 %v2731_v49, 16  ;;  %v1341_v57 = vshll.u32 %v2731_v49, 16  ;;  %v1352_v61 = vshrl.u32 %v2733_v51, 16 }
  0x1e   : > { %v1266_v3 = vsel %vm3648_vm2, %v1261_v58, %v1265_v52  ;;  %v1280_v7 = vsel %vm3648_vm2, %v1275_v62, %v1279_v55  ;;  %v3429_v52 = vld [vmem:[%s3952_s1 + $0x190] sm:$0xff]   ;;  %v2734_v55 = vld [vmem:[%s3577_s24 + $0xcc] sm:$0x1]  ;;  %v1355_v62 = vshll.u32 %v2733_v51, 16 }
  0x1f   : > { %3082 = vmatpush3.bf16.msra.mxu1 %v3394_v14  ;;  %v2751_v11 = vcombine.low %v1266_v3, %v1280_v7  ;;  %v3420_v14 = vld [vmem:[%s3952_s1 + $0x38] sm:$0xff]   ;;  %v1361_v63 = vshll.u32 %v2734_v55, 16  ;;  %v1340_v1 = vrot.slane %v1338_v56, 4 }
  0x20   : > { %3178 = vmatpush3.bf16.msra.mxu0 %v3395_v15  ;;  %3083 = vmatprep.subr.bf16.mxu1 %v3396_v16  ;;  %v1288_v15 = vor.u32 %v1287_v8, %v1284_v4  ;;  %v3431_v4 = vld [vmem:[%s3952_s1 + $0x198] sm:$0xff]   ;;  %v1357_v7 = vrot.slane %v1355_v62, 5 }
  0x21   : > { %3179 = vmatprep.subr.bf16.mxu0 %v3397_v17  ;;  %v1363_v8 = vrot.slane %v1361_v63, 5 }
  0x23   : > { %3084 = vmatpush3.bf16.msra.mxu1 %v3396_v16  ;;  %v1302_v16 = vor.u32 %v1301_v13, %v1298_v9  ;;  %v3432_v13 = vld [vmem:[%s3952_s1 + $0xa0] sm:$0xff]  }
  0x24   : > { %3180 = vmatpush3.bf16.msra.mxu0 %v3397_v17  ;;  %3093 = vmatprep.subr.bf16.mxu1 %v3399_v18  ;;  %v1289_v17 = vrot.slane %v1288_v15, 4 }
  0x25   : > { %3189 = vmatprep.subr.bf16.mxu0 %v3401_v19 }
  0x26   : > { %3086 = vmatmul.mubr.bf16.vlgmr.msra.gmra.mrb[0].mxu1 %v3402_v20  ;;  %v1303_v20 = vrot.slane %v1302_v16, 4  ;;  %v612_v16 = vld [vmem:[%s3577_s24 + $0x8] sm:$0xf] }
  0x27   : > { %3094 = vmatpush3.bf16.msra.mxu1 %v3399_v18  ;;  %3182 = vmatmul.mubr.bf16.vlgmr.msra.gmra.mrb[0].mxu0 %v3403_v21  ;;  %v1307_v18 = vrot.slane %v1305_v10, 5  ;;  %v3423_v21 = vld [vmem:[%s3952_s1 + $0x80] sm:$0xff]  }
  0x28   : > { %3190 = vmatpush3.bf16.msra.mxu0 %v3401_v19  ;;  %3095 = vmatprep.subr.bf16.mxu1 %v3404_v22  ;;  %v3421_v19 = vld [vmem:[%s3952_s1 + $0x178] sm:$0xff]  }
  0x29   : > { %3191 = vmatprep.subr.bf16.mxu0 %v3405_v23  ;;  %3089 = vmatprep.mubr.bf16.mxu1 %v3414_v24  ;;  %v3424_v24 = vld [vmem:[%s3952_s1 + $0x180] sm:$0xff]  }
  0x2a   : > { %3185 = vmatprep.mubr.bf16.mxu0 %v3416_v25  ;;  %v3425_v25 = vld [vmem:[%s3577_s24 + $0x10] ss:$8 sps:$4 sm:$0xff]  }
  0x2b   : > { %3096 = vmatpush3.bf16.msra.mxu1 %v3404_v22  ;;  %v1294_v22 = vsel %vm3648_vm2, %v1289_v17, %v1293_v12  ;;  %v611_v12 = vld [vmem:[%s3577_s24 + $0x4] sm:$0x1]  ;;  %v613_v17 = vld [vmem:[%s3577_s24 + $0xc] sm:$0x1] }
  0x2c   : > { %3192 = vmatpush3.bf16.msra.mxu0 %v3405_v23  ;;  %3097 = vmatprep.subr.bf16.mxu1 %v3406_v26  ;;  %v1308_v23 = vsel %vm3648_vm2, %v1303_v20, %v1307_v18 }
  0x2d   : > { %3193 = vmatprep.subr.bf16.mxu0 %v3407_v27 }
  0x2e   : > { %3090 = vmatmul.mubr.bf16.gmra.mrb[4].mxu1 %v3418_v29  ;;  %v3427_v29 = vld [vmem:[%s3952_s1 + $0x188] sm:$0xff]  }
  0x2f   : > { %3098 = vmatpush3.bf16.msra.mxu1 %v3406_v26  ;;  %3186 = vmatmul.mubr.bf16.gmra.mrb[4].mxu0 %v3419_v30  ;;  %v3426_v26 = vld [vmem:[%s3952_s1 + $0x88] sm:$0xff]   ;;  %v2728_v30 = vld [vmem:[%s3577_s24 + $0xb4] sm:$0x1] }
  0x30   : > { %3194 = vmatpush3.bf16.msra.mxu0 %v3407_v27  ;;  %3099 = vmatprep.subr.bf16.mxu1 %v3408_v28  ;;  %v2727_v27 = vld [vmem:[%s3577_s24 + $0xb0] sm:$0xf]  ;;  %v1319_v35 = vshll.u32 %v2728_v30, 16 }
  0x31   : > { %3195 = vmatprep.subr.bf16.mxu0 %v3409_v31  ;;  %3109 = vmatprep.mubr.bf16.mxu1 %v3422_v32  ;;  %v2730_v32 = vld [vmem:[%s3577_s24 + $0xbc] sm:$0x1]  ;;  %v1310_v33 = vshrl.u32 %v2727_v27, 16  ;;  %v1313_v34 = vshll.u32 %v2727_v27, 16  ;;  %v653_v27 = vshll.u32 %v613_v17, 16 }
  0x32   : > { %3205 = vmatprep.mubr.bf16.mxu0 %v2751_v11  ;;  %v1333_v39 = vshll.u32 %v2730_v32, 16  ;;  %v1321_v44 = vrot.slane %v1319_v35, 5  ;;  %v610_v11 = vld [vmem:[%s3577_s24] sm:$0xf]  ;;  %v3434_v32 = vld [vmem:[%s3952_s1 + $0xa8] sm:$0xff]  }
  0x33   : > { %3100 = vmatpush3.bf16.msra.mxu1 %v3408_v28  ;;  %v2752_v28 = vcombine.low %v1294_v22, %v1308_v23  ;;  %v1312_v40 = vrot.slane %v1310_v33, 4  ;;  %v1315_v41 = vrot.slane %v1313_v34, 5  ;;  %v630_v18 = vshrl.u32 %v610_v11, 16  ;;  %v621_v17 = vld [vmem:[%s3577_s24 + $0x2c] sm:$0x1] }
  0x34   : > { %3196 = vmatpush3.bf16.msra.mxu0 %v3409_v31  ;;  %3101 = vmatprep.subr.bf16.mxu1 %v3410_v38  ;;  %v2729_v31 = vld [vmem:[%s3577_s24 + $0xb8] sm:$0xf]  ;;  %v1335_v46 = vrot.slane %v1333_v39, 5  ;;  %v644_v22 = vshrl.u32 %v612_v16, 16  ;;  %v647_v23 = vshll.u32 %v612_v16, 16 }
  0x35   : > { %3197 = vmatprep.subr.bf16.mxu0 %v3411_v43  ;;  %v1324_v36 = vshrl.u32 %v2729_v31, 16  ;;  %v620_v16 = vld [vmem:[%s3577_s24 + $0x28] sm:$0xf] }
  0x36   : > { %v646_v30 = vrot.slane %v644_v22, 4  ;;  %v700_v22 = vshrl.u32 %v620_v16, 16 }
  0x37   : > { %3102 = vmatpush3.bf16.msra.mxu1 %v3410_v38  ;;  %v1327_v38 = vshll.u32 %v2729_v31, 16  ;;  %v1326_v42 = vrot.slane %v1324_v36, 4  ;;  %v649_v31 = vrot.slane %v647_v23, 5  ;;  %v655_v36 = vrot.slane %v653_v27, 5  ;;  %v622_v23 = vld [vmem:[%s3577_s24 + $0x30] sm:$0xf] }
  0x38   : > { %3198 = vmatpush3.bf16.msra.mxu0 %v3411_v43  ;;  %3103 = vmatprep.subr.bf16.mxu1 %v3412_v47  ;;  %v3428_v43 = vld [vmem:[%s3952_s1 + $0x90] sm:$0xff]   ;;  %v624_v27 = vld [vmem:[%s3577_s24 + $0x38] sm:$0xf] }
  0x39   : > { %3199 = vmatprep.subr.bf16.mxu0 %v3413_v50  ;;  %v1329_v45 = vrot.slane %v1327_v38, 5  ;;  %v3435_v38 = vld [vmem:[%s3952_s1 + $0x1a8] sm:$0xff]  }
  0x3b   : > { %3104 = vmatpush3.bf16.msra.mxu1 %v3412_v47  ;;  %v1316_v47 = vor.u32 %v1315_v41, %v1312_v40  ;;  %v1330_v54 = vor.u32 %v1329_v45, %v1326_v42  ;;  %v650_v40 = vor.u32 %v649_v31, %v646_v30  ;;  %v614_v41 = vld [vmem:[%s3577_s24 + $0x10] sm:$0xf]  ;;  %v702_v31 = vrot.slane %v700_v22, 4 }
  0x3c   : > { %3200 = vmatpush3.bf16.msra.mxu0 %v3413_v50  ;;  %3105 = vmatprep.subr.bf16.mxu1 %v3415_v2  ;;  %v2732_v50 = vld [vmem:[%s3577_s24 + $0xc4] sm:$0x1]  ;;  %v658_v45 = vshrl.u32 %v614_v41, 16  ;;  %v3480_v22 = vld [vmem:[%s3577_s24 + $0x70] ss:$8 sps:$4 sm:$0xff]  }
  0x3d   : > { %3201 = vmatprep.subr.bf16.mxu0 %v3417_v6  ;;  %v1347_v58 = vshll.u32 %v2732_v50, 16  ;;  %v1317_v60 = vrot.slane %v1316_v47, 4  ;;  %v1331_v0 = vrot.slane %v1330_v54, 4  ;;  %v617_v47 = vld [vmem:[%s3577_s24 + $0x1c] sm:$0x1] }
  0x3f   : > { %3106 = vmatpush3.bf16.msra.mxu1 %v3415_v2  ;;  %v1343_v2 = vrot.slane %v1341_v57, 5  ;;  %v1349_v3 = vrot.slane %v1347_v58, 5  ;;  %v1322_v5 = vsel %vm3648_vm2, %v1317_v60, %v1321_v44  ;;  %v1336_v9 = vsel %vm3648_vm2, %v1331_v0, %v1335_v46  ;;  %v616_v44 = vld [vmem:[%s3577_s24 + $0x18] sm:$0xf]  ;;  %v3438_v60 = vld [vmem:[%s3952_s1 + $0x1b0] sm:$0xff]  }
  0x40   : > { %3202 = vmatpush3.bf16.msra.mxu0 %v3417_v6  ;;  %3107 = vmatprep.subr.bf16.mxu1 %v3420_v14  ;;  %v1354_v6 = vrot.slane %v1352_v61, 4  ;;  %v651_v46 = vrot.slane %v650_v40, 4  ;;  %v672_v50 = vshrl.u32 %v616_v44, 16  ;;  %v675_v54 = vshll.u32 %v616_v44, 16 }
  0x41   : > { %3203 = vmatprep.subr.bf16.mxu0 %v3421_v19  ;;  %v1344_v10 = vor.u32 %v1343_v2, %v1340_v1  ;;  %v681_v58 = vshll.u32 %v617_v47, 16  ;;  %v728_v40 = vshrl.u32 %v624_v27, 16 }
  0x42   : > { %v1358_v15 = vor.u32 %v1357_v7, %v1354_v6  ;;  %v656_v55 = vsel %vm3648_vm2, %v651_v46, %v655_v36  ;;  %v674_v57 = vrot.slane %v672_v50, 4  ;;  %v677_v63 = vrot.slane %v675_v54, 5  ;;  %v3441_v6 = vld [vmem:[%s3952_s1 + $0x1b8] sm:$0xff]   ;;  %v3442_v7 = vld [vmem:[%s3952_s1 + $0xc0] sm:$0xff]  }
  0x43   : > { %3108 = vmatpush3.bf16.msra.mxu1 %v3420_v14  ;;  %v2753_v14 = vcombine.low %v1322_v5, %v1336_v9  ;;  %v1345_v20 = vrot.slane %v1344_v10, 4  ;;  %v3444_v10 = vld [vmem:[%s3952_s1 + $0x1c0] sm:$0xff]   ;;  %v717_v36 = vshll.u32 %v622_v23, 16 }
  0x44   : > { %3204 = vmatpush3.bf16.msra.mxu0 %v3421_v19  ;;  %3117 = vmatprep.subr.bf16.mxu1 %v3423_v21  ;;  %v633_v19 = vshll.u32 %v610_v11, 16  ;;  %v678_v1 = vor.u32 %v677_v63, %v674_v57  ;;  %v3445_v11 = vld [vmem:[%s3577_s24 + $0x18] ss:$8 sps:$4 sm:$0xff]  }
  0x45   : > { %3213 = vmatprep.subr.bf16.mxu0 %v3424_v24 }
  0x46   : > { %3110 = vmatmul.mubr.bf16.vlgmr.msra.gmra.mrb[0].mxu1 %v3425_v25  ;;  %v632_v25 = vrot.slane %v630_v18, 4  ;;  %v679_v5 = vrot.slane %v678_v1, 4  ;;  %v3447_v18 = vld [vmem:[%s3952_s1 + $0x1c8] sm:$0xff]   ;;  %v3452_v1 = vld [vmem:[%s3952_s1 + $0xe0] sm:$0xff]  }
  0x47   : > { %3118 = vmatpush3.bf16.msra.mxu1 %v3423_v21  ;;  %3206 = vmatmul.mubr.bf16.vlgmr.msra.gmra.mrb[0].mxu0 %v2752_v28  ;;  %v639_v21 = vshll.u32 %v611_v12, 16  ;;  %v3433_v28 = vld [vmem:[%s3952_s1 + $0x1a0] sm:$0xff]  }
  0x48   : > { %3214 = vmatpush3.bf16.msra.mxu0 %v3424_v24  ;;  %3119 = vmatprep.subr.bf16.mxu1 %v3426_v26  ;;  %v1359_v24 = vrot.slane %v1358_v15, 4  ;;  %v618_v12 = vld [vmem:[%s3577_s24 + $0x20] sm:$0xf]  ;;  %v619_v15 = vld [vmem:[%s3577_s24 + $0x24] sm:$0x1] }
  0x49   : > { %3215 = vmatprep.subr.bf16.mxu0 %v3427_v29  ;;  %3113 = vmatprep.mubr.bf16.mxu1 %v3436_v37  ;;  %v641_v35 = vrot.slane %v639_v21, 5  ;;  %v3443_v37 = vld [vmem:[%s3577_s24 + $0x8] ss:$8 sps:$4 sm:$0xff]   ;;  %v695_v21 = vshll.u32 %v619_v15, 16  ;;  %v3466_v15 = vld [vmem:[%s3953_s2] sm:$0xff]  }
  0x4a   : > { %3209 = vmatprep.mubr.bf16.mxu0 %v2753_v14  ;;  %v1364_v33 = vsel %vm3648_vm2, %v1359_v24, %v1363_v8  ;;  %v3446_v14 = vld [vmem:[%s3952_s1 + $0xc8] sm:$0xff]   ;;  %v703_v24 = vshll.u32 %v620_v16, 16  ;;  %v3465_v16 = vld [vmem:[%s3952_s1 + $0x200] sm:$0xff]  }
  0x4b   : > { %3120 = vmatpush3.bf16.msra.mxu1 %v3426_v26  ;;  %v635_v26 = vrot.slane %v633_v19, 5  ;;  %v686_v19 = vshrl.u32 %v618_v12, 16  ;;  %v697_v30 = vrot.slane %v695_v21, 5  ;;  %v3473_v21 = vld [vmem:[%s3953_s2 + $0x10] sm:$0xff]  }
  0x4c   : > { %3216 = vmatpush3.bf16.msra.mxu0 %v3427_v29  ;;  %3121 = vmatprep.subr.bf16.mxu1 %v3428_v43  ;;  %v1350_v29 = vsel %vm3648_vm2, %v1345_v20, %v1349_v3  ;;  %v683_v3 = vrot.slane %v681_v58, 5  ;;  %v689_v20 = vshll.u32 %v618_v12, 16  ;;  %v3450_v58 = vld [vmem:[%s3952_s1 + $0xd8] sm:$0xff]  }
  0x4d   : > { %3217 = vmatprep.subr.bf16.mxu0 %v3429_v52  ;;  %v636_v34 = vor.u32 %v635_v26, %v632_v25  ;;  %v2754_v39 = vcombine.low %v1350_v29, %v1364_v33  ;;  %v709_v25 = vshll.u32 %v621_v17, 16  ;;  %v623_v26 = vld [vmem:[%s3577_s24 + $0x34] sm:$0x1]  ;;  %v705_v33 = vrot.slane %v703_v24, 5  ;;  %v3460_v12 = vld [vmem:[%s3952_s1 + $0xf8] sm:$0xff]  }
  0x4e   : > { %3114 = vmatmul.mubr.bf16.gmra.mrb[4].mxu1 %v3439_v48  ;;  %v661_v48 = vshll.u32 %v614_v41, 16  ;;  %v684_v9 = vsel %vm3648_vm2, %v679_v5, %v683_v3  ;;  %v691_v29 = vrot.slane %v689_v20, 5  ;;  %v731_v41 = vshll.u32 %v624_v27, 16  ;;  %v3453_v5 = vld [vmem:[%s3952_s1 + $0x1e0] sm:$0xff]   ;;  %v3470_v20 = vld [vmem:[%s3577_s24 + $0xb0] ss:$8 sps:$4 sm:$0xff]  }
  0x4f   : > { %3122 = vmatpush3.bf16.msra.mxu1 %v3428_v43  ;;  %v637_v42 = vrot.slane %v636_v34, 4  ;;  %v615_v43 = vld [vmem:[%s3577_s24 + $0x14] sm:$0x1]  ;;  %3210 = vmatmul.mubr.bf16.gmra.mrb[4].mxu0 %v2754_v39  ;;  %v711_v34 = vrot.slane %v709_v25, 5  ;;  %v723_v39 = vshll.u32 %v623_v26, 16 }
  0x50   : > { %3218 = vmatpush3.bf16.msra.mxu0 %v3429_v52  ;;  %3123 = vmatprep.subr.bf16.mxu1 %v3430_v59  ;;  %v667_v49 = vshll.u32 %v615_v43, 16  ;;  %v660_v52 = vrot.slane %v658_v45, 4  ;;  %v663_v56 = vrot.slane %v661_v48, 5  ;;  %v706_v43 = vor.u32 %v705_v33, %v702_v31  ;;  %v3467_v17 = vld [vmem:[%s3577_s24 + $0x60] ss:$8 sps:$4 sm:$0xff]   ;;  %v3472_v33 = vld [vmem:[%s3952_s1 + $0x210] sm:$0xff]  }
  0x51   : > { %3219 = vmatprep.subr.bf16.mxu0 %v3431_v4  ;;  %v642_v51 = vsel %vm3648_vm2, %v637_v42, %v641_v35  ;;  %3229 = vmatprep.mubr.bf16.mxu0 %v3443_v37  ;;  %v714_v35 = vshrl.u32 %v622_v23, 16  ;;  %v3448_v37 = vld [vmem:[%s3952_s1 + $0xd0] sm:$0xff]   ;;  %v719_v45 = vrot.slane %v717_v36, 5  ;;  %v725_v48 = vrot.slane %v723_v39, 5  ;;  %v2835_v23 = vld [vmem:[%s3577_s24 + $0x8] sm:$0xf] }
  0x52   : > { %v2635_v61 = vcombine.low %v642_v51, %v656_v55  ;;  %v669_v62 = vrot.slane %v667_v49, 5  ;;  %v664_v0 = vor.u32 %v663_v56, %v660_v52  ;;  %v3449_v42 = vld [vmem:[%s3952_s1 + $0x1d0] sm:$0xff]   ;;  %v730_v49 = vrot.slane %v728_v40, 4  ;;  %v2836_v24 = vld [vmem:[%s3577_s24 + $0xc] sm:$0x1] }
  0x53   : > { %3124 = vmatpush3.bf16.msra.mxu1 %v3430_v59  ;;  %v3437_v59 = vld [vmem:[%s3952_s1 + $0xb0] sm:$0xff]   ;;  %v716_v44 = vrot.slane %v714_v35, 4  ;;  %v733_v50 = vrot.slane %v731_v41, 5  ;;  %v707_v51 = vrot.slane %v706_v43, 4  ;;  %v1878_v27 = vshrl.u32 %v2835_v23, 16  ;;  %v3475_v43 = vld [vmem:[%s3953_s2 + $0x18] sm:$0xff]  }
  0x54   : > { %3220 = vmatpush3.bf16.msra.mxu0 %v3431_v4  ;;  %3125 = vmatprep.subr.bf16.mxu1 %v3432_v13  ;;  %v665_v2 = vrot.slane %v664_v0, 4  ;;  %v3440_v4 = vld [vmem:[%s3952_s1 + $0xb8] sm:$0xff]   ;;  %v3457_v55 = vld [vmem:[%s3577_s24 + $0x28] ss:$8 sps:$4 sm:$0xff]   ;;  %v2838_v26 = vld [vmem:[%s3577_s24 + $0x14] sm:$0x1] }
  0x55   : > { %3221 = vmatprep.subr.bf16.mxu0 %v3433_v28  ;;  %3133 = vmatprep.mubr.bf16.mxu1 %v2635_v61  ;;  %v720_v52 = vor.u32 %v719_v45, %v716_v44  ;;  %v734_v57 = vor.u32 %v733_v50, %v730_v49  ;;  %v3459_v61 = vld [vmem:[%s3577_s24 + $0x38] ss:$8 sps:$4 sm:$0xff]   ;;  %v2837_v25 = vld [vmem:[%s3577_s24 + $0x10] sm:$0xf] }
  0x56   : > { %v670_v8 = vsel %vm3648_vm2, %v665_v2, %v669_v62  ;;  %v3451_v62 = vld [vmem:[%s3952_s1 + $0x1d8] sm:$0xff]   ;;  %v1895_v31 = vshll.u32 %v2837_v25, 16  ;;  %v3471_v36 = vld [vmem:[%s3577_s24 + $0xc0] ss:$8 sps:$4 sm:$0xff]  }
  0x57   : > { %3126 = vmatpush3.bf16.msra.mxu1 %v3432_v13  ;;  %v2636_v13 = vcombine.low %v670_v8, %v684_v9  ;;  %v735_v0 = vrot.slane %v734_v57, 4  ;;  %v3454_v8 = vld [vmem:[%s3952_s1 + $0xe8] sm:$0xff]   ;;  %v3486_v49 = vld [vmem:[%s3577_s24 + $0xd8] ss:$8 sps:$4 sm:$0xff]  }
  0x58   : > { %3222 = vmatpush3.bf16.msra.mxu0 %v3433_v28  ;;  %3127 = vmatprep.subr.bf16.mxu1 %v3434_v32  ;;  %v688_v28 = vrot.slane %v686_v19, 4  ;;  %v3455_v9 = vld [vmem:[%s3952_s1 + $0x1e8] sm:$0xff]  }
  0x59   : > { %3223 = vmatprep.subr.bf16.mxu0 %v3435_v38  ;;  %v3469_v19 = vld [vmem:[%s3953_s2 + $0x8] sm:$0xff]  }
  0x5a   : > { %v3481_v39 = vld [vmem:[%s3577_s24 + $0x80] ss:$8 sps:$4 sm:$0xff]  }
  0x5b   : > { %3128 = vmatpush3.bf16.msra.mxu1 %v3434_v32  ;;  %v625_v32 = vld [vmem:[%s3577_s24 + $0x3c] sm:$0x1]  ;;  %v2843_v57 = vld [vmem:[%s3577_s24 + $0x28] sm:$0xf] }
  0x5c   : > { %3224 = vmatpush3.bf16.msra.mxu0 %v3435_v38  ;;  %3129 = vmatprep.subr.bf16.mxu1 %v3437_v59  ;;  %v692_v38 = vor.u32 %v691_v29, %v688_v28  ;;  %v737_v46 = vshll.u32 %v625_v32, 16  ;;  %v1881_v28 = vshll.u32 %v2835_v23, 16  ;;  %v1887_v29 = vshll.u32 %v2836_v24, 16  ;;  %v3483_v23 = vld [vmem:[%s3953_s2 + $0x30] sm:$0xff]  }
  0x5d   : > { %3225 = vmatprep.subr.bf16.mxu0 %v3438_v60  ;;  %v1901_v32 = vshll.u32 %v2838_v26, 16 }
  0x5e   : > { %v693_v47 = vrot.slane %v692_v38, 4  ;;  %v739_v54 = vrot.slane %v737_v46, 5  ;;  %v1883_v35 = vrot.slane %v1881_v28, 5  ;;  %v1897_v38 = vrot.slane %v1895_v31, 5  ;;  %v2841_v46 = vld [vmem:[%s3577_s24 + $0x20] sm:$0xf] }
  0x5f   : > { %3130 = vmatpush3.bf16.msra.mxu1 %v3437_v59  ;;  %v712_v59 = vsel %vm3648_vm2, %v707_v51, %v711_v34  ;;  %v1880_v34 = vrot.slane %v1878_v27, 4  ;;  %v1889_v41 = vrot.slane %v1887_v29, 5  ;;  %v1903_v45 = vrot.slane %v1901_v32, 5  ;;  %v3482_v28 = vld [vmem:[%s3952_s1 + $0x230] sm:$0xff]  }
  0x60   : > { %3226 = vmatpush3.bf16.msra.mxu0 %v3438_v60  ;;  %3131 = vmatprep.subr.bf16.mxu1 %v3440_v4  ;;  %v698_v56 = vsel %vm3648_vm2, %v693_v47, %v697_v30  ;;  %v721_v60 = vrot.slane %v720_v52, 4  ;;  %v740_v3 = vsel %vm3648_vm2, %v735_v0, %v739_v54  ;;  %v1892_v30 = vshrl.u32 %v2837_v25, 16  ;;  %v3474_v47 = vld [vmem:[%s3952_s1 + $0x218] sm:$0xff]  }
  0x61   : > { %3227 = vmatprep.subr.bf16.mxu0 %v3441_v6  ;;  %v2637_v63 = vcombine.low %v698_v56, %v712_v59  ;;  %v1884_v40 = vor.u32 %v1883_v35, %v1880_v34  ;;  %v1923_v56 = vshll.u32 %v2841_v46, 16  ;;  %v3477_v59 = vld [vmem:[%s3953_s2 + $0x20] sm:$0xff]   ;;  %v1937_v0 = vshll.u32 %v2843_v57, 16  ;;  %v3485_v34 = vld [vmem:[%s3953_s2 + $0x38] sm:$0xff]  }
  0x62   : > { %v726_v2 = vsel %vm3648_vm2, %v721_v60, %v725_v48 }
  0x63   : > { %3132 = vmatpush3.bf16.msra.mxu1 %v3440_v4  ;;  %v3462_v4 = vld [vmem:[%s3577_s24 + $0x90] ss:$8 sps:$4 sm:$0xff]   ;;  %v1885_v48 = vrot.slane %v1884_v40, 4 }
  0x64   : > { %3228 = vmatpush3.bf16.msra.mxu0 %v3441_v6  ;;  %3141 = vmatprep.subr.bf16.mxu1 %v3442_v7  ;;  %v2638_v6 = vcombine.low %v726_v2, %v740_v3 }
  0x65   : > { %3237 = vmatprep.subr.bf16.mxu0 %v3444_v10  ;;  %v1890_v52 = vsel %vm3648_vm2, %v1885_v48, %v1889_v41  ;;  %v2850_v48 = vld [vmem:[%s3577_s24 + $0x44] sm:$0x1] }
  0x66   : > { %3134 = vmatmul.mubr.bf16.vlgmr.msra.gmra.mrb[0].mxu1 %v2636_v13  ;;  %v3461_v13 = vld [vmem:[%s3952_s1 + $0x1f8] sm:$0xff]  }
  0x67   : > { %3142 = vmatpush3.bf16.msra.mxu1 %v3442_v7  ;;  %3230 = vmatmul.mubr.bf16.vlgmr.msra.gmra.mrb[0].mxu0 %v3445_v11  ;;  %v3464_v7 = vld [vmem:[%s3577_s24 + $0x50] ss:$8 sps:$4 sm:$0xff]  }
  0x68   : > { %3238 = vmatpush3.bf16.msra.mxu0 %v3444_v10  ;;  %3143 = vmatprep.subr.bf16.mxu1 %v3446_v14  ;;  %v3456_v10 = vld [vmem:[%s3952_s1 + $0xf0] sm:$0xff]  }
  0x69   : > { %3239 = vmatprep.subr.bf16.mxu0 %v3447_v18  ;;  %3233 = vmatprep.mubr.bf16.mxu0 %v3457_v55  ;;  %v3458_v11 = vld [vmem:[%s3952_s1 + $0x1f0] sm:$0xff]   ;;  %v1920_v55 = vshrl.u32 %v2841_v46, 16 }
  0x6a   : > { %3137 = vmatprep.mubr.bf16.mxu1 %v2637_v63  ;;  %v1934_v63 = vshrl.u32 %v2843_v57, 16 }
  0x6b   : > { %3144 = vmatpush3.bf16.msra.mxu1 %v3446_v14  ;;  %v3463_v14 = vld [vmem:[%s3577_s24 + $0xa0] ss:$8 sps:$4 sm:$0xff]  }
  0x6c   : > { %3240 = vmatpush3.bf16.msra.mxu0 %v3447_v18  ;;  %3145 = vmatprep.subr.bf16.mxu1 %v3448_v37  ;;  %v3468_v18 = vld [vmem:[%s3952_s1 + $0x208] sm:$0xff]  }
  0x6d   : > { %3241 = vmatprep.subr.bf16.mxu0 %v3449_v42 }
  0x6e   : > { %3138 = vmatmul.mubr.bf16.gmra.mrb[4].mxu1 %v2638_v6 }
  0x6f   : > { %3146 = vmatpush3.bf16.msra.mxu1 %v3448_v37  ;;  %3234 = vmatmul.mubr.bf16.gmra.mrb[4].mxu0 %v3459_v61  ;;  %v1894_v37 = vrot.slane %v1892_v30, 4  ;;  %v2845_v61 = vld [vmem:[%s3577_s24 + $0x30] sm:$0xf] }
  0x70   : > { %3242 = vmatpush3.bf16.msra.mxu0 %v3449_v42  ;;  %3147 = vmatprep.subr.bf16.mxu1 %v3450_v58  ;;  %v2839_v42 = vld [vmem:[%s3577_s24 + $0x18] sm:$0xf]  ;;  %v1948_v2 = vshrl.u32 %v2845_v61, 16  ;;  %v1951_v3 = vshll.u32 %v2845_v61, 16 }
  0x71   : > { %3243 = vmatprep.subr.bf16.mxu0 %v3451_v62  ;;  %3157 = vmatprep.mubr.bf16.mxu1 %v3462_v4  ;;  %v1898_v44 = vor.u32 %v1897_v38, %v1894_v37  ;;  %v1906_v51 = vshrl.u32 %v2839_v42, 16  ;;  %v1909_v54 = vshll.u32 %v2839_v42, 16  ;;  %v3478_v4 = vld [vmem:[%s3952_s1 + $0x228] sm:$0xff]  }
  0x72   : > { %3253 = vmatprep.mubr.bf16.mxu0 %v3464_v7 }
  0x73   : > { %3148 = vmatpush3.bf16.msra.mxu1 %v3450_v58  ;;  %v1899_v50 = vrot.slane %v1898_v44, 4  ;;  %v3476_v58 = vld [vmem:[%s3952_s1 + $0x220] sm:$0xff]   ;;  %v1908_v6 = vrot.slane %v1906_v51, 4  ;;  %v1911_v7 = vrot.slane %v1909_v54, 5 }
  0x74   : > { %3244 = vmatpush3.bf16.msra.mxu0 %v3451_v62  ;;  %3149 = vmatprep.subr.bf16.mxu1 %v3452_v1 }
  0x75   : > { %3245 = vmatprep.subr.bf16.mxu0 %v3453_v5  ;;  %v1904_v60 = vsel %vm3648_vm2, %v1899_v50, %v1903_v45 }
  0x76   : > { %v2867_v62 = vcombine.low %v1890_v52, %v1904_v60  ;;  %v3488_v60 = vld [vmem:[%s3577_s24 + $0xf8] ss:$8 sps:$4 sm:$0xff]  }
  0x77   : > { %3150 = vmatpush3.bf16.msra.mxu1 %v3452_v1  ;;  %v3479_v1 = vld [vmem:[%s3953_s2 + $0x28] sm:$0xff]  }
  0x78   : > { %3246 = vmatpush3.bf16.msra.mxu0 %v3453_v5  ;;  %3151 = vmatprep.subr.bf16.mxu1 %v3454_v8  ;;  %v2840_v5 = vld [vmem:[%s3577_s24 + $0x1c] sm:$0x1] }
  0x79   : > { %3247 = vmatprep.subr.bf16.mxu0 %v3455_v9 }
  0x7b   : > { %3152 = vmatpush3.bf16.msra.mxu1 %v3454_v8  ;;  %v1922_v8 = vrot.slane %v1920_v55, 4  ;;  %v1985_v55 = vshll.u32 %v2850_v48, 16 }
  0x7c   : > { %3248 = vmatpush3.bf16.msra.mxu0 %v3455_v9  ;;  %3153 = vmatprep.subr.bf16.mxu1 %v3456_v10  ;;  %v1925_v9 = vrot.slane %v1923_v56, 5 }
  0x7d   : > { %3249 = vmatprep.subr.bf16.mxu0 %v3458_v11 }
  0x7f   : > { %3154 = vmatpush3.bf16.msra.mxu1 %v3456_v10  ;;  %v2842_v10 = vld [vmem:[%s3577_s24 + $0x24] sm:$0x1] }
  0x80   : > { %3250 = vmatpush3.bf16.msra.mxu0 %v3458_v11  ;;  %3155 = vmatprep.subr.bf16.mxu1 %v3460_v12  ;;  %v2844_v11 = vld [vmem:[%s3577_s24 + $0x2c] sm:$0x1] }
  0x81   : > { %3251 = vmatprep.subr.bf16.mxu0 %v3461_v13  ;;  %v1943_v30 = vshll.u32 %v2844_v11, 16 }
  0x83   : > { %3156 = vmatpush3.bf16.msra.mxu1 %v3460_v12  ;;  %v1936_v12 = vrot.slane %v1934_v63, 4  ;;  %v1945_v45 = vrot.slane %v1943_v30, 5 }
  0x84   : > { %3252 = vmatpush3.bf16.msra.mxu0 %v3461_v13  ;;  %3285 = vmatprep.subr.bf16.mxu1 %v3466_v15  ;;  %v1939_v13 = vrot.slane %v1937_v0, 5 }
  0x85   : > { %3261 = vmatprep.subr.bf16.mxu0 %v3465_v16 }
  0x86   : > { %3158 = vmatmul.mubr.bf16.vlgmr.msra.gmra.mrb[0].mxu1 %v3463_v14  ;;  %v1950_v14 = vrot.slane %v1948_v2, 4  ;;  %v1940_v29 = vor.u32 %v1939_v13, %v1936_v12 }
  0x87   : > { %3254 = vmatmul.mubr.bf16.vlgmr.msra.gmra.mrb[0].mxu0 %v3467_v17  ;;  %3286 = vmatpush3.bf16.msra.mxu1 %v3466_v15  ;;  %v1953_v15 = vrot.slane %v1951_v3, 5  ;;  %v2849_v17 = vld [vmem:[%s3577_s24 + $0x40] sm:$0xf] }
  0x88   : > { %3262 = vmatpush3.bf16.msra.mxu0 %v3465_v16  ;;  %3287 = vmatprep.subr.bf16.mxu1 %v3469_v19  ;;  %v2847_v16 = vld [vmem:[%s3577_s24 + $0x38] sm:$0xf]  ;;  %v1976_v26 = vshrl.u32 %v2849_v17, 16  ;;  %v1979_v27 = vshll.u32 %v2849_v17, 16  ;;  %v1941_v44 = vrot.slane %v1940_v29, 4 }
  0x89   : > { %3263 = vmatprep.subr.bf16.mxu0 %v3468_v18  ;;  %3161 = vmatprep.mubr.bf16.mxu1 %v3470_v20  ;;  %v1915_v20 = vshll.u32 %v2840_v5, 16  ;;  %v1962_v24 = vshrl.u32 %v2847_v16, 16  ;;  %v1965_v25 = vshll.u32 %v2847_v16, 16  ;;  %v1954_v31 = vor.u32 %v1953_v15, %v1950_v14 }
  0x8a   : > { %3257 = vmatprep.mubr.bf16.mxu0 %v3480_v22  ;;  %v1929_v22 = vshll.u32 %v2842_v10, 16  ;;  %v1978_v42 = vrot.slane %v1976_v26, 4  ;;  %v1946_v56 = vsel %vm3648_vm2, %v1941_v44, %v1945_v45 }
  0x8b   : > { %3288 = vmatpush3.bf16.msra.mxu1 %v3469_v19  ;;  %v1912_v19 = vor.u32 %v1911_v7, %v1908_v6  ;;  %v1964_v40 = vrot.slane %v1962_v24, 4  ;;  %v1967_v41 = vrot.slane %v1965_v25, 5  ;;  %v1955_v46 = vrot.slane %v1954_v31, 4 }
  0x8c   : > { %3264 = vmatpush3.bf16.msra.mxu0 %v3468_v18  ;;  %3289 = vmatprep.subr.bf16.mxu1 %v3473_v21  ;;  %v2846_v18 = vld [vmem:[%s3577_s24 + $0x34] sm:$0x1]  ;;  %v1931_v38 = vrot.slane %v1929_v22, 5 }
  0x8d   : > { %3265 = vmatprep.subr.bf16.mxu0 %v3472_v33  ;;  %v1957_v32 = vshll.u32 %v2846_v18, 16  ;;  %v1913_v35 = vrot.slane %v1912_v19, 4  ;;  %v1968_v52 = vor.u32 %v1967_v41, %v1964_v40 }
  0x8e   : > { %3162 = vmatmul.mubr.bf16.gmra.mrb[4].mxu1 %v3471_v36  ;;  %v1917_v36 = vrot.slane %v1915_v20, 5 }
  0x8f   : > { %3290 = vmatpush3.bf16.msra.mxu1 %v3473_v21  ;;  %3258 = vmatmul.mubr.bf16.gmra.mrb[4].mxu0 %v3481_v39  ;;  %v1926_v21 = vor.u32 %v1925_v9, %v1922_v8  ;;  %v2848_v39 = vld [vmem:[%s3577_s24 + $0x3c] sm:$0x1]  ;;  %v1969_v63 = vrot.slane %v1968_v52, 4 }
  0x90   : > { %3266 = vmatpush3.bf16.msra.mxu0 %v3472_v33  ;;  %3291 = vmatprep.subr.bf16.mxu1 %v3475_v43  ;;  %v3484_v33 = vld [vmem:[%s3952_s1 + $0x238] sm:$0xff]   ;;  %v1971_v50 = vshll.u32 %v2848_v39, 16 }
  0x91   : > { %3267 = vmatprep.subr.bf16.mxu0 %v3474_v47  ;;  %3301 = vmatprep.mubr.bf16.mxu1 %v3486_v49  ;;  %v1927_v37 = vrot.slane %v1926_v21, 4  ;;  %v1918_v49 = vsel %vm3648_vm2, %v1913_v35, %v1917_v36 }
  0x92   : > { %3277 = vmatprep.mubr.bf16.mxu0 %v2867_v62  ;;  %v1973_v61 = vrot.slane %v1971_v50, 5 }
  0x93   : > { %3292 = vmatpush3.bf16.msra.mxu1 %v3475_v43  ;;  %v1981_v43 = vrot.slane %v1979_v27, 5  ;;  %v1932_v51 = vsel %vm3648_vm2, %v1927_v37, %v1931_v38 }
  0x94   : > { %3268 = vmatpush3.bf16.msra.mxu0 %v3474_v47  ;;  %3293 = vmatprep.subr.bf16.mxu1 %v3477_v59  ;;  %v1959_v47 = vrot.slane %v1957_v32, 5  ;;  %v1974_v2 = vsel %vm3648_vm2, %v1969_v63, %v1973_v61 }
  0x95   : > { %3269 = vmatprep.subr.bf16.mxu0 %v3476_v58  ;;  %v1982_v54 = vor.u32 %v1981_v43, %v1978_v42 }
  0x96   : > { %v1960_v57 = vsel %vm3648_vm2, %v1955_v46, %v1959_v47 }
  0x97   : > { %3294 = vmatpush3.bf16.msra.mxu1 %v3477_v59  ;;  %v2868_v59 = vcombine.low %v1918_v49, %v1932_v51  ;;  %v2869_v62 = vcombine.low %v1946_v56, %v1960_v57  ;;  %v1983_v0 = vrot.slane %v1982_v54, 4 }
  0x98   : > { %3270 = vmatpush3.bf16.msra.mxu0 %v3476_v58  ;;  %3295 = vmatprep.subr.bf16.mxu1 %v3479_v1  ;;  %v3487_v58 = vld [vmem:[%s3577_s24 + $0xe8] ss:$8 sps:$4 sm:$0xff]  }
  0x99   : > { %3271 = vmatprep.subr.bf16.mxu0 %v3478_v4 }
  0x9b   : > { %3296 = vmatpush3.bf16.msra.mxu1 %v3479_v1  ;;  %v1987_v1 = vrot.slane %v1985_v55, 5 }
  0x9c   : > { %3272 = vmatpush3.bf16.msra.mxu0 %v3478_v4  ;;  %3297 = vmatprep.subr.bf16.mxu1 %v3483_v23  ;;  %v3489_v4 = vld [vmem:[%s3577_s24 + $0x108] ss:$8 sps:$4 sm:$0xff]  }
  0x9d   : > { %3273 = vmatprep.subr.bf16.mxu0 %v3482_v28  ;;  %v1988_v3 = vsel %vm3648_vm2, %v1983_v0, %v1987_v1 }
  0x9e   : > { %v2870_v5 = vcombine.low %v1974_v2, %v1988_v3 }
  0x9f   : > { %3298 = vmatpush3.bf16.msra.mxu1 %v3483_v23 }
  0xa0   : > { %3274 = vmatpush3.bf16.msra.mxu0 %v3482_v28  ;;  %3299 = vmatprep.subr.bf16.mxu1 %v3485_v34 }
  0xa1   : > { %3275 = vmatprep.subr.bf16.mxu0 %v3484_v33 }
  0xa3   : > { %3300 = vmatpush3.bf16.msra.mxu1 %v3485_v34 }
  0xa4   : > { %3276 = vmatpush3.bf16.msra.mxu0 %v3484_v33 }
  0xa6   : > { %3302 = vmatmul.mubr.bf16.vlgmr.msra.gmra.mrb[8].mxu1 %v3487_v58 }
  0xa7   : > { %3278 = vmatmul.mubr.bf16.vlgmr.msra.gmra.mrb[0].mxu0 %v2868_v59  ;;  %3305 = vmatprep.mubr.bf16.mxu1 %v3488_v60 }
  0xa8   : > { %3281 = vmatprep.mubr.bf16.mxu0 %v2869_v62 }
  0xae   : > { %3306 = vmatmul.mubr.bf16.gmra.mrb[12].mxu1 %v3489_v4 }
  0xaf   : > { %3282 = vmatmul.mubr.bf16.gmra.mrb[4].mxu0 %v2870_v5 }
 0x159   : > { %v3159_v6 = vpop.f32.mrb[0].mxu1 }
 0x15a   : > { %v1027_v7 = vpop.f32.mrb[1].mxu1 }
 0x15b   : > { %v3160_v8 = vpop.f32.mrb[2].mxu1 }
 0x15c   : > { %v1030_v9 = vpop.f32.mrb[3].mxu1 }
 0x161   : > { %v3163_v10 = vpop.f32.mrb[4].mxu1 }
 0x162   : > { %v1043_v11 = vpop.f32.mrb[5].mxu1 }
 0x163   : > { %v3164_v12 = vpop.f32.mrb[6].mxu1 }
 0x164   : > { %v3919_v13 = vpop.f32.mrb[7].mxu1 }
 0x179   : > { %v3303_v14 = vpop.f32.mrb[8].mxu1 }
 0x17a   : > { %v3279_v15 = vpop.f32.mrb[0].mxu0  ;;  %v2326_v16 = vpop.f32.mrb[9].mxu1  ;;  %v2388_v30 = vmul.f32 %v3303_v14, %v3303_v14 }
 0x17b   : > { %v3309_v17 = vadd.f32 %v3279_v15, %v3159_v6  ;;  %v2104_v53 = vpop.f32.mrb[1].mxu0  ;;  %v3304_v18 = vpop.f32.mrb[10].mxu1  ;;  %v2386_v20 = vmul.f32 %v2326_v16, %v2326_v16 }
 0x17c   : > { %v3310_v19 = vadd.f32 %v2104_v53, %v1027_v7  ;;  %v3280_v21 = vpop.f32.mrb[2].mxu0  ;;  %v2931_v22 = vpack.c.bf16 %v3304_v18, %v3303_v14  ;;  %v2329_v23 = vpop.f32.mrb[11].mxu1  ;;  %v2389_v38 = vmul.f32 %v3304_v18, %v3304_v18 }
 0x17d   : > { %v3311_v24 = vadd.f32 %v3280_v21, %v3160_v8  ;;  %v2107_v25 = vpop.f32.mrb[3].mxu0  ;;  %v2926_v26 = vpack.c.bf16 %v2329_v23, %v2326_v16  ;;  %v2373_v27 = vadd.f32 %v2329_v23, %v2326_v16  ;;  %v2387_v29 = vmul.f32 %v2329_v23, %v2329_v23 }
 0x17e   : > { %2946 = vst [vmem:[%s3925_s17 + $0x8] sm:$0xff] %v2931_v22   ;;  %v3312_v28 = vadd.f32 %v2107_v25, %v1030_v9  ;;  %v2172_v31 = vmul.f32 %v3310_v19, %v3310_v19  ;;  %v2174_v41 = vmul.f32 %v3309_v17, %v3309_v17 }
 0x17f   : > { %v2911_v32 = vpack.c.bf16 %v3311_v24, %v3309_v17  ;;  %2927 = vst [vmem:[%s3925_s17] sm:$0xff] %v2926_v26   ;;  %v2374_v33 = vadd.f32 %v3303_v14, %v2373_v27  ;;  %v2394_v37 = vadd.f32 %v2387_v29, %v2386_v20  ;;  %v2175_v47 = vmul.f32 %v3311_v24, %v3311_v24 }
 0x180   : > { %v2906_v34 = vpack.c.bf16 %v3312_v28, %v3310_v19  ;;  %v2159_v35 = vadd.f32 %v3312_v28, %v3310_v19  ;;  %v2173_v36 = vmul.f32 %v3312_v28, %v3312_v28 }
 0x181   : > { %2943 = vst [vmem:[%s3930_s20 + $0x8] sm:$0xff] %v2911_v32   ;;  %v3307_v39 = vpop.f32.mrb[12].mxu1  ;;  %v2375_v40 = vadd.f32 %v3304_v18, %v2374_v33  ;;  %v2395_v44 = vadd.f32 %v2394_v37, %v2388_v30 }
 0x182   : > { %2907 = vst [vmem:[%s3930_s20] sm:$0xff] %v2906_v34   ;;  %v2160_v42 = vadd.f32 %v3309_v17, %v2159_v35  ;;  %v2180_v43 = vadd.f32 %v2173_v36, %v2172_v31  ;;  %v3283_v45 = vpop.f32.mrb[4].mxu0  ;;  %v2342_v46 = vpop.f32.mrb[13].mxu1 }
 0x183   : > { %v3313_v48 = vadd.f32 %v3283_v45, %v3163_v10  ;;  %v2120_v49 = vpop.f32.mrb[5].mxu0  ;;  %v2376_v50 = vadd.f32 %v2375_v40, %v2342_v46  ;;  %v2390_v51 = vmul.f32 %v2342_v46, %v2342_v46  ;;  %v3308_v52 = vpop.f32.mrb[14].mxu1  ;;  %v2396_v57 = vadd.f32 %v2395_v44, %v2389_v38 }
 0x184   : > { %v2181_v54 = vadd.f32 %v2180_v43, %v2174_v41  ;;  %v3314_v55 = vadd.f32 %v2120_v49, %v1043_v11  ;;  %v2161_v56 = vadd.f32 %v3311_v24, %v2160_v42  ;;  %v3284_v58 = vpop.f32.mrb[6].mxu0  ;;  %v2345_v59 = vpop.f32.mrb[15].mxu1  ;;  %v2941_v61 = vpack.c.bf16 %v3308_v52, %v3307_v39 }
 0x185   : > { %v3315_v60 = vadd.f32 %v3284_v58, %v3164_v12  ;;  %v2123_v62 = vpop.f32.mrb[7].mxu0  ;;  %v2397_v2 = vadd.f32 %v2396_v57, %v2390_v51  ;;  %v2936_v5 = vpack.c.bf16 %v2345_v59, %v2342_v46  ;;  %v2377_v7 = vadd.f32 %v2376_v50, %v2345_v59 }
 0x186   : > { %v2162_v63 = vadd.f32 %v3314_v55, %v2161_v56  ;;  %v2176_v0 = vmul.f32 %v3314_v55, %v3314_v55  ;;  %v2182_v1 = vadd.f32 %v2181_v54, %v2175_v47  ;;  %2948 = vst [vmem:[%s3925_s17 + $0x18] sm:$0xff] %v2941_v61   ;;  %v3316_v4 = vadd.f32 %v2123_v62, %v3919_v13 }
 0x187   : > { %v2921_v3 = vpack.c.bf16 %v3315_v60, %v3313_v48  ;;  %v2391_v8 = vmul.f32 %v2345_v59, %v2345_v59  ;;  %2947 = vst [vmem:[%s3925_s17 + $0x10] sm:$0xff] %v2936_v5   ;;  %v2392_v12 = vmul.f32 %v3307_v39, %v3307_v39  ;;  %v2378_v14 = vadd.f32 %v3307_v39, %v2377_v7 }
 0x188   : > { %v2183_v6 = vadd.f32 %v2182_v1, %v2176_v0  ;;  %v2916_v9 = vpack.c.bf16 %v3316_v4, %v3314_v55  ;;  %v2163_v10 = vadd.f32 %v3316_v4, %v2162_v63  ;;  %v2177_v11 = vmul.f32 %v3316_v4, %v3316_v4 }
 0x189   : > { %2945 = vst [vmem:[%s3930_s20 + $0x18] sm:$0xff] %v2921_v3   ;;  %v2398_v15 = vadd.f32 %v2397_v2, %v2391_v8  ;;  %v2178_v16 = vmul.f32 %v3313_v48, %v3313_v48  ;;  %v2393_v18 = vmul.f32 %v3308_v52, %v3308_v52  ;;  %v2379_v19 = vadd.f32 %v3308_v52, %v2378_v14 }
 0x18a   : > { %2944 = vst [vmem:[%s3930_s20 + $0x10] sm:$0xff] %v2916_v9   ;;  %v2164_v17 = vadd.f32 %v3313_v48, %v2163_v10  ;;  %v2184_v53 = vadd.f32 %v2183_v6, %v2177_v11  ;;  %v2179_v13 = vmul.f32 %v3315_v60, %v3315_v60 }
 0x18b   : > { %v2399_v20 = vadd.f32 %v2398_v15, %v2392_v12  ;;  %v2380_v23 = vrot.slane %v2379_v19, 4 }
 0x18c   : > { %v2165_v21 = vadd.f32 %v3315_v60, %v2164_v17  ;;  %v2185_v22 = vadd.f32 %v2184_v53, %v2178_v16 }
 0x18d   : > { %v2400_v24 = vadd.f32 %v2399_v20, %v2393_v18  ;;  %v2381_v27 = vadd.f32 %v2380_v23, %v2379_v19 }
 0x18e   : > { %v2166_v25 = vrot.slane %v2165_v21, 4  ;;  %v2186_v26 = vadd.f32 %v2185_v22, %v2179_v13 }
 0x18f   : > { %v2401_v28 = vrot.slane %v2400_v24, 4  ;;  %v2382_v31 = vrot.slane %v2381_v27, 2 }
 0x190   : > { %v2167_v29 = vadd.f32 %v2166_v25, %v2165_v21  ;;  %v2187_v30 = vrot.slane %v2186_v26, 4 }
 0x191   : > { %v2402_v32 = vadd.f32 %v2401_v28, %v2400_v24  ;;  %v2383_v35 = vadd.f32 %v2382_v31, %v2381_v27 }
 0x192   : > { %v2168_v33 = vrot.slane %v2167_v29, 2  ;;  %v2188_v34 = vadd.f32 %v2187_v30, %v2186_v26 }
 0x193   : > { %v2403_v36 = vrot.slane %v2402_v32, 2  ;;  %v2384_v39 = vrot.slane %v2383_v35, 1 }
 0x194   : > { %v2169_v37 = vadd.f32 %v2168_v33, %v2167_v29  ;;  %v2189_v38 = vrot.slane %v2188_v34, 2 }
 0x195   : > { %v2404_v40 = vadd.f32 %v2403_v36, %v2402_v32  ;;  %v2385_v45 = vadd.f32 %v2384_v39, %v2383_v35 }
 0x196   : > { %v2170_v41 = vrot.slane %v2169_v37, 1  ;;  %v2190_v42 = vadd.f32 %v2189_v38, %v2188_v34 }
 0x197   : > { %v2405_v43 = vrot.slane %v2404_v40, 1 }
 0x198   : > { %v2191_v44 = vrot.slane %v2190_v42, 1  ;;  %v2171_v47 = vadd.f32 %v2170_v41, %v2169_v37 }
 0x199   : > { %v2406_v46 = vadd.f32 %v2405_v43, %v2404_v40 }
 0x19a   : > { %v2192_v48 = vadd.f32 %v2191_v44, %v2190_v42 }
 0x19b   : > { %v2407_v49 = vsel %vm2193_vm3, %v2385_v45, %v2406_v46 }
 0x19c   : > { %v2194_v50 = vsel %vm2193_vm3, %v2171_v47, %v2192_v48  ;;  %2408 = vst [vmem:[%s284_s27] sm:$0x3] %v2407_v49 }
 0x19d   : > { %2195 = vst [vmem:[%s275_s30] sm:$0x3] %v2194_v50 }
 0x19e PF: > { %s17_s21 = sadd.s32 1, %s3496_s21  }
 0x19f   : > { %p14_p4 = scmp.ge.s32.totalorder %s17_s21, 4  }
 0x1a1   :  { %16 = sbr.rel (!%p14_p4) target bundleno = 1 (0x1), region = 111 }

// kernel: mix_block_forward.4
= control target key start
LH: loop header
LB: loop body
LE: loop exit
PB: predicated region body
PF: predicated region fallthrough
CT: control target
= control target key end

     0   :  { %s3455_s18 = smov 0   ;;  %s4101_s0 = inlined_call_operand.vmem [shape: bf16[2,8,8,128], index: 0, kind: input, shape index: {}]   ;;  %s4102_s1 = inlined_call_operand.vmem [shape: f32[1,128], index: 1, kind: input, shape index: {}]   ;;  %s4103_s2 = inlined_call_operand.vmem [shape: f32[1,128], index: 2, kind: input, shape index: {}]   ;;  %s4104_s3 = inlined_call_operand.vmem [shape: bf16[9,128,128], index: 3, kind: input, shape index: {}]   ;;  %s4105_s4 = inlined_call_operand.vmem [shape: bf16[2,8,8,128], index: 4, kind: output, shape index: {0}]   ;;  %s4106_s5 = inlined_call_operand.vmem [shape: f32[2,2,128], index: 5, kind: output, shape index: {1}]  }
   0x1 LB: > { %s2585_s19 = sadd.s32 4294967295, %s3422_s18   ;;  %p2589_p0 = scmp.ge.s32.totalorder %s3422_s18, 1  ;;  %s3422_s18 = sphi %s3455_s18, %s16_s18  }
   0x2   : > { %p190_p1 = scmp.lt.s32.totalorder %s3422_s18, 3 }
   0x4   : > { %p191_p2 = pnand %p2589_p0, %p190_p1 }
   0x5   : > { %v3332_v0 = vld [vmem:[%s4104_s3 + $0x40] sm:$0xff] (!%p191_p2)   ;;  %v3334_v2 = vld [vmem:[%s4104_s3 + $0x48] sm:$0xff] (!%p191_p2)   ;;  %p3474_p3 = scmp.lt.s32.totalorder (!%p191_p2), %s2585_s19, 1  ;;  %v3424_v3 = vmov (!%p191_p2), 0   ;;  %v3336_v5 = vld [vmem:[%s4104_s3 + $0x50] sm:$0xff] (!%p191_p2)   ;;  %vm424_vm0 = vcmask (!%p191_p2), 1043456  }
   0x6   : > { %194 = sbr.rel (%p191_p2) target bundleno = 454 (0x1c6), region = 36  ;;  %v3333_v1 = vld [vmem:[%s4104_s3 + $0x100] sm:$0xff] (!%p191_p2)   ;;  %3027 = vmatprep.subr.bf16.mxu1 (!%p191_p2), %v3332_v0  ;;  %299 = vst [vmem:[#allocation2] sm:$0xf] (!%p191_p2), %v3424_v3  ;;  %300 = vst [vmem:[#allocation2 + $0x4] sm:$0x1] (!%p191_p2), %v3424_v3 }
   0x7   : > { %301 = vst [vmem:[#allocation2 + $0x8] sm:$0xf] (!%p191_p2), %v3424_v3  ;;  %302 = vst [vmem:[#allocation2 + $0xc] sm:$0x1] (!%p191_p2), %v3424_v3  ;;  %3123 = vmatprep.subr.bf16.mxu0 (!%p191_p2), %v3333_v1  ;;  %3028 = vmatpush3.bf16.msra.mxu1 (!%p191_p2), %v3332_v0  ;;  %v3335_v4 = vld [vmem:[%s4104_s3 + $0x108] sm:$0xff] (!%p191_p2)   ;;  %v3337_v6 = vld [vmem:[%s4104_s3 + $0x110] sm:$0xff] (!%p191_p2)  }
   0x8   : > { %303 = vst [vmem:[#allocation2 + $0x10] sm:$0xf] (!%p191_p2), %v3424_v3  ;;  %304 = vst [vmem:[#allocation2 + $0x14] sm:$0x1] (!%p191_p2), %v3424_v3  ;;  %3124 = vmatpush3.bf16.msra.mxu0 (!%p191_p2), %v3333_v1  ;;  %3029 = vmatprep.subr.bf16.mxu1 (!%p191_p2), %v3334_v2  ;;  %v3338_v7 = vld [vmem:[%s4104_s3 + $0x58] sm:$0xff] (!%p191_p2)   ;;  %v3340_v9 = vld [vmem:[%s4104_s3 + $0x60] sm:$0xff] (!%p191_p2)  }
   0x9   : > { %305 = vst [vmem:[#allocation2 + $0x18] sm:$0xf] (!%p191_p2), %v3424_v3  ;;  %306 = vst [vmem:[#allocation2 + $0x1c] sm:$0x1] (!%p191_p2), %v3424_v3  ;;  %3125 = vmatprep.subr.bf16.mxu0 (!%p191_p2), %v3335_v4  ;;  %v3339_v8 = vld [vmem:[%s4104_s3 + $0x118] sm:$0xff] (!%p191_p2)   ;;  %v3341_v10 = vld [vmem:[%s4104_s3 + $0x120] sm:$0xff] (!%p191_p2)  }
   0xa   : > { %307 = vst [vmem:[#allocation2 + $0x20] sm:$0xf] (!%p191_p2), %v3424_v3  ;;  %308 = vst [vmem:[#allocation2 + $0x24] sm:$0x1] (!%p191_p2), %v3424_v3  ;;  %v3342_v11 = vld [vmem:[%s4104_s3 + $0x68] sm:$0xff] (!%p191_p2)   ;;  %v3344_v20 = vld [vmem:[%s4104_s3 + $0x70] sm:$0xff] (!%p191_p2)  }
   0xb   : > { %309 = vst [vmem:[#allocation2 + $0x28] sm:$0xf] (!%p191_p2), %v3424_v3  ;;  %310 = vst [vmem:[#allocation2 + $0x2c] sm:$0x1] (!%p191_p2), %v3424_v3  ;;  %3030 = vmatpush3.bf16.msra.mxu1 (!%p191_p2), %v3334_v2  ;;  %v3520_v13 = vld [vmem:[%s4102_s1] ss:$0 sm:$0xff] (!%p191_p2) }
   0xc   : > { %311 = vst [vmem:[#allocation2 + $0x30] sm:$0xf] (!%p191_p2), %v3424_v3  ;;  %312 = vst [vmem:[#allocation2 + $0x34] sm:$0x1] (!%p191_p2), %v3424_v3  ;;  %3126 = vmatpush3.bf16.msra.mxu0 (!%p191_p2), %v3335_v4  ;;  %3031 = vmatprep.subr.bf16.mxu1 (!%p191_p2), %v3336_v5  ;;  %v3343_v14 = vld [vmem:[%s4104_s3 + $0x128] sm:$0xff] (!%p191_p2)   ;;  %v3345_v23 = vld [vmem:[%s4104_s3 + $0x130] sm:$0xff] (!%p191_p2)  }
   0xd   : > { %313 = vst [vmem:[#allocation2 + $0x38] sm:$0xf] %v3424_v3  ;;  %314 = vst [vmem:[#allocation2 + $0x3c] sm:$0x1] %v3424_v3  ;;  %s4117_s19 = smov (!%p3474_p3, %s2585_s19), 1  ;;  %3127 = vmatprep.subr.bf16.mxu0 %v3337_v6  ;;  %v3346_v28 = vld [vmem:[%s4104_s3 + $0x78] sm:$0xff]  }
   0xe   : > { %315 = vst [vmem:[#allocation2 + $0x40] sm:$0xf] %v3424_v3  ;;  %316 = vst [vmem:[#allocation2 + $0x44] sm:$0x1] %v3424_v3  ;;  %s2867_s12 = sshll.u32 %s4117_s19, 5  ;;  %vm430_vm1 = vcmask 1040384  }
   0xf   : > { %317 = vst [vmem:[#allocation2 + $0x48] sm:$0xf] %v3424_v3  ;;  %318 = vst [vmem:[#allocation2 + $0x4c] sm:$0x1] %v3424_v3  ;;  %3032 = vmatpush3.bf16.msra.mxu1 %v3336_v5  ;;  %s3511_s21 = scalar_lea.vmem %s4101_s0, %s2867_s12  ;;  %v3528_v17 = vld [vmem:[%s4103_s2] ss:$0 sm:$0xff]  ;;  %s231_s20 = scalar_lea.vmem %s4105_s4, %s2867_s12 }
  0x10   : > { %3128 = vmatpush3.bf16.msra.mxu0 %v3337_v6  ;;  %3033 = vmatprep.subr.bf16.mxu1 %v3338_v7  ;;  %v2878_v12 = vld [vmem:[%s3511_s21] sm:$0xff]   ;;  %v2913_v27 = vld [vmem:[%s3511_s21 + $0x8] sm:$0xff]   ;;  %vm425_vm2 = vsmask.f32 7938  ;;  %vm431_vm3 = vsmask.f32 256 }
  0x11   : > { %3129 = vmatprep.subr.bf16.mxu0 %v3339_v8  ;;  %v2879_v15 = vunpack.c.l.bf16 %v2878_v12  ;;  %v2880_v16 = vunpack.c.h.bf16 %v2878_v12  ;;  %v3530_v18 = vld [vmem:[#allocation2] sm:$0xf]  ;;  %v2883_v30 = vunpack.c.l.bf16 %v2913_v27  ;;  %v2884_v31 = vunpack.c.h.bf16 %v2913_v27  ;;  %v3347_v34 = vld [vmem:[%s4104_s3 + $0x138] sm:$0xff]   ;;  %v3555_v39 = vld [vmem:[#allocation2 + $0x4] sm:$0x1]  ;;  %s2594_s12 = sshll.u32 %s4117_s19, 1 }
  0x12   : > { %v514_v21 = vshrl.u32 %v3530_v18, 16  ;;  %v517_v25 = vshll.u32 %v3530_v18, 16  ;;  %v3560_v40 = vld [vmem:[%s4104_s3] sm:$0xff]   ;;  %v427_v46 = vld [vmem:[#allocation2 + $0x8] sm:$0xf]  ;;  %vm3571_vm6 = vmand %vm424_vm0, %vm425_vm2  ;;  %v523_v61 = vshll.u32 %v3555_v39, 16  ;;  %s235_s23 = scalar_lea.vmem %s4106_s5, %s2594_s12 }
  0x13   : > { %3034 = vmatpush3.bf16.msra.mxu1 %v3338_v7  ;;  %v260_v19 = vmul.f32 %v2879_v15, %v3520_v13  ;;  %v261_v22 = vmul.f32 %v2880_v16, %v3520_v13  ;;  %v262_v37 = vmul.f32 %v2883_v30, %v3520_v13  ;;  %v263_v38 = vmul.f32 %v2884_v31, %v3520_v13  ;;  %v3565_v44 = vld [vmem:[%s4104_s3 + $0x140] sm:$0xff]   ;;  %v433_v47 = vld [vmem:[#allocation2 + $0xc] sm:$0x1]  ;;  %v436_v53 = vld [vmem:[#allocation2 + $0x10] sm:$0xf] }
  0x14   : > { %3130 = vmatpush3.bf16.msra.mxu0 %v3339_v8  ;;  %3035 = vmatprep.subr.bf16.mxu1 %v3340_v9  ;;  %v3548_v32 = vrot.slane %v514_v21, 4  ;;  %v519_v36 = vrot.slane %v517_v25, 5  ;;  %vm510_vm4 = vsmask.f32 3328  ;;  %vm511_vm5 = vsmask.f32 7440  ;;  %vm3577_vm7 = vmand %vm430_vm1, %vm431_vm3 }
  0x15   : > { %3131 = vmatprep.subr.bf16.mxu0 %v3341_v10  ;;  %v275_v24 = vadd.f32 %v3528_v17, %v260_v19  ;;  %v276_v26 = vadd.f32 %v3528_v17, %v261_v22  ;;  %v277_v45 = vadd.f32 %v3528_v17, %v262_v37  ;;  %v278_v50 = vadd.f32 %v3528_v17, %v263_v38  ;;  %v439_v54 = vld [vmem:[#allocation2 + $0x14] sm:$0x1]  ;;  %v448_v16 = vld [vmem:[#allocation2 + $0x20] sm:$0xf]  ;;  %v451_v19 = vld [vmem:[#allocation2 + $0x24] sm:$0x1] }
  0x16   : > { %v520_v63 = vor.u32 %v519_v36, %v3548_v32  ;;  %vm3600_vm8 = vmor %vm510_vm4, %vm511_vm5  ;;  %v937_v32 = vrot.slane %v3555_v39, 5  ;;  %vm932_vm9 = vcmask 1042432   ;;  %vm933_vm10 = vcmask 1046532   ;;  %v3372_v39 = vld [vmem:[%s4104_s3 + $0x98] sm:$0xff]   ;;  %v3412_v27 = vld [vmem:[%s4104_s3 + $0x220] sm:$0xff]  }
  0x17   : > { %3036 = vmatpush3.bf16.msra.mxu1 %v3340_v9  ;;  %v283_v29 = vmax.f32 %v275_v24, 0.0  ;;  %v284_v33 = vmax.f32 %v276_v26, 0.0  ;;  %v285_v55 = vmax.f32 %v277_v45, 0.0  ;;  %v286_v58 = vmax.f32 %v278_v50, 0.0  ;;  %v442_v9 = vld [vmem:[#allocation2 + $0x18] sm:$0xf]  ;;  %vm3819_vm11 = vmor %vm932_vm9, %vm933_vm10 }
  0x18   : > { %3132 = vmatpush3.bf16.msra.mxu0 %v3341_v10  ;;  %3037 = vmatprep.subr.bf16.mxu1 %v3342_v11  ;;  %v445_v10 = vld [vmem:[#allocation2 + $0x1c] sm:$0x1]  ;;  %v3596_v24 = vrot.slane %v523_v61, 5 }
  0x19   : > { %3133 = vmatprep.subr.bf16.mxu0 %v3343_v14  ;;  %v2869_v35 = vpack.c.bf16 %v283_v29, %v283_v29  ;;  %v2870_v41 = vpack.c.bf16 %v284_v33, %v284_v33  ;;  %v2871_v62 = vpack.c.bf16 %v285_v55, %v285_v55  ;;  %v2872_v2 = vpack.c.bf16 %v286_v58, %v286_v58 }
  0x1b   : > { %3038 = vmatpush3.bf16.msra.mxu1 %v3342_v11  ;;  %v344_v42 = vshrl.u32 %v2869_v35, 16  ;;  %v347_v43 = vshll.u32 %v2869_v35, 16  ;;  %v352_v48 = vshrl.u32 %v2870_v41, 16  ;;  %v355_v49 = vshll.u32 %v2870_v41, 16  ;;  %v3614_v35 = vld [vmem:[%s3511_s21 + $0x18] sm:$0xff]  }
  0x1c   : > { %3134 = vmatpush3.bf16.msra.mxu0 %v3343_v14  ;;  %3039 = vmatprep.subr.bf16.mxu1 %v3344_v20  ;;  %v360_v5 = vshrl.u32 %v2871_v62, 16  ;;  %v363_v6 = vshll.u32 %v2871_v62, 16  ;;  %v368_v11 = vshrl.u32 %v2872_v2, 16  ;;  %v371_v12 = vshll.u32 %v2872_v2, 16 }
  0x1d   : > { %3135 = vmatprep.subr.bf16.mxu0 %v3345_v23  ;;  %v346_v51 = vrot.slane %v344_v42, 7  ;;  %v354_v57 = vrot.slane %v352_v48, 7  ;;  %v2891_v58 = vunpack.c.l.bf16 %v3614_v35 }
  0x1e   : > { %v362_v14 = vrot.slane %v360_v5, 7  ;;  %v370_v15 = vrot.slane %v368_v11, 7 }
  0x1f   : > { %3040 = vmatpush3.bf16.msra.mxu1 %v3344_v20  ;;  %v349_v59 = vor.u32 %v347_v43, %v346_v51  ;;  %v350_v60 = vrot.slane %v346_v51, 4  ;;  %v357_v0 = vor.u32 %v355_v49, %v354_v57  ;;  %v358_v1 = vrot.slane %v354_v57, 4  ;;  %v2914_v20 = vld [vmem:[%s3511_s21 + $0x10] sm:$0xff]  }
  0x20   : > { %3136 = vmatpush3.bf16.msra.mxu0 %v3345_v23  ;;  %3041 = vmatprep.subr.bf16.mxu1 %v3346_v28  ;;  %v365_v21 = vor.u32 %v363_v6, %v362_v14  ;;  %v366_v22 = vrot.slane %v362_v14, 4  ;;  %v3594_v23 = vrot.slane %v520_v63, 4  ;;  %v373_v25 = vor.u32 %v371_v12, %v370_v15 }
  0x21   : > { %3137 = vmatprep.subr.bf16.mxu0 %v3347_v34  ;;  %v428_v3 = vsel %vm3571_vm6, %v349_v59, %v427_v46  ;;  %v434_v4 = vsel %vm3577_vm7, %v350_v60, %v433_v47  ;;  %v437_v7 = vsel %vm3571_vm6, %v357_v0, %v436_v53  ;;  %v440_v8 = vsel %vm3577_vm7, %v358_v1, %v439_v54 }
  0x22   : > { %429 = vst [vmem:[#allocation2 + $0x8] sm:$0xf] %v428_v3  ;;  %435 = vst [vmem:[#allocation2 + $0xc] sm:$0x1] %v434_v4  ;;  %v374_v26 = vrot.slane %v370_v15, 4  ;;  %v446_v29 = vsel %vm3577_vm7, %v366_v22, %v445_v10  ;;  %v2887_v30 = vunpack.c.l.bf16 %v2914_v20  ;;  %v2888_v31 = vunpack.c.h.bf16 %v2914_v20 }
  0x23   : > { %3042 = vmatpush3.bf16.msra.mxu1 %v3346_v28  ;;  %438 = vst [vmem:[#allocation2 + $0x10] sm:$0xf] %v437_v7  ;;  %441 = vst [vmem:[#allocation2 + $0x14] sm:$0x1] %v440_v8  ;;  %v443_v28 = vsel %vm3571_vm6, %v365_v21, %v442_v9  ;;  %v449_v33 = vsel %vm3571_vm6, %v373_v25, %v448_v16  ;;  %v526_v41 = vsel %vm3600_vm8, %v3594_v23, %v3596_v24 }
  0x24   : > { %3138 = vmatpush3.bf16.msra.mxu0 %v3347_v34  ;;  %3051 = vmatprep.subr.bf16.mxu1 %v3560_v40  ;;  %444 = vst [vmem:[#allocation2 + $0x18] sm:$0xf] %v443_v28  ;;  %447 = vst [vmem:[#allocation2 + $0x1c] sm:$0x1] %v446_v29  ;;  %v452_v34 = vsel %vm3577_vm7, %v374_v26, %v451_v19  ;;  %v264_v51 = vmul.f32 %v2887_v30, %v3520_v13  ;;  %v2892_v4 = vunpack.c.h.bf16 %v3614_v35 }
  0x25   : > { %3147 = vmatprep.subr.bf16.mxu0 %v3565_v44  ;;  %450 = vst [vmem:[#allocation2 + $0x20] sm:$0xf] %v449_v33  ;;  %453 = vst [vmem:[#allocation2 + $0x24] sm:$0x1] %v452_v34  ;;  %v265_v53 = vmul.f32 %v2888_v31, %v3520_v13 }
  0x29   : > { %v3616_v36 = vld [vmem:[#allocation2 + $0x8] sm:$0xf]  ;;  %v3618_v37 = vld [vmem:[#allocation2 + $0xc] sm:$0x1] }
  0x2a   : > { %v1291_v38 = vld [vmem:[#allocation2 + $0x8] sm:$0xf]  ;;  %v528_v42 = vshrl.u32 %v3616_v36, 16  ;;  %v531_v43 = vshll.u32 %v3616_v36, 16  ;;  %v537_v45 = vshll.u32 %v3618_v37, 16 }
  0x2b   : > { %v3627_v46 = vld [vmem:[#allocation2 + $0xc] sm:$0x1]  ;;  %v1293_v47 = vld [vmem:[#allocation2 + $0x10] sm:$0xf]  ;;  %v3629_v48 = vld [vmem:[#allocation2 + $0x14] sm:$0x1] }
  0x2c   : > { %v1308_v49 = vshrl.u32 %v1291_v38, 16  ;;  %v1311_v50 = vshll.u32 %v1291_v38, 16  ;;  %v530_v54 = vrot.slane %v528_v42, 4  ;;  %v533_v55 = vrot.slane %v531_v43, 5  ;;  %v3635_v63 = vld [vmem:[#allocation2 + $0x10] sm:$0xf] }
  0x2d   : > { %v1317_v57 = vshll.u32 %v3627_v46, 16  ;;  %v1322_v61 = vshrl.u32 %v1293_v47, 16  ;;  %v1325_v62 = vshll.u32 %v1293_v47, 16  ;;  %v539_v1 = vrot.slane %v537_v45, 5  ;;  %v3638_v3 = vld [vmem:[#allocation2 + $0x14] sm:$0x1] }
  0x2e   : > { %v1310_v59 = vrot.slane %v1308_v49, 4  ;;  %v1313_v60 = vrot.slane %v1311_v50, 5  ;;  %v534_v0 = vor.u32 %v533_v55, %v530_v54  ;;  %v1331_v2 = vshll.u32 %v3629_v48, 16  ;;  %v3641_v9 = vld [vmem:[#allocation2 + $0x18] sm:$0xf] }
  0x2f   : > { %v1319_v6 = vrot.slane %v1317_v57, 5  ;;  %v1324_v7 = vrot.slane %v1322_v61, 4  ;;  %v1327_v8 = vrot.slane %v1325_v62, 5  ;;  %v542_v12 = vshrl.u32 %v3635_v63, 16  ;;  %v3645_v19 = vld [vmem:[#allocation2 + $0x1c] sm:$0x1] }
  0x30   : > { %v1314_v5 = vor.u32 %v1313_v60, %v1310_v59  ;;  %v535_v10 = vrot.slane %v534_v0, 4  ;;  %v1333_v11 = vrot.slane %v1331_v2, 5  ;;  %v545_v14 = vshll.u32 %v3635_v63, 16  ;;  %v1295_v26 = vld [vmem:[#allocation2 + $0x18] sm:$0xf] }
  0x31   : > { %v1328_v16 = vor.u32 %v1327_v8, %v1324_v7  ;;  %v551_v20 = vshll.u32 %v3638_v3, 16  ;;  %v556_v21 = vshrl.u32 %v3641_v9, 16  ;;  %v544_v23 = vrot.slane %v542_v12, 4  ;;  %v3654_v33 = vld [vmem:[#allocation2 + $0x1c] sm:$0x1] }
  0x32   : > { %v1315_v15 = vrot.slane %v1314_v5, 4  ;;  %v540_v22 = vsel %vm3600_vm8, %v535_v10, %v539_v1  ;;  %v547_v24 = vrot.slane %v545_v14, 5  ;;  %v559_v25 = vshll.u32 %v3641_v9, 16  ;;  %v1297_v43 = vld [vmem:[#allocation2 + $0x20] sm:$0xf] }
  0x33   : > { %v2621_v28 = vcombine.low %v526_v41, %v540_v22  ;;  %v1329_v30 = vrot.slane %v1328_v16, 4  ;;  %v553_v31 = vrot.slane %v551_v20, 5  ;;  %v558_v35 = vrot.slane %v556_v21, 4  ;;  %v3659_v47 = vld [vmem:[#allocation2 + $0x24] sm:$0x1]  ;;  %v3350_v21 = vld [vmem:[%s4104_s3 + $0x8] sm:$0xff]  }
  0x34   : > { %v1320_v29 = vsel %vm3600_vm8, %v1315_v15, %v1319_v6  ;;  %v548_v34 = vor.u32 %v547_v24, %v544_v23  ;;  %v561_v38 = vrot.slane %v559_v25, 5  ;;  %v565_v42 = vshll.u32 %v3645_v19, 16  ;;  %v3676_v23 = vld [vmem:[#allocation2 + $0x20] sm:$0xf] }
  0x35   : > { %3043 = vmatprep.mubr.bf16.mxu1 %v2621_v28  ;;  %v1334_v45 = vsel %vm3600_vm8, %v1329_v30, %v1333_v11  ;;  %v1336_v41 = vshrl.u32 %v1295_v26, 16  ;;  %v279_v49 = vadd.f32 %v3528_v17, %v264_v51  ;;  %v280_v50 = vadd.f32 %v3528_v17, %v265_v53 }
  0x36   : > { %v2725_v54 = vcombine.low %v1320_v29, %v1334_v45  ;;  %v549_v55 = vrot.slane %v548_v34, 4  ;;  %v562_v57 = vor.u32 %v561_v38, %v558_v35  ;;  %v567_v59 = vrot.slane %v565_v42, 5 }
  0x37   : > { %v1338_v60 = vrot.slane %v1336_v41, 4  ;;  %v1339_v61 = vshll.u32 %v1295_v26, 16  ;;  %v1345_v62 = vshll.u32 %v3654_v33, 16  ;;  %v1350_v0 = vshrl.u32 %v1297_v43, 16 }
  0x38   : > { %3139 = vmatprep.mubr.bf16.mxu0 %v2725_v54  ;;  %v554_v1 = vsel %vm3600_vm8, %v549_v55, %v553_v31  ;;  %v563_v2 = vrot.slane %v562_v57, 4  ;;  %v1353_v5 = vshll.u32 %v1297_v43, 16  ;;  %v1359_v6 = vshll.u32 %v3659_v47, 16  ;;  %v3682_v31 = vld [vmem:[#allocation2 + $0x24] sm:$0x1]  ;;  %v3352_v43 = vld [vmem:[%s4104_s3 + $0x10] sm:$0xff]  }
  0x39   : > { %v941_v51 = vrot.slane %v3618_v37, 5  ;;  %v1341_v53 = vrot.slane %v1339_v61, 5  ;;  %v1352_v7 = vrot.slane %v1350_v0, 4  ;;  %v266_v8 = vmul.f32 %v2891_v58, %v3520_v13  ;;  %v457_v54 = vld [vmem:[#allocation2 + $0x2c] sm:$0x1] }
  0x3a   : > { %v1599_v10 = vrot.slane %v3627_v46, 5  ;;  %v568_v11 = vsel %vm3600_vm8, %v563_v2, %v567_v59  ;;  %v1355_v12 = vrot.slane %v1353_v5, 5  ;;  %v267_v14 = vmul.f32 %v2892_v4, %v3520_v13  ;;  %v463_v0 = vld [vmem:[#allocation2 + $0x34] sm:$0x1] }
  0x3b   : > { %v2622_v15 = vcombine.low %v554_v1, %v568_v11  ;;  %v1342_v16 = vor.u32 %v1341_v53, %v1338_v60  ;;  %v1347_v20 = vrot.slane %v1345_v62, 5  ;;  %v287_v22 = vmax.f32 %v279_v49, 0.0  ;;  %v3351_v60 = vld [vmem:[%s4104_s3 + $0x148] sm:$0xff]   ;;  %v460_v62 = vld [vmem:[#allocation2 + $0x30] sm:$0xf]  ;;  %v3354_v11 = vld [vmem:[%s4104_s3 + $0x18] sm:$0xff]  }
  0x3c   : > { %v1603_v58 = vrot.slane %v3629_v48, 5  ;;  %v1356_v24 = vor.u32 %v1355_v12, %v1352_v7  ;;  %v1361_v25 = vrot.slane %v1359_v6, 5  ;;  %v288_v26 = vmax.f32 %v280_v50, 0.0  ;;  %v454_v50 = vld [vmem:[#allocation2 + $0x28] sm:$0xf] }
  0x3d   : > { %3044 = vmatmul.mubr.bf16.vlgmr.msra.gmra.mrb[0].mxu1 %v2622_v15  ;;  %v945_v28 = vrot.slane %v3638_v3, 5  ;;  %v1343_v29 = vrot.slane %v1342_v16, 4  ;;  %v2873_v13 = vpack.c.bf16 %v287_v22, %v287_v22  ;;  %v281_v4 = vadd.f32 %v3528_v17, %v266_v8  ;;  %v3353_v8 = vld [vmem:[%s4104_s3 + $0x150] sm:$0xff]  }
  0x3e   : > { %3052 = vmatpush3.bf16.msra.mxu1 %v3560_v40  ;;  %v1357_v30 = vrot.slane %v1356_v24, 4  ;;  %v570_v34 = vshrl.u32 %v3676_v23, 16  ;;  %v573_v35 = vshll.u32 %v3676_v23, 16  ;;  %v2874_v38 = vpack.c.bf16 %v288_v26, %v288_v26 }
  0x3f   : > { %v1348_v42 = vsel %vm3600_vm8, %v1343_v29, %v1347_v20  ;;  %3053 = vmatprep.subr.bf16.mxu1 %v3350_v21  ;;  %v376_v45 = vshrl.u32 %v2873_v13, 16  ;;  %v379_v41 = vshll.u32 %v2873_v13, 16  ;;  %v289_v49 = vmax.f32 %v281_v4, 0.0 }
  0x40   : > { %v1362_v40 = vsel %vm3600_vm8, %v1357_v30, %v1361_v25  ;;  %v384_v55 = vshrl.u32 %v2874_v38, 16  ;;  %v387_v57 = vshll.u32 %v2874_v38, 16  ;;  %v282_v2 = vadd.f32 %v3528_v17, %v267_v14  ;;  %v3356_v25 = vld [vmem:[%s4104_s3 + $0x20] sm:$0xff]  }
  0x41   : > { %v2726_v59 = vcombine.low %v1348_v42, %v1362_v40  ;;  %v378_v61 = vrot.slane %v376_v45, 7  ;;  %v2875_v1 = vpack.c.bf16 %v289_v49, %v289_v49  ;;  %v572_v5 = vrot.slane %v570_v34, 4  ;;  %v469_v34 = vld [vmem:[#allocation2 + $0x3c] sm:$0x1] }
  0x42   : > { %3054 = vmatpush3.bf16.msra.mxu1 %v3350_v21  ;;  %v575_v6 = vrot.slane %v573_v35, 5  ;;  %v579_v53 = vshll.u32 %v3682_v31, 16  ;;  %v386_v7 = vrot.slane %v384_v55, 7  ;;  %v466_v21 = vld [vmem:[#allocation2 + $0x38] sm:$0xf]  ;;  %v290_v22 = vmax.f32 %v282_v2, 0.0 }
  0x43   : > { %3140 = vmatmul.mubr.bf16.vlgmr.msra.gmra.mrb[0].mxu0 %v2726_v59  ;;  %3055 = vmatprep.subr.bf16.mxu1 %v3352_v43  ;;  %v381_v12 = vor.u32 %v379_v41, %v378_v61  ;;  %v382_v15 = vrot.slane %v378_v61, 4  ;;  %v392_v16 = vshrl.u32 %v2875_v1, 16  ;;  %v395_v17 = vshll.u32 %v2875_v1, 16  ;;  %v3355_v42 = vld [vmem:[%s4104_s3 + $0x158] sm:$0xff]   ;;  %v3721_v41 = vld [vmem:[#allocation2 + $0x8] sm:$0xe] }
  0x44   : > { %3148 = vmatpush3.bf16.msra.mxu0 %v3565_v44  ;;  %v389_v14 = vor.u32 %v387_v57, %v386_v7  ;;  %v390_v20 = vrot.slane %v386_v7, 4  ;;  %v949_v24 = vrot.slane %v3645_v19, 5  ;;  %v576_v44 = vor.u32 %v575_v6, %v572_v5  ;;  %v3358_v55 = vld [vmem:[%s4104_s3 + $0x28] sm:$0xff]   ;;  %v3357_v1 = vld [vmem:[%s4104_s3 + $0x160] sm:$0xff]  }
  0x45   : > { %3149 = vmatprep.subr.bf16.mxu0 %v3351_v60  ;;  %v455_v26 = vsel %vm3571_vm6, %v381_v12, %v454_v50  ;;  %v458_v29 = vsel %vm3577_vm7, %v382_v15, %v457_v54  ;;  %v394_v13 = vrot.slane %v392_v16, 7  ;;  %v2876_v35 = vpack.c.bf16 %v290_v22, %v290_v22 }
  0x46   : > { %3056 = vmatpush3.bf16.msra.mxu1 %v3352_v43  ;;  %456 = vst [vmem:[#allocation2 + $0x28] sm:$0xf] %v455_v26  ;;  %459 = vst [vmem:[#allocation2 + $0x2c] sm:$0x1] %v458_v29  ;;  %v461_v4 = vsel %vm3571_vm6, %v389_v14, %v460_v62  ;;  %v464_v30 = vsel %vm3577_vm7, %v390_v20, %v463_v0  ;;  %v1607_v38 = vrot.slane %v3654_v33, 5  ;;  %v1611_v49 = vrot.slane %v3659_v47, 5 }
  0x47   : > { %3057 = vmatprep.subr.bf16.mxu1 %v3354_v11  ;;  %462 = vst [vmem:[#allocation2 + $0x30] sm:$0xf] %v461_v4  ;;  %465 = vst [vmem:[#allocation2 + $0x34] sm:$0x1] %v464_v30  ;;  %v397_v43 = vor.u32 %v395_v17, %v394_v13  ;;  %v398_v45 = vrot.slane %v394_v13, 4  ;;  %v3724_v40 = vrot.slane %v579_v53, 5 }
  0x48   : > { %3150 = vmatpush3.bf16.msra.mxu0 %v3351_v60  ;;  %v400_v50 = vshrl.u32 %v2876_v35, 16  ;;  %v403_v54 = vshll.u32 %v2876_v35, 16  ;;  %v3733_v61 = vrot.slane %v576_v44, 4  ;;  %v472_v62 = vld [vmem:[#allocation2 + $0x40] sm:$0xf]  ;;  %v2737_v6 = vrot.slane %v3721_v41, 9 }
  0x49   : > { %3151 = vmatprep.subr.bf16.mxu0 %v3353_v8  ;;  %v467_v57 = vsel %vm3571_vm6, %v397_v43, %v466_v21  ;;  %v470_v59 = vsel %vm3577_vm7, %v398_v45, %v469_v34  ;;  %v475_v0 = vld [vmem:[#allocation2 + $0x44] sm:$0x1]  ;;  %v3359_v35 = vld [vmem:[%s4104_s3 + $0x168] sm:$0xff]   ;;  %v910_v41 = vld [vmem:[#allocation2 + $0x10] sm:$0xe] }
  0x4a   : > { %3058 = vmatpush3.bf16.msra.mxu1 %v3354_v11  ;;  %468 = vst [vmem:[#allocation2 + $0x38] sm:$0xf] %v467_v57  ;;  %471 = vst [vmem:[#allocation2 + $0x3c] sm:$0x1] %v470_v59  ;;  %v402_v60 = vrot.slane %v400_v50, 7  ;;  %v3360_v11 = vld [vmem:[%s4104_s3 + $0x30] sm:$0xff]   ;;  %v582_v56 = vsel %vm3600_vm8, %v3733_v61, %v3724_v40 }
  0x4b   : > { %3059 = vmatprep.subr.bf16.mxu1 %v3356_v25  ;;  %v3362_v40 = vld [vmem:[%s4104_s3 + $0x38] sm:$0xff]   ;;  %v3370_v33 = vld [vmem:[%s4104_s3 + $0x90] sm:$0xff]  }
  0x4c   : > { %3152 = vmatpush3.bf16.msra.mxu0 %v3353_v8  ;;  %v405_v2 = vor.u32 %v403_v54, %v402_v60  ;;  %v406_v5 = vrot.slane %v402_v60, 4 }
  0x4d   : > { %3153 = vmatprep.subr.bf16.mxu0 %v3355_v42  ;;  %v3739_v53 = vld [vmem:[#allocation2 + $0x28] sm:$0xf]  ;;  %v3741_v7 = vld [vmem:[#allocation2 + $0x2c] sm:$0x1] }
  0x4e   : > { %v1299_v12 = vld [vmem:[#allocation2 + $0x28] sm:$0xf]  ;;  %3060 = vmatpush3.bf16.msra.mxu1 %v3356_v25  ;;  %v584_v15 = vshrl.u32 %v3739_v53, 16  ;;  %v587_v16 = vshll.u32 %v3739_v53, 16  ;;  %v593_v8 = vshll.u32 %v3741_v7, 16  ;;  %v473_v29 = vsel %vm3571_vm6, %v405_v2, %v472_v62 }
  0x4f   : > { %v3749_v17 = vld [vmem:[#allocation2 + $0x2c] sm:$0x1]  ;;  %v1364_v14 = vshrl.u32 %v1299_v12, 16  ;;  %3061 = vmatprep.subr.bf16.mxu1 %v3358_v55  ;;  %v1301_v20 = vld [vmem:[#allocation2 + $0x30] sm:$0xf]  ;;  %v1367_v22 = vshll.u32 %v1299_v12, 16  ;;  %v476_v25 = vsel %vm3577_vm7, %v406_v5, %v475_v0 }
  0x50   : > { %v3751_v21 = vld [vmem:[#allocation2 + $0x34] sm:$0x1]  ;;  %v1373_v26 = vshll.u32 %v3749_v17, 16  ;;  %3154 = vmatpush3.bf16.msra.mxu0 %v3355_v42  ;;  %v586_v13 = vrot.slane %v584_v15, 4  ;;  %v589_v44 = vrot.slane %v587_v16, 5  ;;  %v595_v4 = vrot.slane %v593_v8, 5 }
  0x51   : > { %v1366_v30 = vrot.slane %v1364_v14, 4  ;;  %v3758_v34 = vld [vmem:[#allocation2 + $0x30] sm:$0xf]  ;;  %474 = vst [vmem:[#allocation2 + $0x40] sm:$0xf] %v473_v29  ;;  %3155 = vmatprep.subr.bf16.mxu0 %v3357_v1  ;;  %v1369_v43 = vrot.slane %v1367_v22, 5 }
  0x52   : > { %477 = vst [vmem:[#allocation2 + $0x44] sm:$0x1] %v476_v25  ;;  %v1375_v52 = vrot.slane %v1373_v26, 5  ;;  %v1378_v45 = vshrl.u32 %v1301_v20, 16  ;;  %v1381_v50 = vshll.u32 %v1301_v20, 16  ;;  %3062 = vmatpush3.bf16.msra.mxu1 %v3358_v55  ;;  %v590_v42 = vor.u32 %v589_v44, %v586_v13  ;;  %v3361_v20 = vld [vmem:[%s4104_s3 + $0x170] sm:$0xff]  }
  0x53   : > { %v1387_v54 = vshll.u32 %v3751_v21, 16  ;;  %v3768_v57 = vld [vmem:[#allocation2 + $0x38] sm:$0xf]  ;;  %v3770_v59 = vld [vmem:[#allocation2 + $0x34] sm:$0x1]  ;;  %v598_v60 = vshrl.u32 %v3758_v34, 16  ;;  %3063 = vmatprep.subr.bf16.mxu1 %v3360_v11  ;;  %v1370_v62 = vor.u32 %v1369_v43, %v1366_v30 }
  0x54   : > { %v1380_v0 = vrot.slane %v1378_v45, 4  ;;  %v1383_v55 = vrot.slane %v1381_v50, 5  ;;  %v3773_v2 = vld [vmem:[#allocation2 + $0x3c] sm:$0x1]  ;;  %v601_v5 = vshll.u32 %v3758_v34, 16  ;;  %3156 = vmatpush3.bf16.msra.mxu0 %v3357_v1  ;;  %v591_v61 = vrot.slane %v590_v42, 4 }
  0x55   : > { %v1389_v12 = vrot.slane %v1387_v54, 5  ;;  %v600_v15 = vrot.slane %v598_v60, 4  ;;  %v607_v16 = vshll.u32 %v3770_v59, 16  ;;  %3157 = vmatprep.subr.bf16.mxu0 %v3359_v35  ;;  %v1371_v8 = vrot.slane %v1370_v62, 4  ;;  %v1303_v29 = vld [vmem:[#allocation2 + $0x38] sm:$0xf] }
  0x56   : > { %v1384_v14 = vor.u32 %v1383_v55, %v1380_v0  ;;  %v603_v22 = vrot.slane %v601_v5, 5  ;;  %v612_v26 = vshrl.u32 %v3768_v57, 16  ;;  %v596_v25 = vsel %vm3600_vm8, %v591_v61, %v595_v4  ;;  %3064 = vmatpush3.bf16.msra.mxu1 %v3360_v11  ;;  %v3788_v30 = vld [vmem:[#allocation2 + $0x3c] sm:$0x1]  ;;  %v3795_v4 = vld [vmem:[%s4104_s3 + $0x80] sm:$0xff]  }
  0x57   : > { %v609_v1 = vrot.slane %v607_v16, 5  ;;  %v615_v13 = vshll.u32 %v3768_v57, 16  ;;  %v621_v44 = vshll.u32 %v3773_v2, 16  ;;  %v2623_v43 = vcombine.low %v582_v56, %v596_v25  ;;  %3065 = vmatprep.subr.bf16.mxu1 %v3362_v40  ;;  %v1574_v60 = vld [vmem:[#allocation2 + $0x10] sm:$0xe] }
  0x58   : > { %v1376_v45 = vsel %vm3600_vm8, %v1371_v8, %v1375_v52  ;;  %v1385_v50 = vrot.slane %v1384_v14, 4  ;;  %v604_v42 = vor.u32 %v603_v22, %v600_v15  ;;  %v1305_v54 = vld [vmem:[#allocation2 + $0x40] sm:$0xf]  ;;  %3158 = vmatpush3.bf16.msra.mxu0 %v3359_v35  ;;  %v614_v62 = vrot.slane %v612_v26, 4  ;;  %v3797_v5 = vld [vmem:[#allocation2 + $0x18] sm:$0xe] }
  0x59   : > { %v617_v0 = vrot.slane %v615_v13, 5  ;;  %v623_v11 = vrot.slane %v621_v44, 5  ;;  %v1392_v55 = vshrl.u32 %v1303_v29, 16  ;;  %3047 = vmatprep.mubr.bf16.mxu1 %v2623_v43  ;;  %3159 = vmatprep.subr.bf16.mxu0 %v3361_v20  ;;  %v3801_v61 = vld [vmem:[#allocation2 + $0x44] sm:$0x1]  ;;  %v1395_v15 = vshll.u32 %v1303_v29, 16 }
  0x5a   : > { %v1390_v52 = vsel %vm3600_vm8, %v1385_v50, %v1389_v12  ;;  %v605_v56 = vrot.slane %v604_v42, 4  ;;  %v1401_v16 = vshll.u32 %v3788_v30, 16  ;;  %v3363_v35 = vld [vmem:[%s4104_s3 + $0x178] sm:$0xff]   ;;  %v1406_v26 = vshrl.u32 %v1305_v54, 16  ;;  %3066 = vmatpush3.bf16.msra.mxu1 %v3362_v40  ;;  %v1576_v44 = vld [vmem:[#allocation2 + $0x20] sm:$0xe] }
  0x5b   : > { %v2727_v8 = vcombine.low %v1376_v45, %v1390_v52  ;;  %v618_v14 = vor.u32 %v617_v0, %v614_v62  ;;  %v1394_v22 = vrot.slane %v1392_v55, 4  ;;  %v1397_v25 = vrot.slane %v1395_v15, 5  ;;  %3075 = vmatprep.subr.bf16.mxu1 %v3795_v4  ;;  %v3815_v40 = vld [vmem:[%s4104_s3 + $0x180] sm:$0xff]   ;;  %v3827_v52 = vld [vmem:[#allocation2 + $0x38] sm:$0xe] }
  0x5c   : > { %v1409_v13 = vshll.u32 %v1305_v54, 16  ;;  %v2738_v12 = vrot.slane %v1574_v60, 9  ;;  %v2739_v43 = vrot.slane %v3797_v5, 9  ;;  %v610_v29 = vsel %vm3600_vm8, %v605_v56, %v609_v1  ;;  %3160 = vmatpush3.bf16.msra.mxu0 %v3361_v20  ;;  %v1577_v54 = vld [vmem:[#allocation2 + $0x28] sm:$0xe] }
  0x5d   : > { %3143 = vmatprep.mubr.bf16.mxu0 %v2727_v8  ;;  %v619_v50 = vrot.slane %v618_v14, 4  ;;  %v1408_v42 = vrot.slane %v1406_v26, 4  ;;  %v1415_v45 = vshll.u32 %v3801_v61, 16  ;;  %v1398_v62 = vor.u32 %v1397_v25, %v1394_v22  ;;  %3161 = vmatprep.subr.bf16.mxu0 %v3363_v35  ;;  %v1578_v1 = vld [vmem:[#allocation2 + $0x30] sm:$0xe] }
  0x5e   : > { %v1403_v60 = vrot.slane %v1401_v16, 5  ;;  %v1411_v0 = vrot.slane %v1409_v13, 5  ;;  %v2633_v5 = vcombine.low %v3530_v18, %v3616_v36  ;;  %v908_v14 = vld [vmem:[#allocation2] sm:$0xe]  ;;  %v1600_v22 = vsel %vm3819_vm11, %v2737_v6, %v1599_v10  ;;  %v909_v26 = vld [vmem:[#allocation2 + $0x8] sm:$0xe] }
  0x5f   : > { %v624_v20 = vsel %vm3600_vm8, %v619_v50, %v623_v11  ;;  %v1399_v15 = vrot.slane %v1398_v62, 4  ;;  %v1417_v8 = vrot.slane %v1415_v45, 5  ;;  %v1604_v18 = vsel %vm3819_vm11, %v2738_v12, %v1603_v58  ;;  %v911_v58 = vld [vmem:[#allocation2 + $0x18] sm:$0xe] }
  0x60   : > { %v2624_v56 = vcombine.low %v610_v29, %v624_v20  ;;  %v1412_v16 = vor.u32 %v1411_v0, %v1408_v42  ;;  %3162 = vmatpush3.bf16.msra.mxu0 %v3363_v35  ;;  %v2740_v36 = vrot.slane %v1576_v44, 9  ;;  %v2741_v11 = vrot.slane %v1577_v54, 9  ;;  %v3376_v20 = vld [vmem:[%s4104_s3 + $0xa8] sm:$0xff]  }
  0x61   : > { %v1404_v25 = vsel %vm3600_vm8, %v1399_v15, %v1403_v60  ;;  %3171 = vmatprep.subr.bf16.mxu0 %v3815_v40  ;;  %v1615_v46 = vrot.slane %v3749_v17, 5  ;;  %v2742_v10 = vrot.slane %v1578_v1, 9  ;;  %v1619_v48 = vrot.slane %v3751_v21, 5  ;;  %v3368_v21 = vld [vmem:[%s4104_s3 + $0x88] sm:$0xff]   ;;  %v3385_v1 = vld [vmem:[#allocation2 + $0x10] ss:$8 sps:$4 sm:$0xff]  }
  0x62   : > { %3048 = vmatmul.mubr.bf16.gmra.mrb[4].mxu1 %v2624_v56  ;;  %v1413_v35 = vrot.slane %v1412_v16, 4  ;;  %v2743_v6 = vrot.slane %v3827_v52, 9  ;;  %v2647_v13 = vrot.slane %v910_v41, 9  ;;  %v2761_v44 = vcombine.low %v1600_v22, %v1604_v18  ;;  %v3377_v52 = vld [vmem:[%s4104_s3 + $0x1a8] sm:$0xff]   ;;  %v3379_v56 = vld [vmem:[%s4104_s3 + $0xb0] sm:$0xff]   ;;  %v3382_v22 = vld [vmem:[%s4104_s3 + $0xb8] sm:$0xff]  }
  0x63   : > { %3067 = vmatprep.mubr.bf16.mxu1 %v2633_v5  ;;  %v1623_v29 = vrot.slane %v3788_v30, 5  ;;  %v2648_v50 = vrot.slane %v911_v58, 9  ;;  %v2645_v45 = vrot.slane %v908_v14, 9  ;;  %v2646_v54 = vrot.slane %v909_v26, 9  ;;  %v3375_v5 = vld [vmem:[%s4104_s3 + $0x1a0] sm:$0xff]  }
  0x64   : > { %v1418_v12 = vsel %vm3600_vm8, %v1413_v35, %v1417_v8  ;;  %v2634_v17 = vcombine.low %v3635_v63, %v3641_v9  ;;  %v3857_v62 = vsel %vm3819_vm11, %v2647_v13, %v945_v28  ;;  %v2635_v63 = vcombine.low %v3676_v23, %v3739_v53  ;;  %v1580_v9 = vld [vmem:[#allocation2 + $0x40] sm:$0xe]  ;;  %v913_v16 = vld [vmem:[#allocation2 + $0x28] sm:$0xe]  ;;  %v1954_v8 = vld [vmem:[#allocation2 + $0x10] sm:$0xf] }
  0x65   : > { %v2728_v42 = vcombine.low %v1404_v25, %v1418_v12  ;;  %v3863_v30 = vsel %vm3819_vm11, %v2648_v50, %v949_v24  ;;  %v1608_v3 = vsel %vm3819_vm11, %v2739_v43, %v1607_v38  ;;  %v1612_v19 = vsel %vm3819_vm11, %v2740_v36, %v1611_v49  ;;  %v912_v15 = vld [vmem:[#allocation2 + $0x20] sm:$0xe]  ;;  %v1956_v14 = vld [vmem:[#allocation2 + $0x18] sm:$0xf]  ;;  %v3380_v25 = vld [vmem:[%s4104_s3 + $0x1b0] sm:$0xff]  }
  0x66   : > { %v2670_v60 = vcombine.low %v3857_v62, %v3863_v30  ;;  %v1616_v28 = vsel %vm3819_vm11, %v2741_v11, %v1615_v46  ;;  %v1620_v23 = vsel %vm3819_vm11, %v2742_v10, %v1619_v48  ;;  %v2762_v24 = vcombine.low %v1608_v3, %v1612_v19  ;;  %v914_v35 = vld [vmem:[#allocation2 + $0x30] sm:$0xe]  ;;  %v915_v46 = vld [vmem:[#allocation2 + $0x38] sm:$0xe]  ;;  %v3388_v3 = vld [vmem:[%s4104_s3 + $0xc8] sm:$0xff]  }
  0x67   : > { %3144 = vmatmul.mubr.bf16.gmra.mrb[4].mxu0 %v2728_v42  ;;  %v2744_v47 = vrot.slane %v1580_v9, 9  ;;  %v1627_v38 = vrot.slane %v3801_v61, 5  ;;  %v938_v49 = vsel %vm3819_vm11, %v2645_v45, %v937_v32  ;;  %v942_v53 = vsel %vm3819_vm11, %v2646_v54, %v941_v51  ;;  %v3371_v51 = vld [vmem:[%s4104_s3 + $0x190] sm:$0xff]   ;;  %v3383_v13 = vld [vmem:[%s4104_s3 + $0x1b8] sm:$0xff]  }
  0x68   : > { %3163 = vmatprep.mubr.bf16.mxu0 %v2761_v44  ;;  %v2763_v43 = vcombine.low %v1616_v28, %v1620_v23  ;;  %v2636_v0 = vcombine.low %v3758_v34, %v3768_v57  ;;  %v2669_v61 = vcombine.low %v938_v49, %v942_v53  ;;  %v1624_v32 = vsel %vm3819_vm11, %v2743_v6, %v1623_v29  ;;  %v3374_v57 = vld [vmem:[%s4104_s3 + $0xa0] sm:$0xff]   ;;  %v3950_v9 = vld [vmem:[#allocation2 + $0x1c] sm:$0x1]  ;;  %v3390_v49 = vld [vmem:[%s4104_s3 + $0xd0] sm:$0xff]  }
  0x69   : > { %v1628_v37 = vsel %vm3819_vm11, %v2744_v47, %v1627_v38  ;;  %v2649_v18 = vrot.slane %v912_v15, 9  ;;  %v953_v36 = vrot.slane %v3682_v31, 5  ;;  %v2650_v11 = vrot.slane %v913_v16, 9  ;;  %v3384_v31 = vld [vmem:[%s4104_s3 + $0xc0] sm:$0xff]   ;;  %v3389_v38 = vld [vmem:[%s4104_s3 + $0x1c8] sm:$0xff]  }
  0x6a   : > { %3068 = vmatmul.mubr.bf16.vlgmr.msra.gmra.mrb[0].mxu1 %v2634_v17  ;;  %v2764_v34 = vcombine.low %v1624_v32, %v1628_v37  ;;  %v957_v26 = vrot.slane %v3741_v7, 5  ;;  %v1971_v41 = vshrl.u32 %v1954_v8, 16  ;;  %v1974_v10 = vshll.u32 %v1954_v8, 16  ;;  %v3398_v62 = vld [vmem:[#allocation2 + $0x30] ss:$8 sps:$4 sm:$0xff]  }
  0x6b   : > { %3076 = vmatpush3.bf16.msra.mxu1 %v3795_v4  ;;  %3071 = vmatprep.mubr.bf16.mxu1 %v2635_v63  ;;  %v3369_v4 = vld [vmem:[%s4104_s3 + $0x188] sm:$0xff]   ;;  %v1985_v48 = vshrl.u32 %v1956_v14, 16  ;;  %v1988_v6 = vshll.u32 %v1956_v14, 16  ;;  %v954_v7 = vsel %vm3819_vm11, %v2649_v18, %v953_v36  ;;  %v2651_v12 = vrot.slane %v914_v35, 9  ;;  %v3948_v63 = vld [vmem:[#allocation2 + $0x14] sm:$0x1] }
  0x6c   : > { %3077 = vmatprep.subr.bf16.mxu1 %v3368_v21  ;;  %v958_v58 = vsel %vm3819_vm11, %v2650_v11, %v957_v26  ;;  %v961_v44 = vrot.slane %v3770_v59, 5  ;;  %v2652_v29 = vrot.slane %v915_v46, 9  ;;  %v965_v50 = vrot.slane %v3773_v2, 5  ;;  %v3386_v59 = vld [vmem:[%s4104_s3 + $0x1c0] sm:$0xff]   ;;  %v3396_v26 = vld [vmem:[%s4104_s3 + $0xe8] sm:$0xff]  }
  0x6d   : > { %v1973_v42 = vrot.slane %v1971_v41, 4  ;;  %v1976_v45 = vrot.slane %v1974_v10, 5  ;;  %v1987_v54 = vrot.slane %v1985_v48, 4  ;;  %v1990_v17 = vrot.slane %v1988_v6, 5  ;;  %v3387_v2 = vld [vmem:[#allocation2 + $0x20] ss:$8 sps:$4 sm:$0xff]  }
  0x6e   : > { %v962_v19 = vsel %vm3819_vm11, %v2651_v12, %v961_v44  ;;  %v966_v28 = vsel %vm3819_vm11, %v2652_v29, %v965_v50  ;;  %v1994_v47 = vshll.u32 %v3950_v9, 16  ;;  %v1958_v32 = vld [vmem:[#allocation2 + $0x20] sm:$0xf]  ;;  %v3997_v48 = vld [vmem:[#allocation2 + $0x2c] sm:$0x1]  ;;  %v3399_v44 = vld [vmem:[%s4104_s3 + $0xf0] sm:$0xff]  }
  0x6f   : > { %3164 = vmatmul.mubr.bf16.vlgmr.msra.gmra.mrb[0].mxu0 %v2762_v24  ;;  %3078 = vmatpush3.bf16.msra.mxu1 %v3368_v21  ;;  %v2671_v21 = vcombine.low %v954_v7, %v958_v58  ;;  %v1977_v23 = vor.u32 %v1976_v45, %v1973_v42  ;;  %v1980_v24 = vshll.u32 %v3948_v63, 16  ;;  %v2672_v30 = vcombine.low %v962_v19, %v966_v28  ;;  %v3395_v11 = vld [vmem:[%s4104_s3 + $0x1e0] sm:$0xff]   ;;  %v4001_v12 = vld [vmem:[#allocation2 + $0x3c] sm:$0x1]  ;;  %v1968_v50 = vld [vmem:[#allocation2 + $0x48] sm:$0xf] }
  0x70   : > { %3172 = vmatpush3.bf16.msra.mxu0 %v3815_v40  ;;  %3079 = vmatprep.subr.bf16.mxu1 %v3370_v33  ;;  %v3373_v40 = vld [vmem:[%s4104_s3 + $0x198] sm:$0xff]   ;;  %v2002_v15 = vshll.u32 %v1958_v32, 16  ;;  %v1966_v29 = vld [vmem:[#allocation2 + $0x40] sm:$0xf]  ;;  %v3397_v42 = vld [vmem:[%s4104_s3 + $0x1e8] sm:$0xff]   ;;  %v2050_v19 = vshll.u32 %v4001_v12, 16 }
  0x71   : > { %3173 = vmatprep.subr.bf16.mxu0 %v3369_v4  ;;  %3167 = vmatprep.mubr.bf16.mxu0 %v2763_v43  ;;  %v1982_v53 = vrot.slane %v1980_v24, 5  ;;  %v1996_v43 = vrot.slane %v1994_v47, 5  ;;  %v2055_v28 = vshrl.u32 %v1966_v29, 16  ;;  %v2069_v24 = vshrl.u32 %v1968_v50, 16  ;;  %v3402_v47 = vld [vmem:[%s4104_s3 + $0xf8] sm:$0xff]  }
  0x72   : > { %3072 = vmatmul.mubr.bf16.gmra.mrb[4].mxu1 %v2636_v0  ;;  %v3404_v0 = vld [vmem:[#allocation2 + $0x8] ss:$8 sps:$4 sm:$0xff]   ;;  %v2004_v46 = vrot.slane %v2002_v15, 5 }
  0x73   : > { %3080 = vmatpush3.bf16.msra.mxu1 %v3370_v33  ;;  %3091 = vmatprep.mubr.bf16.mxu1 %v2669_v61  ;;  %v1991_v33 = vor.u32 %v1990_v17, %v1987_v54  ;;  %v3392_v61 = vld [vmem:[%s4104_s3 + $0xd8] sm:$0xff]  }
  0x74   : > { %3174 = vmatpush3.bf16.msra.mxu0 %v3369_v4  ;;  %3081 = vmatprep.subr.bf16.mxu1 %v3372_v39 }
  0x75   : > { %3175 = vmatprep.subr.bf16.mxu0 %v3371_v51  ;;  %v1992_v4 = vrot.slane %v1991_v33, 4  ;;  %v2072_v33 = vshll.u32 %v1968_v50, 16 }
  0x77   : > { %3082 = vmatpush3.bf16.msra.mxu1 %v3372_v39  ;;  %3168 = vmatmul.mubr.bf16.gmra.mrb[4].mxu0 %v2764_v34  ;;  %v3391_v39 = vld [vmem:[%s4104_s3 + $0x1d0] sm:$0xff]   ;;  %v1960_v34 = vld [vmem:[#allocation2 + $0x28] sm:$0xf] }
  0x78   : > { %3176 = vmatpush3.bf16.msra.mxu0 %v3371_v51  ;;  %3083 = vmatprep.subr.bf16.mxu1 %v3374_v57  ;;  %v1997_v51 = vsel %vm3600_vm8, %v1992_v4, %v1996_v43  ;;  %v2013_v16 = vshrl.u32 %v1960_v34, 16  ;;  %v2016_v8 = vshll.u32 %v1960_v34, 16  ;;  %v2074_v34 = vrot.slane %v2072_v33, 5  ;;  %v3413_v33 = vld [vmem:[%s4104_s3 + $0x228] sm:$0xff]  }
  0x79   : > { %3177 = vmatprep.subr.bf16.mxu0 %v3373_v40  ;;  %3187 = vmatprep.mubr.bf16.mxu0 %v3385_v1  ;;  %v1964_v1 = vld [vmem:[#allocation2 + $0x38] sm:$0xf] }
  0x7a   : > { %v2041_v18 = vshrl.u32 %v1964_v1, 16  ;;  %v2044_v36 = vshll.u32 %v1964_v1, 16  ;;  %v2015_v41 = vrot.slane %v2013_v16, 4  ;;  %v2018_v10 = vrot.slane %v2016_v8, 5  ;;  %v2240_v1 = vld [vmem:[#allocation2 + $0x30] sm:$0xe] }
  0x7b   : > { %3084 = vmatpush3.bf16.msra.mxu1 %v3374_v57  ;;  %v3400_v57 = vld [vmem:[#allocation2 + $0x40] ss:$8 sps:$4 sm:$0xff]  }
  0x7c   : > { %3178 = vmatpush3.bf16.msra.mxu0 %v3373_v40  ;;  %3085 = vmatprep.subr.bf16.mxu1 %v3376_v20  ;;  %v1962_v40 = vld [vmem:[#allocation2 + $0x30] sm:$0xf]  ;;  %v2043_v7 = vrot.slane %v2041_v18, 4  ;;  %v2046_v58 = vrot.slane %v2044_v36, 5  ;;  %v2019_v17 = vor.u32 %v2018_v10, %v2015_v41  ;;  %v2282_v41 = vrot.slane %v4001_v12, 5 }
  0x7d   : > { %3179 = vmatprep.subr.bf16.mxu0 %v3375_v5  ;;  %v2027_v14 = vshrl.u32 %v1962_v40, 16  ;;  %v3408_v8 = vld [vmem:[#allocation2 + $0x28] ss:$8 sps:$4 sm:$0xff]  }
  0x7f   : > { %3086 = vmatpush3.bf16.msra.mxu1 %v3376_v20  ;;  %v3394_v20 = vld [vmem:[%s4104_s3 + $0xe0] sm:$0xff]   ;;  %v2029_v6 = vrot.slane %v2027_v14, 4 }
  0x80   : > { %3180 = vmatpush3.bf16.msra.mxu0 %v3375_v5  ;;  %3087 = vmatprep.subr.bf16.mxu1 %v3379_v56  ;;  %v1999_v5 = vshrl.u32 %v1958_v32, 16  ;;  %v2057_v32 = vrot.slane %v2055_v28, 4  ;;  %v3411_v28 = vld [vmem:[%s4104_s3 + $0x218] sm:$0xff]  }
  0x81   : > { %3181 = vmatprep.subr.bf16.mxu0 %v3377_v52 }
  0x82   : > { %v2001_v35 = vrot.slane %v1999_v5, 4  ;;  %v3405_v5 = vld [vmem:[#allocation2 + $0x18] ss:$8 sps:$4 sm:$0xff]  }
  0x83   : > { %3088 = vmatpush3.bf16.msra.mxu1 %v3379_v56 }
  0x84   : > { %3182 = vmatpush3.bf16.msra.mxu0 %v3377_v52  ;;  %3089 = vmatprep.subr.bf16.mxu1 %v3382_v22  ;;  %v3393_v52 = vld [vmem:[%s4104_s3 + $0x1d8] sm:$0xff]   ;;  %v2005_v45 = vor.u32 %v2004_v46, %v2001_v35 }
  0x85   : > { %3183 = vmatprep.subr.bf16.mxu0 %v3380_v25 }
  0x87   : > { %3090 = vmatpush3.bf16.msra.mxu1 %v3382_v22  ;;  %v2030_v22 = vshll.u32 %v1962_v40, 16  ;;  %v3403_v40 = vld [vmem:[%s4104_s3 + $0x1f8] sm:$0xff]  }
  0x88   : > { %3184 = vmatpush3.bf16.msra.mxu0 %v3380_v25  ;;  %3099 = vmatprep.subr.bf16.mxu1 %v3384_v31  ;;  %v3995_v25 = vld [vmem:[#allocation2 + $0x24] sm:$0x1] }
  0x89   : > { %3185 = vmatprep.subr.bf16.mxu0 %v3383_v13  ;;  %v2008_v54 = vshll.u32 %v3995_v25, 16 }
  0x8a   : > { %3092 = vmatmul.mubr.bf16.vlgmr.msra.gmra.mrb[0].mxu1 %v2670_v60  ;;  %v1978_v60 = vrot.slane %v1977_v23, 4  ;;  %v2058_v23 = vshll.u32 %v1966_v29, 16 }
  0x8b   : > { %3100 = vmatpush3.bf16.msra.mxu1 %v3384_v31  ;;  %3095 = vmatprep.mubr.bf16.mxu1 %v2671_v21  ;;  %v2032_v31 = vrot.slane %v2030_v22, 5  ;;  %v2022_v21 = vshll.u32 %v3997_v48, 16 }
  0x8c   : > { %3186 = vmatpush3.bf16.msra.mxu0 %v3383_v13  ;;  %3101 = vmatprep.subr.bf16.mxu1 %v3388_v3  ;;  %v1983_v37 = vsel %vm3600_vm8, %v1978_v60, %v1982_v53  ;;  %v3999_v13 = vld [vmem:[#allocation2 + $0x34] sm:$0x1] }
  0x8d   : > { %3195 = vmatprep.subr.bf16.mxu0 %v3386_v59  ;;  %v2817_v56 = vcombine.low %v1983_v37, %v1997_v51  ;;  %v2024_v60 = vrot.slane %v2022_v21, 5  ;;  %v2060_v37 = vrot.slane %v2058_v23, 5  ;;  %v2071_v51 = vrot.slane %v2069_v24, 4 }
  0x8e   : > { %v2278_v35 = vrot.slane %v3999_v13, 5 }
  0x8f   : > { %3188 = vmatmul.mubr.bf16.vlgmr.msra.gmra.mrb[0].mxu0 %v3387_v2  ;;  %3102 = vmatpush3.bf16.msra.mxu1 %v3388_v3  ;;  %v2033_v3 = vor.u32 %v2032_v31, %v2029_v6  ;;  %v2047_v2 = vor.u32 %v2046_v58, %v2043_v7  ;;  %v2061_v18 = vor.u32 %v2060_v37, %v2057_v32  ;;  %v2236_v58 = vld [vmem:[#allocation2 + $0x10] sm:$0xe]  ;;  %v2270_v37 = vrot.slane %v3995_v25, 5 }
  0x90   : > { %3196 = vmatpush3.bf16.msra.mxu0 %v3386_v59  ;;  %3103 = vmatprep.subr.bf16.mxu1 %v3390_v49  ;;  %v2036_v59 = vshll.u32 %v3999_v13, 16  ;;  %v2075_v36 = vor.u32 %v2074_v34, %v2071_v51  ;;  %v2274_v34 = vrot.slane %v3997_v48, 5 }
  0x91   : > { %3197 = vmatprep.subr.bf16.mxu0 %v3389_v38  ;;  %3191 = vmatprep.mubr.bf16.mxu0 %v3398_v62  ;;  %v2010_v62 = vrot.slane %v2008_v54, 5  ;;  %v2034_v53 = vrot.slane %v2033_v3, 4  ;;  %v2048_v43 = vrot.slane %v2047_v2, 4  ;;  %v2062_v29 = vrot.slane %v2061_v18, 4 }
  0x92   : > { %3096 = vmatmul.mubr.bf16.gmra.mrb[4].mxu1 %v2672_v30  ;;  %v2020_v30 = vrot.slane %v2019_v17, 4  ;;  %v2038_v4 = vrot.slane %v2036_v59, 5  ;;  %v2076_v50 = vrot.slane %v2075_v36, 4  ;;  %v2829_v54 = vrot.slane %v2236_v58, 9 }
  0x93   : > { %3104 = vmatpush3.bf16.msra.mxu1 %v3390_v49  ;;  %3115 = vmatprep.mubr.bf16.mxu1 %v3404_v0  ;;  %v2006_v49 = vrot.slane %v2005_v45, 4  ;;  %v2052_v0 = vrot.slane %v2050_v19, 5  ;;  %v3409_v45 = vld [vmem:[#allocation2 + $0x38] ss:$8 sps:$4 sm:$0xff]   ;;  %v2262_v17 = vrot.slane %v3948_v63, 5  ;;  %v2266_v3 = vrot.slane %v3950_v9, 5 }
  0x94   : > { %3198 = vmatpush3.bf16.msra.mxu0 %v3389_v38  ;;  %3105 = vmatprep.subr.bf16.mxu1 %v3392_v61  ;;  %v3401_v38 = vld [vmem:[%s4104_s3 + $0x1f0] sm:$0xff]   ;;  %v2039_v14 = vsel %vm3600_vm8, %v2034_v53, %v2038_v4  ;;  %v3415_v4 = vld [vmem:[%s4104_s3 + $0x238] sm:$0xff]  }
  0x95   : > { %3199 = vmatprep.subr.bf16.mxu0 %v3391_v39  ;;  %v2053_v22 = vsel %vm3600_vm8, %v2048_v43, %v2052_v0  ;;  %v2263_v63 = vsel %vm3819_vm11, %v2829_v54, %v2262_v17  ;;  %v2238_v43 = vld [vmem:[#allocation2 + $0x20] sm:$0xe]  ;;  %v2239_v0 = vld [vmem:[#allocation2 + $0x28] sm:$0xe] }
  0x96   : > { %v2819_v6 = vcombine.low %v2039_v14, %v2053_v22  ;;  %v2832_v51 = vrot.slane %v2239_v0, 9 }
  0x97   : > { %3106 = vmatpush3.bf16.msra.mxu1 %v3392_v61  ;;  %3192 = vmatmul.mubr.bf16.gmra.mrb[4].mxu0 %v3400_v57  ;;  %v4019_v61 = vld [vmem:[#allocation2 + $0x44] sm:$0x1] }
  0x98   : > { %3200 = vmatpush3.bf16.msra.mxu0 %v3391_v39  ;;  %3107 = vmatprep.subr.bf16.mxu1 %v3394_v20  ;;  %v4021_v39 = vld [vmem:[#allocation2 + $0x4c] sm:$0x1]  ;;  %v3406_v57 = vld [vmem:[%s4104_s3 + $0x200] sm:$0xff]   ;;  %v2064_v15 = vshll.u32 %v4019_v61, 16 }
  0x99   : > { %3201 = vmatprep.subr.bf16.mxu0 %v3393_v52  ;;  %3211 = vmatprep.mubr.bf16.mxu0 %v2817_v56  ;;  %v2025_v56 = vsel %vm3600_vm8, %v2020_v30, %v2024_v60  ;;  %v2078_v16 = vshll.u32 %v4021_v39, 16  ;;  %v2290_v30 = vrot.slane %v4021_v39, 5  ;;  %v2831_v39 = vrot.slane %v2238_v43, 9 }
  0x9a   : > { %v2066_v31 = vrot.slane %v2064_v15, 5 }
  0x9b   : > { %3108 = vmatpush3.bf16.msra.mxu1 %v3394_v20  ;;  %v2241_v20 = vld [vmem:[#allocation2 + $0x38] sm:$0xe]  ;;  %v2080_v7 = vrot.slane %v2078_v16, 5 }
  0x9c   : > { %3202 = vmatpush3.bf16.msra.mxu0 %v3393_v52  ;;  %3109 = vmatprep.subr.bf16.mxu1 %v3396_v26  ;;  %v2011_v52 = vsel %vm3600_vm8, %v2006_v49, %v2010_v62  ;;  %v2834_v46 = vrot.slane %v2241_v20, 9  ;;  %v2067_v2 = vsel %vm3600_vm8, %v2062_v29, %v2066_v31  ;;  %v2243_v49 = vld [vmem:[#allocation2 + $0x48] sm:$0xe]  ;;  %v2286_v62 = vrot.slane %v4019_v61, 5 }
  0x9d   : > { %3203 = vmatprep.subr.bf16.mxu0 %v3395_v11  ;;  %v2818_v10 = vcombine.low %v2011_v52, %v2025_v56  ;;  %v2081_v19 = vsel %vm3600_vm8, %v2076_v50, %v2080_v7  ;;  %v2836_v53 = vrot.slane %v2243_v49, 9 }
  0x9e   : > { %v2283_v12 = vsel %vm3819_vm11, %v2834_v46, %v2282_v41  ;;  %v2820_v23 = vcombine.low %v2067_v2, %v2081_v19 }
  0x9f   : > { %3110 = vmatpush3.bf16.msra.mxu1 %v3396_v26  ;;  %v2833_v26 = vrot.slane %v2240_v1, 9  ;;  %v2291_v61 = vsel %vm3819_vm11, %v2836_v53, %v2290_v30  ;;  %v2275_v1 = vsel %vm3819_vm11, %v2832_v51, %v2274_v34 }
  0xa0   : > { %3204 = vmatpush3.bf16.msra.mxu0 %v3395_v11  ;;  %3111 = vmatprep.subr.bf16.mxu1 %v3399_v44  ;;  %v3407_v11 = vld [vmem:[%s4104_s3 + $0x208] sm:$0xff]  }
  0xa1   : > { %3205 = vmatprep.subr.bf16.mxu0 %v3397_v42  ;;  %v2279_v13 = vsel %vm3819_vm11, %v2833_v26, %v2278_v35 }
  0xa2   : > { %v2855_v59 = vcombine.low %v2279_v13, %v2283_v12 }
  0xa3   : > { %3112 = vmatpush3.bf16.msra.mxu1 %v3399_v44  ;;  %v2237_v44 = vld [vmem:[#allocation2 + $0x18] sm:$0xe] }
  0xa4   : > { %3206 = vmatpush3.bf16.msra.mxu0 %v3397_v42  ;;  %3113 = vmatprep.subr.bf16.mxu1 %v3402_v47  ;;  %v3410_v42 = vld [vmem:[%s4104_s3 + $0x210] sm:$0xff]   ;;  %v2830_v21 = vrot.slane %v2237_v44, 9 }
  0xa5   : > { %3207 = vmatprep.subr.bf16.mxu0 %v3401_v38 }
  0xa6   : > { %v2267_v9 = vsel %vm3819_vm11, %v2830_v21, %v2266_v3 }
  0xa7   : > { %3114 = vmatpush3.bf16.msra.mxu1 %v3402_v47  ;;  %v2853_v24 = vcombine.low %v2263_v63, %v2267_v9  ;;  %v3414_v47 = vld [vmem:[%s4104_s3 + $0x230] sm:$0xff]  }
  0xa8   : > { %3208 = vmatpush3.bf16.msra.mxu0 %v3401_v38  ;;  %3243 = vmatprep.subr.bf16.mxu1 %v3406_v57  ;;  %v2242_v38 = vld [vmem:[#allocation2 + $0x40] sm:$0xe] }
  0xa9   : > { %3209 = vmatprep.subr.bf16.mxu0 %v3403_v40  ;;  %v2835_v60 = vrot.slane %v2242_v38, 9 }
  0xaa   : > { %3116 = vmatmul.mubr.bf16.vlgmr.msra.gmra.mrb[0].mxu1 %v3405_v5 }
  0xab   : > { %3251 = vmatpush3.bf16.msra.mxu1 %v3406_v57  ;;  %3119 = vmatprep.mubr.bf16.mxu1 %v3408_v8  ;;  %v2287_v32 = vsel %vm3819_vm11, %v2835_v60, %v2286_v62 }
  0xac   : > { %3210 = vmatpush3.bf16.msra.mxu0 %v3403_v40  ;;  %3244 = vmatprep.subr.bf16.mxu1 %v3407_v11  ;;  %v2271_v40 = vsel %vm3819_vm11, %v2831_v39, %v2270_v37 }
  0xad   : > { %3219 = vmatprep.subr.bf16.mxu0 %v3406_v57  ;;  %v2854_v20 = vcombine.low %v2271_v40, %v2275_v1 }
  0xaf   : > { %3212 = vmatmul.mubr.bf16.vlgmr.msra.gmra.mrb[0].mxu0 %v2818_v10  ;;  %3252 = vmatpush3.bf16.msra.mxu1 %v3407_v11 }
  0xb0   : > { %3220 = vmatpush3.bf16.msra.mxu0 %v3406_v57  ;;  %3215 = vmatprep.mubr.bf16.mxu0 %v2819_v6  ;;  %v2856_v57 = vcombine.low %v2287_v32, %v2291_v61 }
  0xb1   : > { %3221 = vmatprep.subr.bf16.mxu0 %v3407_v11  ;;  %3245 = vmatprep.subr.bf16.mxu1 %v3410_v42 }
  0xb2   : > { %3120 = vmatmul.mubr.bf16.gmra.mrb[4].mxu1 %v3409_v45 }
  0xb3   : > { %3253 = vmatpush3.bf16.msra.mxu1 %v3410_v42  ;;  %3239 = vmatprep.mubr.bf16.mxu1 %v2855_v59 }
  0xb4   : > { %3222 = vmatpush3.bf16.msra.mxu0 %v3407_v11  ;;  %3246 = vmatprep.subr.bf16.mxu1 %v3411_v28 }
  0xb5   : > { %3223 = vmatprep.subr.bf16.mxu0 %v3410_v42 }
  0xb7   : > { %3216 = vmatmul.mubr.bf16.gmra.mrb[4].mxu0 %v2820_v23  ;;  %3254 = vmatpush3.bf16.msra.mxu1 %v3411_v28 }
  0xb8   : > { %3224 = vmatpush3.bf16.msra.mxu0 %v3410_v42  ;;  %3247 = vmatprep.subr.bf16.mxu1 %v3412_v27 }
  0xb9   : > { %3225 = vmatprep.subr.bf16.mxu0 %v3411_v28  ;;  %3235 = vmatprep.mubr.bf16.mxu0 %v2853_v24 }
  0xbb   : > { %3255 = vmatpush3.bf16.msra.mxu1 %v3412_v27 }
  0xbc   : > { %3226 = vmatpush3.bf16.msra.mxu0 %v3411_v28  ;;  %3248 = vmatprep.subr.bf16.mxu1 %v3413_v33 }
  0xbd   : > { %3227 = vmatprep.subr.bf16.mxu0 %v3412_v27 }
  0xbf   : > { %3256 = vmatpush3.bf16.msra.mxu1 %v3413_v33 }
  0xc0   : > { %3228 = vmatpush3.bf16.msra.mxu0 %v3412_v27  ;;  %3249 = vmatprep.subr.bf16.mxu1 %v3414_v47 }
  0xc1   : > { %3229 = vmatprep.subr.bf16.mxu0 %v3413_v33 }
  0xc3   : > { %3257 = vmatpush3.bf16.msra.mxu1 %v3414_v47 }
  0xc4   : > { %3230 = vmatpush3.bf16.msra.mxu0 %v3413_v33  ;;  %3250 = vmatprep.subr.bf16.mxu1 %v3415_v4 }
  0xc5   : > { %3231 = vmatprep.subr.bf16.mxu0 %v3414_v47 }
  0xc7   : > { %3258 = vmatpush3.bf16.msra.mxu1 %v3415_v4 }
  0xc8   : > { %3232 = vmatpush3.bf16.msra.mxu0 %v3414_v47 }
  0xc9   : > { %3233 = vmatprep.subr.bf16.mxu0 %v3415_v4 }
  0xca   : > { %3240 = vmatmul.mubr.bf16.vlgmr.msra.gmra.mrb[8].mxu1 %v2856_v57 }
  0xcc   : > { %3234 = vmatpush3.bf16.msra.mxu0 %v3415_v4 }
  0xcf   : > { %3236 = vmatmul.mubr.bf16.vlgmr.msra.gmra.mrb[0].mxu0 %v2854_v20 }
 0x17d   : > { %v3117_v5 = vpop.f32.mrb[0].mxu1 }
 0x17e   : > { %v1252_v25 = vpop.f32.mrb[1].mxu1 }
 0x17f   : > { %v3118_v52 = vpop.f32.mrb[2].mxu1 }
 0x180   : > { %v1255_v56 = vpop.f32.mrb[3].mxu1 }
 0x185   : > { %v3121_v48 = vpop.f32.mrb[4].mxu1 }
 0x186   : > { %v1268_v15 = vpop.f32.mrb[5].mxu1 }
 0x187   : > { %v3122_v16 = vpop.f32.mrb[6].mxu1 }
 0x188   : > { %v1271_v8 = vpop.f32.mrb[7].mxu1 }
 0x18a   : > { %v3217_v14 = vpop.f32.mrb[4].mxu0 }
 0x18b   : > { %v3263_v22 = vadd.f32 %v3217_v14, %v3121_v48  ;;  %v2213_v18 = vpop.f32.mrb[5].mxu0 }
 0x18c   : > { %v3265_v36 = vadd.f32 %v2213_v18, %v1268_v15  ;;  %v3218_v55 = vpop.f32.mrb[6].mxu0 }
 0x18d   : > { %v3267_v11 = vadd.f32 %v3218_v55, %v3122_v16  ;;  %v2216_v26 = vpop.f32.mrb[7].mxu0 }
 0x18e   : > { %v3269_v35 = vadd.f32 %v2216_v26, %v1271_v8 }
 0x19d   : > { %v3241_v46 = vpop.f32.mrb[8].mxu1 }
 0x19e   : > { %v3264_v41 = vadd.f32 %v3263_v22, %v3241_v46  ;;  %v2423_v10 = vpop.f32.mrb[9].mxu1 }
 0x19f   : > { %v3266_v6 = vadd.f32 %v3265_v36, %v2423_v10  ;;  %v3242_v31 = vpop.f32.mrb[10].mxu1 }
 0x1a0   : > { %v3268_v7 = vadd.f32 %v3267_v11, %v3242_v31  ;;  %v2426_v58 = vpop.f32.mrb[11].mxu1  ;;  %v2481_v4 = vmul.f32 %v3264_v41, %v3264_v41 }
 0x1a1   : > { %v3270_v44 = vadd.f32 %v3269_v35, %v2426_v58  ;;  %v2479_v38 = vmul.f32 %v3266_v6, %v3266_v6 }
 0x1a2   : > { %v3237_v29 = vpop.f32.mrb[0].mxu0  ;;  %v2911_v50 = vpack.c.bf16 %v3268_v7, %v3264_v41  ;;  %v2482_v32 = vmul.f32 %v3268_v7, %v3268_v7 }
 0x1a3   : > { %v3259_v13 = vadd.f32 %v3237_v29, %v3117_v5  ;;  %v2407_v12 = vpop.f32.mrb[1].mxu0  ;;  %v2906_v42 = vpack.c.bf16 %v3270_v44, %v3266_v6  ;;  %v2480_v60 = vmul.f32 %v3270_v44, %v3270_v44 }
 0x1a4   : > { %v3260_v45 = vadd.f32 %v2407_v12, %v1252_v25  ;;  %v3238_v54 = vpop.f32.mrb[2].mxu0  ;;  %2918 = vst [vmem:[%s231_s20 + $0x18] sm:$0xff] %v2911_v50  }
 0x1a5   : > { %v3261_v17 = vadd.f32 %v3238_v54, %v3118_v52  ;;  %v2410_v21 = vpop.f32.mrb[3].mxu0  ;;  %2917 = vst [vmem:[%s231_s20 + $0x10] sm:$0xff] %v2906_v42   ;;  %v2477_v9 = vmul.f32 %v3259_v13, %v3259_v13 }
 0x1a6   : > { %v3262_v3 = vadd.f32 %v2410_v21, %v1255_v56  ;;  %v2475_v2 = vmul.f32 %v3260_v45, %v3260_v45 }
 0x1a7   : > { %v2901_v59 = vpack.c.bf16 %v3261_v17, %v3259_v13  ;;  %v2478_v24 = vmul.f32 %v3261_v17, %v3261_v17 }
 0x1a8   : > { %v2896_v19 = vpack.c.bf16 %v3262_v3, %v3260_v45  ;;  %v2462_v28 = vadd.f32 %v3262_v3, %v3260_v45  ;;  %v2476_v63 = vmul.f32 %v3262_v3, %v3262_v3 }
 0x1a9   : > { %2916 = vst [vmem:[%s231_s20 + $0x8] sm:$0xff] %v2901_v59  }
 0x1aa   : > { %2897 = vst [vmem:[%s231_s20] sm:$0xff] %v2896_v19   ;;  %v2463_v23 = vadd.f32 %v3259_v13, %v2462_v28  ;;  %v2483_v27 = vadd.f32 %v2476_v63, %v2475_v2 }
 0x1ac   : > { %v2484_v33 = vadd.f32 %v2483_v27, %v2477_v9  ;;  %v2464_v47 = vadd.f32 %v3261_v17, %v2463_v23 }
 0x1ae   : > { %v2465_v49 = vadd.f32 %v3266_v6, %v2464_v47  ;;  %v2485_v62 = vadd.f32 %v2484_v33, %v2478_v24 }
 0x1b0   : > { %v2466_v30 = vadd.f32 %v3270_v44, %v2465_v49  ;;  %v2486_v53 = vadd.f32 %v2485_v62, %v2479_v38 }
 0x1b2   : > { %v2467_v43 = vadd.f32 %v3264_v41, %v2466_v30  ;;  %v2487_v0 = vadd.f32 %v2486_v53, %v2480_v60 }
 0x1b4   : > { %v2468_v61 = vadd.f32 %v3268_v7, %v2467_v43  ;;  %v2488_v39 = vadd.f32 %v2487_v0, %v2481_v4 }
 0x1b6   : > { %v2469_v37 = vrot.slane %v2468_v61, 4  ;;  %v2489_v51 = vadd.f32 %v2488_v39, %v2482_v32 }
 0x1b8   : > { %v2470_v34 = vadd.f32 %v2469_v37, %v2468_v61  ;;  %v2490_v57 = vrot.slane %v2489_v51, 4 }
 0x1ba   : > { %v2471_v40 = vrot.slane %v2470_v34, 2  ;;  %v2491_v1 = vadd.f32 %v2490_v57, %v2489_v51 }
 0x1bc   : > { %v2472_v20 = vadd.f32 %v2471_v40, %v2470_v34  ;;  %v2492_v5 = vrot.slane %v2491_v1, 2 }
 0x1be   : > { %v2473_v25 = vrot.slane %v2472_v20, 1  ;;  %v2493_v52 = vadd.f32 %v2492_v5, %v2491_v1 }
 0x1c0   : > { %v2494_v56 = vrot.slane %v2493_v52, 1  ;;  %v2474_v48 = vadd.f32 %v2473_v25, %v2472_v20 }
 0x1c2   : > { %v2495_v15 = vadd.f32 %v2494_v56, %v2493_v52 }
 0x1c4   : > { %v2497_v16 = vsel %vm430_vm1, %v2474_v48, %v2495_v15 }
 0x1c5   : > { %2498 = vst [vmem:[%s235_s23] sm:$0x3] %v2497_v16 }
 0x1c6 PF: > { %s16_s18 = sadd.s32 1, %s3422_s18  }
 0x1c7   : > { %p13_p4 = scmp.ge.s32.totalorder %s16_s18, 4  }
 0x1c9   :  { %15 = sbr.rel (!%p13_p4) target bundleno = 1 (0x1), region = 88 }

</bundles_post_ra>
